<compile_context>
chip_gen: v5e
topology: v5e:2x2
jax: 0.10.0
libtpu: 0.0.40
codegen_flags: <defaults>
</compile_context>

<pallas_src>
import functools

import jax
import jax.numpy as jnp
from jax.experimental import pallas as pl
from jax.experimental.pallas import tpu as pltpu


# ---------------------------------------------------------------------------
# helpers
# ---------------------------------------------------------------------------
def _round_up(x, m):
    return (x + m - 1) // m * m


def _best_tile(d, target, align):
    """`d` is a multiple of `align`. Largest tile <= target that is a multiple
    of `align` and divides `d`."""
    if d <= target:
        return d
    t = (target // align) * align
    while t > align:
        if d % t == 0:
            return t
        t -= align
    return align


def _pick_tile(d, target, align):
    """Return (tile, padded_d). Prefer a divisor of round_up(d, align) close
    to `target`; if only a degenerate divisor exists, use `target` itself and
    pad d up to a multiple of it (avoids silently tiny tiles)."""
    da = _round_up(d, align)
    if da <= target:
        return da, da
    t = _best_tile(da, target, align)
    if t >= target // 2:
        return t, da
    t = (target // align) * align
    return t, _round_up(da, t)


def _conv_out(s, k, st):
    return (s - (k - 1) - 1) // st + 1


def _default_fc_h_split():
    """Use both TensorCores for the FC head on v7x (2 TC/chip); 1 elsewhere."""
    try:
        kind = jax.devices()[0].device_kind.lower()
    except Exception:
        return 1
    return 2 if ("v7" in kind or "7x" in kind) else 1


# ---------------------------------------------------------------------------
# Pallas kernel 1: single-K-block matmul + bias + (optional) ReLU
#   grid = (M/tm, N/tn); whole K fits one block for every conv layer here,
#   so there is no accumulator scratch / K pipeline at all.
# ---------------------------------------------------------------------------
def _matmul_bias_act_kernel(x_ref, w_ref, b_ref, o_ref, *, apply_relu):
    acc = jnp.dot(x_ref[...], w_ref[...], preferred_element_type=jnp.float32)
    acc = acc + b_ref[...]                       # (tm,tn) + (1,tn)
    if apply_relu:
        acc = jnp.maximum(acc, 0.0)
    o_ref[...] = acc.astype(o_ref.dtype)


def matmul_bias_act(x, w_pad, b_pad, n_out, apply_relu, out_dtype,
                    *, tm_target=1024):
    """y = act(x @ w_pad + b_pad)[:, :n_out].

    `w_pad` (K, Na) and `b_pad` (1, Na) are pre-laid-out bf16/f32 with Na a
    multiple of 128. K is taken as one full block (no K padding needed)."""
    M, K = x.shape
    Kw, Na = w_pad.shape
    assert K == Kw, (K, Kw)
    assert Na % 128 == 0

    tm, Ma = _pick_tile(M, tm_target, 8)
    tn = Na if Na <= 256 else 128                # Na is 128 for every conv here

    xp = x.astype(jnp.bfloat16)
    if Ma != M:
        xp = jnp.pad(xp, ((0, Ma - M), (0, 0)))

    kernel = functools.partial(_matmul_bias_act_kernel, apply_relu=apply_relu)
    out = pl.pallas_call(
        kernel,
        out_shape=jax.ShapeDtypeStruct((Ma, Na), out_dtype),
        grid_spec=pltpu.PrefetchScalarGridSpec(
            num_scalar_prefetch=0,
            grid=(Ma // tm, Na // tn),
            in_specs=[
                pl.BlockSpec((tm, K), lambda i, j: (i, 0)),
                pl.BlockSpec((K, tn), lambda i, j: (0, j)),
                pl.BlockSpec((1, tn), lambda i, j: (0, j)),
            ],
            out_specs=pl.BlockSpec((tm, tn), lambda i, j: (i, j)),
        ),
        compiler_params=pltpu.CompilerParams(
            dimension_semantics=("parallel", "parallel")),
    )(xp, w_pad, b_pad)
    return out[:M, :n_out]


# ---------------------------------------------------------------------------
# Pallas kernel 2: fused FC head  y = relu(x @ w1 + b1) @ w2   (+ b2 outside)
#   fc1 K-pipelined into an f32 accumulator; fc2 (tiny) runs in the epilogue.
#   Optional h_split parallel axis splits the hidden dim across TensorCores
#   (v7x); the per-half fc2 partials are summed in the wrapper.
# ---------------------------------------------------------------------------
def _fc_head_kernel(x_ref, w1_ref, b1_ref, w2_ref, o_ref, acc_ref):
    k = pl.program_id(1)

    @pl.when(k == 0)
    def _():
        acc_ref[...] = jnp.zeros_like(acc_ref)

    acc_ref[...] += jnp.dot(x_ref[...], w1_ref[...],
                            preferred_element_type=jnp.float32)

    @pl.when(k == pl.num_programs(1) - 1)
    def _():
        h = jnp.maximum(acc_ref[...] + b1_ref[...], 0.0)
        o_ref[...] = jnp.dot(h.astype(w2_ref.dtype), w2_ref[...],
                             preferred_element_type=jnp.float32
                             ).astype(o_ref.dtype)


def fc_head(x, w1_pad, b1_pad, w2_pad, b2, *, tk_target=2048, h_split=None):
    """q = relu(x @ w1 + b1) @ w2 + b2 with pre-laid-out, pre-padded weights."""
    M, K = x.shape
    Kp, Ha = w1_pad.shape
    Ha2, Aa = w2_pad.shape
    assert Ha == Ha2
    A = b2.shape[0]

    if h_split is None:
        h_split = _default_fc_h_split()
    if Ha % (h_split * 128) != 0:
        h_split = 1
    Hh = Ha // h_split

    tk, kp_expect = _pick_tile(K, tk_target, 128)
    assert kp_expect == Kp, (kp_expect, Kp)

    Ma = _round_up(M, 8)
    xp = x.astype(jnp.bfloat16)
    if (Ma, Kp) != (M, K):
        xp = jnp.pad(xp, ((0, Ma - M), (0, Kp - K)))

    partial = pl.pallas_call(
        _fc_head_kernel,
        out_shape=jax.ShapeDtypeStruct((h_split, Ma, Aa), jnp.float32),
        grid_spec=pltpu.PrefetchScalarGridSpec(
            num_scalar_prefetch=0,
            grid=(h_split, Kp // tk),
            in_specs=[
                pl.BlockSpec((Ma, tk), lambda s, k: (0, k)),
                pl.BlockSpec((tk, Hh), lambda s, k: (k, s)),
                pl.BlockSpec((1, Hh), lambda s, k: (0, s)),
                pl.BlockSpec((Hh, Aa), lambda s, k: (s, 0)),
            ],
            out_specs=pl.BlockSpec((None, Ma, Aa), lambda s, k: (s, 0, 0)),
            scratch_shapes=[pltpu.VMEM((Ma, Hh), jnp.float32)],
        ),
        compiler_params=pltpu.CompilerParams(
            dimension_semantics=("parallel", "arbitrary")),
    )(xp, w1_pad, b1_pad, w2_pad)

    return partial.sum(axis=0)[:M, :A] + b2[None, :]


# ---------------------------------------------------------------------------
# Conv2d (PyTorch semantics, valid padding) via NHWC im2col + Pallas matmul.
# ---------------------------------------------------------------------------
def _im2col_nhwc(x, ksize, stride):
    """x: (N,H,W,C) -> (N*Ho*Wo, K*K*C); patch flattened as (kh, kw, C)."""
    n, h, w, c = x.shape
    ho = (h - ksize) // stride + 1
    wo = (w - ksize) // stride + 1
    r = jnp.arange(ho)[:, None] * stride + jnp.arange(ksize)[None, :]   # (Ho,K)
    s = jnp.arange(wo)[:, None] * stride + jnp.arange(ksize)[None, :]   # (Wo,K)
    patches = x[:, r[:, None, :, None], s[None, :, None, :], :]
    return patches.reshape(n * ho * wo, ksize * ksize * c), ho, wo
    # TODO(synk): fuse the patch extraction into the Pallas kernel (scalar-
    # prefetch row offsets / Element index_map) to avoid materializing the
    # im2col matrix in HBM.


def conv2d_relu_nhwc(x, w2d_pad, b_pad, cout, ksize, stride):
    """x NHWC bf16, pre-laid-out weight (K*K*Cin, Na) bf16; returns NHWC bf16."""
    n = x.shape[0]
    cols, ho, wo = _im2col_nhwc(x, ksize, stride)
    out = matmul_bias_act(cols, w2d_pad, b_pad, n_out=cout, apply_relu=True,
                          out_dtype=jnp.bfloat16)
    return out.reshape(n, ho, wo, cout)


# ---------------------------------------------------------------------------
# Parameters (deterministic, xavier-uniform like the PyTorch module)
# ---------------------------------------------------------------------------
def _xavier_uniform(key, shape, fan_in, fan_out):
    bound = jnp.sqrt(6.0 / (fan_in + fan_out))
    return jax.random.uniform(key, shape, jnp.float32, -bound, bound)


def init_dqn_params(key, in_channels=12, num_actions=2, h=256, w=144):
    convh = _conv_out(_conv_out(_conv_out(h, 8, 4), 4, 2), 3, 1)
    convw = _conv_out(_conv_out(_conv_out(w, 8, 4), 4, 2), 3, 1)
    lin_in = convh * convw * 64
    keys = jax.random.split(key, 10)
    p = {}
    p["conv1_w"] = _xavier_uniform(keys[0], (32, in_channels, 8, 8),
                                   in_channels * 8 * 8, 32 * 8 * 8)
    p["conv1_b"] = jax.random.uniform(keys[1], (32,), jnp.float32, -0.05, 0.05)
    p["conv2_w"] = _xavier_uniform(keys[2], (64, 32, 4, 4), 32 * 16, 64 * 16)
    p["conv2_b"] = jax.random.uniform(keys[3], (64,), jnp.float32, -0.05, 0.05)
    p["conv3_w"] = _xavier_uniform(keys[4], (64, 64, 3, 3), 64 * 9, 64 * 9)
    p["conv3_b"] = jax.random.uniform(keys[5], (64,), jnp.float32, -0.05, 0.05)
    p["fc1_w"] = _xavier_uniform(keys[6], (512, lin_in), lin_in, 512)
    p["fc1_b"] = jax.random.uniform(keys[7], (512,), jnp.float32, -0.05, 0.05)
    p["fc2_w"] = _xavier_uniform(keys[8], (num_actions, 512), 512, num_actions)
    p["fc2_b"] = jax.random.uniform(keys[9], (num_actions,), jnp.float32,
                                    -0.05, 0.05)
    return p


def prepare_dqn_params(params, *, h, w, fc_tk_target=2048):
    """One-time weight layout prep (outside the jitted forward):
    conv OIHW -> (kh*kw*cin, Cout) bf16 lane-padded; fc1 columns permuted from
    PyTorch's NCHW flatten to our NHWC flatten, transposed, bf16, K/N padded;
    fc2 transposed, bf16, padded."""
    prepped = {}
    for name in ("conv1", "conv2", "conv3"):
        w_oihw = params[f"{name}_w"]
        b = params[f"{name}_b"]
        cout, cin, k, _ = w_oihw.shape
        na = _round_up(cout, 128)
        w2d = w_oihw.transpose(2, 3, 1, 0).reshape(k * k * cin, cout)
        prepped[f"{name}_w"] = jnp.pad(w2d.astype(jnp.bfloat16),
                                       ((0, 0), (0, na - cout)))
        prepped[f"{name}_b"] = jnp.pad(b.astype(jnp.float32),
                                       (0, na - cout)).reshape(1, na)

    hc = _conv_out(_conv_out(_conv_out(h, 8, 4), 4, 2), 3, 1)
    wc = _conv_out(_conv_out(_conv_out(w, 8, 4), 4, 2), 3, 1)
    cc = params["conv3_w"].shape[0]
    fc1_out, lin_in = params["fc1_w"].shape
    assert lin_in == hc * wc * cc, (lin_in, hc, wc, cc)

    # Permute fc1 columns so semantics match PyTorch's x.view(x.size(0), -1)
    # (NCHW flatten) applied to our NHWC activations.
    w1 = (params["fc1_w"].reshape(fc1_out, cc, hc, wc)
          .transpose(0, 2, 3, 1).reshape(fc1_out, lin_in).T)        # (lin_in,512)
    _, kp = _pick_tile(lin_in, fc_tk_target, 128)
    ha = _round_up(fc1_out, 128)
    prepped["fc1_w"] = jnp.pad(w1.astype(jnp.bfloat16),
                               ((0, kp - lin_in), (0, ha - fc1_out)))
    prepped["fc1_b"] = jnp.pad(params["fc1_b"].astype(jnp.float32),
                               (0, ha - fc1_out)).reshape(1, ha)

    num_actions = params["fc2_w"].shape[0]
    aa = _round_up(num_actions, 128)
    w2 = params["fc2_w"].T                                          # (512, A)
    prepped["fc2_w"] = jnp.pad(w2.astype(jnp.bfloat16),
                               ((0, ha - fc1_out), (0, aa - num_actions)))
    prepped["fc2_b"] = params["fc2_b"].astype(jnp.float32)
    return prepped


# ---------------------------------------------------------------------------
# DQN forward (matches the PyTorch forward; bn1..bn4 unused there => omitted)
# ---------------------------------------------------------------------------
_CONV_CFG = ((8, 4, 32), (4, 2, 64), (3, 1, 64))   # (kernel, stride, Cout)


def dqn_forward(prepped, x_nchw):
    x = x_nchw.transpose(0, 2, 3, 1).astype(jnp.bfloat16)   # NCHW->NHWC + bf16 once
    for idx, (k, st, cout) in enumerate(_CONV_CFG, start=1):
        x = conv2d_relu_nhwc(x, prepped[f"conv{idx}_w"], prepped[f"conv{idx}_b"],
                             cout=cout, ksize=k, stride=st)
    n = x.shape[0]
    x2d = x.reshape(n, -1)                                   # NHWC flatten
    return fc_head(x2d, prepped["fc1_w"], prepped["fc1_b"],
                   prepped["fc2_w"], prepped["fc2_b"])


if __name__ == "__main__":
    key = jax.random.PRNGKey(0)
    k_param, k_x = jax.random.split(key)

    # Small shapes consistent with the module (full module uses h=256, w=144).
    batch, in_channels, h, w = 2, 12, 48, 64
    num_actions = 2

    raw_params = init_dqn_params(k_param, in_channels=in_channels,
                                 num_actions=num_actions, h=h, w=w)
    params = prepare_dqn_params(raw_params, h=h, w=w)        # one-time layout prep
    x = jax.random.normal(k_x, (batch, in_channels, h, w), jnp.float32)

    q = jax.jit(dqn_forward)(params, x)
    jax.block_until_ready(q)
    assert q.shape == (batch, num_actions), q.shape
    print("KERNEL_OK")
</pallas_src>

<mosaic_0001>
module attributes {stable_mosaic.version = 11 : i64} {
  func.func @_matmul_bias_act_kernel(%arg0: i32, %arg1: i32, %arg2: memref<336x768xbf16, #tpu.memory_space<vmem>>, %arg3: memref<768x128xbf16, #tpu.memory_space<vmem>>, %arg4: memref<1x128xf32, #tpu.memory_space<vmem>>, %arg5: memref<336x128xbf16, #tpu.memory_space<vmem>>) attributes {dimension_semantics = [#tpu.dimension_semantics<parallel>, #tpu.dimension_semantics<parallel>], iteration_bounds = array<i64: 1, 1>, scalar_prefetch = 0 : i64, scratch_operands = 0 : i64, tpu.core_type = #tpu.core_type<tc>, window_params = [{transform_indices = @transform_0, window_bounds = array<i64: 336, 768>}, {transform_indices = @transform_1, window_bounds = array<i64: 768, 128>}, {transform_indices = @transform_2, window_bounds = array<i64: 1, 128>}, {transform_indices = @transform_3, window_bounds = array<i64: 336, 128>}]} {
    %c0 = arith.constant 0 : index
    %c0_0 = arith.constant 0 : index
    %0 = vector.load %arg2[%c0, %c0_0] : memref<336x768xbf16, #tpu.memory_space<vmem>>, vector<336x768xbf16>
    %c0_1 = arith.constant 0 : index
    %c0_2 = arith.constant 0 : index
    %1 = vector.load %arg3[%c0_1, %c0_2] : memref<768x128xbf16, #tpu.memory_space<vmem>>, vector<768x128xbf16>
    %cst = arith.constant dense<0.000000e+00> : vector<336x128xf32>
    %2 = tpu.matmul %0, %1, %cst {dimension_numbers = #tpu.dot_dimension_numbers<[1], [0], [0], [1], [0, 0, 1, 1], [], []>} : vector<336x768xbf16>, vector<768x128xbf16>, vector<336x128xf32> -> vector<336x128xf32>
    %c0_3 = arith.constant 0 : index
    %c0_4 = arith.constant 0 : index
    %3 = vector.load %arg4[%c0_3, %c0_4] : memref<1x128xf32, #tpu.memory_space<vmem>>, vector<1x128xf32>
    %4 = vector.broadcast %3 : vector<1x128xf32> to vector<336x128xf32>
    %5 = arith.addf %2, %4 : vector<336x128xf32>
    %cst_5 = arith.constant 0.000000e+00 : f32
    %6 = vector.broadcast %cst_5 : f32 to vector<336x128xf32>
    %7 = arith.maximumf %5, %6 : vector<336x128xf32>
    %8 = arith.truncf %7 : vector<336x128xf32> to vector<336x128xbf16>
    %c0_6 = arith.constant 0 : index
    %c0_7 = arith.constant 0 : index
    %9 = vector.load %arg5[%c0_6, %c0_7] : memref<336x128xbf16, #tpu.memory_space<vmem>>, vector<336x128xbf16>
    tpu.vector_store %arg5[%c0_6, %c0_7], %8 {strides = array<i32>} : memref<336x128xbf16, #tpu.memory_space<vmem>>, vector<336x128xbf16>,
    return
  }
  func.func @transform_0(%arg0: i32, %arg1: i32) -> (i32, i32) {
    %c0_i32 = arith.constant 0 : i32
    %c0_i32_0 = arith.constant 0 : i32
    return %arg0, %c0_i32 : i32, i32
  }
  func.func @transform_1(%arg0: i32, %arg1: i32) -> (i32, i32) {
    %c0_i32 = arith.constant 0 : i32
    %c0_i32_0 = arith.constant 0 : i32
    return %c0_i32, %arg1 : i32, i32
  }
  func.func @transform_2(%arg0: i32, %arg1: i32) -> (i32, i32) {
    %c0_i32 = arith.constant 0 : i32
    %c0_i32_0 = arith.constant 0 : i32
    return %c0_i32, %arg1 : i32, i32
  }
  func.func @transform_3(%arg0: i32, %arg1: i32) -> (i32, i32) {
    %c0_i32 = arith.constant 0 : i32
    return %arg0, %arg1 : i32, i32
  }
}

module attributes {stable_mosaic.version = 11 : i64} {
  func.func @_matmul_bias_act_kernel(%arg0: i32, %arg1: i32, %arg2: memref<48x512xbf16, #tpu.memory_space<vmem>>, %arg3: memref<512x128xbf16, #tpu.memory_space<vmem>>, %arg4: memref<1x128xf32, #tpu.memory_space<vmem>>, %arg5: memref<48x128xbf16, #tpu.memory_space<vmem>>) attributes {dimension_semantics = [#tpu.dimension_semantics<parallel>, #tpu.dimension_semantics<parallel>], iteration_bounds = array<i64: 1, 1>, scalar_prefetch = 0 : i64, scratch_operands = 0 : i64, tpu.core_type = #tpu.core_type<tc>, window_params = [{transform_indices = @transform_0, window_bounds = array<i64: 48, 512>}, {transform_indices = @transform_1, window_bounds = array<i64: 512, 128>}, {transform_indices = @transform_2, window_bounds = array<i64: 1, 128>}, {transform_indices = @transform_3, window_bounds = array<i64: 48, 128>}]} {
    %c0 = arith.constant 0 : index
    %c0_0 = arith.constant 0 : index
    %0 = vector.load %arg2[%c0, %c0_0] : memref<48x512xbf16, #tpu.memory_space<vmem>>, vector<48x512xbf16>
    %c0_1 = arith.constant 0 : index
    %c0_2 = arith.constant 0 : index
    %1 = vector.load %arg3[%c0_1, %c0_2] : memref<512x128xbf16, #tpu.memory_space<vmem>>, vector<512x128xbf16>
    %cst = arith.constant dense<0.000000e+00> : vector<48x128xf32>
    %2 = tpu.matmul %0, %1, %cst {dimension_numbers = #tpu.dot_dimension_numbers<[1], [0], [0], [1], [0, 0, 1, 1], [], []>} : vector<48x512xbf16>, vector<512x128xbf16>, vector<48x128xf32> -> vector<48x128xf32>
    %c0_3 = arith.constant 0 : index
    %c0_4 = arith.constant 0 : index
    %3 = vector.load %arg4[%c0_3, %c0_4] : memref<1x128xf32, #tpu.memory_space<vmem>>, vector<1x128xf32>
    %4 = vector.broadcast %3 : vector<1x128xf32> to vector<48x128xf32>
    %5 = arith.addf %2, %4 : vector<48x128xf32>
    %cst_5 = arith.constant 0.000000e+00 : f32
    %6 = vector.broadcast %cst_5 : f32 to vector<48x128xf32>
    %7 = arith.maximumf %5, %6 : vector<48x128xf32>
    %8 = arith.truncf %7 : vector<48x128xf32> to vector<48x128xbf16>
    %c0_6 = arith.constant 0 : index
    %c0_7 = arith.constant 0 : index
    %9 = vector.load %arg5[%c0_6, %c0_7] : memref<48x128xbf16, #tpu.memory_space<vmem>>, vector<48x128xbf16>
    tpu.vector_store %arg5[%c0_6, %c0_7], %8 {strides = array<i32>} : memref<48x128xbf16, #tpu.memory_space<vmem>>, vector<48x128xbf16>,
    return
  }
  func.func @transform_0(%arg0: i32, %arg1: i32) -> (i32, i32) {
    %c0_i32 = arith.constant 0 : i32
    %c0_i32_0 = arith.constant 0 : i32
    return %arg0, %c0_i32 : i32, i32
  }
  func.func @transform_1(%arg0: i32, %arg1: i32) -> (i32, i32) {
    %c0_i32 = arith.constant 0 : i32
    %c0_i32_0 = arith.constant 0 : i32
    return %c0_i32, %arg1 : i32, i32
  }
  func.func @transform_2(%arg0: i32, %arg1: i32) -> (i32, i32) {
    %c0_i32 = arith.constant 0 : i32
    %c0_i32_0 = arith.constant 0 : i32
    return %c0_i32, %arg1 : i32, i32
  }
  func.func @transform_3(%arg0: i32, %arg1: i32) -> (i32, i32) {
    %c0_i32 = arith.constant 0 : i32
    return %arg0, %arg1 : i32, i32
  }
}

module attributes {stable_mosaic.version = 11 : i64} {
  func.func @_matmul_bias_act_kernel(%arg0: i32, %arg1: i32, %arg2: memref<16x576xbf16, #tpu.memory_space<vmem>>, %arg3: memref<576x128xbf16, #tpu.memory_space<vmem>>, %arg4: memref<1x128xf32, #tpu.memory_space<vmem>>, %arg5: memref<16x128xbf16, #tpu.memory_space<vmem>>) attributes {dimension_semantics = [#tpu.dimension_semantics<parallel>, #tpu.dimension_semantics<parallel>], iteration_bounds = array<i64: 1, 1>, scalar_prefetch = 0 : i64, scratch_operands = 0 : i64, tpu.core_type = #tpu.core_type<tc>, window_params = [{transform_indices = @transform_0, window_bounds = array<i64: 16, 576>}, {transform_indices = @transform_1, window_bounds = array<i64: 576, 128>}, {transform_indices = @transform_2, window_bounds = array<i64: 1, 128>}, {transform_indices = @transform_3, window_bounds = array<i64: 16, 128>}]} {
    %c0 = arith.constant 0 : index
    %c0_0 = arith.constant 0 : index
    %0 = vector.load %arg2[%c0, %c0_0] : memref<16x576xbf16, #tpu.memory_space<vmem>>, vector<16x576xbf16>
    %c0_1 = arith.constant 0 : index
    %c0_2 = arith.constant 0 : index
    %1 = vector.load %arg3[%c0_1, %c0_2] : memref<576x128xbf16, #tpu.memory_space<vmem>>, vector<576x128xbf16>
    %cst = arith.constant dense<0.000000e+00> : vector<16x128xf32>
    %2 = tpu.matmul %0, %1, %cst {dimension_numbers = #tpu.dot_dimension_numbers<[1], [0], [0], [1], [0, 0, 1, 1], [], []>} : vector<16x576xbf16>, vector<576x128xbf16>, vector<16x128xf32> -> vector<16x128xf32>
    %c0_3 = arith.constant 0 : index
    %c0_4 = arith.constant 0 : index
    %3 = vector.load %arg4[%c0_3, %c0_4] : memref<1x128xf32, #tpu.memory_space<vmem>>, vector<1x128xf32>
    %4 = vector.broadcast %3 : vector<1x128xf32> to vector<16x128xf32>
    %5 = arith.addf %2, %4 : vector<16x128xf32>
    %cst_5 = arith.constant 0.000000e+00 : f32
    %6 = vector.broadcast %cst_5 : f32 to vector<16x128xf32>
    %7 = arith.maximumf %5, %6 : vector<16x128xf32>
    %8 = arith.truncf %7 : vector<16x128xf32> to vector<16x128xbf16>
    %c0_6 = arith.constant 0 : index
    %c0_7 = arith.constant 0 : index
    %9 = vector.load %arg5[%c0_6, %c0_7] : memref<16x128xbf16, #tpu.memory_space<vmem>>, vector<16x128xbf16>
    tpu.vector_store %arg5[%c0_6, %c0_7], %8 {strides = array<i32>} : memref<16x128xbf16, #tpu.memory_space<vmem>>, vector<16x128xbf16>,
    return
  }
  func.func @transform_0(%arg0: i32, %arg1: i32) -> (i32, i32) {
    %c0_i32 = arith.constant 0 : i32
    %c0_i32_0 = arith.constant 0 : i32
    return %arg0, %c0_i32 : i32, i32
  }
  func.func @transform_1(%arg0: i32, %arg1: i32) -> (i32, i32) {
    %c0_i32 = arith.constant 0 : i32
    %c0_i32_0 = arith.constant 0 : i32
    return %c0_i32, %arg1 : i32, i32
  }
  func.func @transform_2(%arg0: i32, %arg1: i32) -> (i32, i32) {
    %c0_i32 = arith.constant 0 : i32
    %c0_i32_0 = arith.constant 0 : i32
    return %c0_i32, %arg1 : i32, i32
  }
  func.func @transform_3(%arg0: i32, %arg1: i32) -> (i32, i32) {
    %c0_i32 = arith.constant 0 : i32
    return %arg0, %arg1 : i32, i32
  }
}

module attributes {stable_mosaic.version = 11 : i64} {
  func.func @_fc_head_kernel(%arg0: i32, %arg1: i32, %arg2: memref<8x512xbf16, #tpu.memory_space<vmem>>, %arg3: memref<512x512xbf16, #tpu.memory_space<vmem>>, %arg4: memref<1x512xf32, #tpu.memory_space<vmem>>, %arg5: memref<512x128xbf16, #tpu.memory_space<vmem>>, %arg6: memref<1x8x128xf32, #tpu.memory_space<vmem>>, %arg7: memref<8x512xf32, #tpu.memory_space<vmem>>) attributes {dimension_semantics = [#tpu.dimension_semantics<parallel>, #tpu.dimension_semantics<arbitrary>], iteration_bounds = array<i64: 1, 1>, scalar_prefetch = 0 : i64, scratch_operands = 1 : i64, tpu.core_type = #tpu.core_type<tc>, window_params = [{transform_indices = @transform_0, window_bounds = array<i64: 8, 512>}, {transform_indices = @transform_1, window_bounds = array<i64: 512, 512>}, {transform_indices = @transform_2, window_bounds = array<i64: 1, 512>}, {transform_indices = @transform_3, window_bounds = array<i64: 512, 128>}, {transform_indices = @transform_4, window_bounds = array<i64: 1, 8, 128>}]} {
    %c0_i32 = arith.constant 0 : i32
    %0 = arith.cmpi eq, %arg1, %c0_i32 : i32
    %1 = arith.extui %0 : i1 to i32
    %c0_i32_0 = arith.constant 0 : i32
    %2 = arith.cmpi ne, %1, %c0_i32_0 : i32
    scf.if %2 {
      %cst_10 = arith.constant 0.000000e+00 : f32
      %12 = vector.broadcast %cst_10 : f32 to vector<8x512xf32>
      %c0_11 = arith.constant 0 : index
      %c0_12 = arith.constant 0 : index
      %13 = vector.load %arg7[%c0_11, %c0_12] : memref<8x512xf32, #tpu.memory_space<vmem>>, vector<8x512xf32>
      tpu.vector_store %arg7[%c0_11, %c0_12], %12 {strides = array<i32>} : memref<8x512xf32, #tpu.memory_space<vmem>>, vector<8x512xf32>,
    } else {
    }
    %c0 = arith.constant 0 : index
    %c0_1 = arith.constant 0 : index
    %3 = vector.load %arg7[%c0, %c0_1] : memref<8x512xf32, #tpu.memory_space<vmem>>, vector<8x512xf32>
    %c0_2 = arith.constant 0 : index
    %c0_3 = arith.constant 0 : index
    %4 = vector.load %arg2[%c0_2, %c0_3] : memref<8x512xbf16, #tpu.memory_space<vmem>>, vector<8x512xbf16>
    %c0_4 = arith.constant 0 : index
    %c0_5 = arith.constant 0 : index
    %5 = vector.load %arg3[%c0_4, %c0_5] : memref<512x512xbf16, #tpu.memory_space<vmem>>, vector<512x512xbf16>
    %cst = arith.constant dense<0.000000e+00> : vector<8x512xf32>
    %6 = tpu.matmul %4, %5, %cst {dimension_numbers = #tpu.dot_dimension_numbers<[1], [0], [0], [1], [0, 0, 1, 1], [], []>} : vector<8x512xbf16>, vector<512x512xbf16>, vector<8x512xf32> -> vector<8x512xf32>
    %7 = arith.addf %3, %6 : vector<8x512xf32>
    %c0_6 = arith.constant 0 : index
    %c0_7 = arith.constant 0 : index
    %8 = vector.load %arg7[%c0_6, %c0_7] : memref<8x512xf32, #tpu.memory_space<vmem>>, vector<8x512xf32>
    tpu.vector_store %arg7[%c0_6, %c0_7], %7 {strides = array<i32>} : memref<8x512xf32, #tpu.memory_space<vmem>>, vector<8x512xf32>,
    %c0_i32_8 = arith.constant 0 : i32
    %9 = arith.cmpi eq, %arg1, %c0_i32_8 : i32
    %10 = arith.extui %9 : i1 to i32
    %c0_i32_9 = arith.constant 0 : i32
    %11 = arith.cmpi ne, %10, %c0_i32_9 : i32
    scf.if %11 {
      %c0_10 = arith.constant 0 : index
      %c0_11 = arith.constant 0 : index
      %12 = vector.load %arg7[%c0_10, %c0_11] : memref<8x512xf32, #tpu.memory_space<vmem>>, vector<8x512xf32>
      %c0_12 = arith.constant 0 : index
      %c0_13 = arith.constant 0 : index
      %13 = vector.load %arg4[%c0_12, %c0_13] : memref<1x512xf32, #tpu.memory_space<vmem>>, vector<1x512xf32>
      %14 = vector.broadcast %13 : vector<1x512xf32> to vector<8x512xf32>
      %15 = arith.addf %12, %14 : vector<8x512xf32>
      %cst_14 = arith.constant 0.000000e+00 : f32
      %16 = vector.broadcast %cst_14 : f32 to vector<8x512xf32>
      %17 = arith.maximumf %15, %16 : vector<8x512xf32>
      %18 = arith.truncf %17 : vector<8x512xf32> to vector<8x512xbf16>
      %c0_15 = arith.constant 0 : index
      %c0_16 = arith.constant 0 : index
      %19 = vector.load %arg5[%c0_15, %c0_16] : memref<512x128xbf16, #tpu.memory_space<vmem>>, vector<512x128xbf16>
      %cst_17 = arith.constant dense<0.000000e+00> : vector<8x128xf32>
      %20 = tpu.matmul %18, %19, %cst_17 {dimension_numbers = #tpu.dot_dimension_numbers<[1], [0], [0], [1], [0, 0, 1, 1], [], []>} : vector<8x512xbf16>, vector<512x128xbf16>, vector<8x128xf32> -> vector<8x128xf32>
      %c0_18 = arith.constant 0 : index
      %c0_19 = arith.constant 0 : index
      %c0_20 = arith.constant 0 : index
      %21 = vector.load %arg6[%c0_18, %c0_19, %c0_20] : memref<1x8x128xf32, #tpu.memory_space<vmem>>, vector<1x8x128xf32>
      %22 = vector.shape_cast %21 : vector<1x8x128xf32> to vector<8x128xf32>
      %23 = vector.shape_cast %20 : vector<8x128xf32> to vector<1x8x128xf32>
      tpu.vector_store %arg6[%c0_18, %c0_19, %c0_20], %23 {strides = array<i32>} : memref<1x8x128xf32, #tpu.memory_space<vmem>>, vector<1x8x128xf32>,
    } else {
    }
    return
  }
  func.func @transform_0(%arg0: i32, %arg1: i32) -> (i32, i32) {
    %c0_i32 = arith.constant 0 : i32
    %c0_i32_0 = arith.constant 0 : i32
    return %c0_i32, %arg1 : i32, i32
  }
  func.func @transform_1(%arg0: i32, %arg1: i32) -> (i32, i32) {
    %c0_i32 = arith.constant 0 : i32
    return %arg1, %arg0 : i32, i32
  }
  func.func @transform_2(%arg0: i32, %arg1: i32) -> (i32, i32) {
    %c0_i32 = arith.constant 0 : i32
    %c0_i32_0 = arith.constant 0 : i32
    return %c0_i32, %arg0 : i32, i32
  }
  func.func @transform_3(%arg0: i32, %arg1: i32) -> (i32, i32) {
    %c0_i32 = arith.constant 0 : i32
    %c0_i32_0 = arith.constant 0 : i32
    return %arg0, %c0_i32 : i32, i32
  }
  func.func @transform_4(%arg0: i32, %arg1: i32) -> (i32, i32, i32) {
    %c0_i32 = arith.constant 0 : i32
    %c0_i32_0 = arith.constant 0 : i32
    %c0_i32_1 = arith.constant 0 : i32
    return %arg0, %c0_i32, %c0_i32_0 : i32, i32, i32
  }
}

</mosaic_0001>

<bundles_post_ra>
// kernel: dqn_forward.4
= control target key start
LH: loop header
LB: loop body
LE: loop exit
PB: predicated region body
PF: predicated region fallthrough
CT: control target
= control target key end

     0   :  { %s4140_s1 = inlined_call_operand.vmem [shape: bf16[768,128], index: 1, kind: input, shape index: {}]   ;;  %s4141_s2 = inlined_call_operand.vmem [shape: f32[1,128], index: 2, kind: input, shape index: {}]   ;;  %s4142_s0 = inlined_call_operand.vmem [shape: bf16[336,768], index: 0, kind: input, shape index: {}]   ;;  %s4143_s3 = inlined_call_operand.vmem [shape: bf16[336,128], index: 3, kind: output, shape index: {}]  }
   0x1   :  { %v2801_v0 = vld [vmem:[%s4140_s1 + $0x38] sm:$0xff]  ;;  %v2800_v2 = vld [vmem:[%s4140_s1 + $0x30] sm:$0xff]  ;;  %v2799_v4 = vld [vmem:[%s4140_s1 + $0x28] sm:$0xff] }
   0x2   :  { %v2809_v1 = vld [vmem:[%s4140_s1 + $0x78] sm:$0xff]  ;;  %1158 = vmatpush.bf16.msra.mxu0 %v2801_v0  ;;  %2967 = vmatpush.bf16.msra.mxu2 %v2801_v0  ;;  %v2808_v3 = vld [vmem:[%s4140_s1 + $0x70] sm:$0xff]  ;;  %v2807_v5 = vld [vmem:[%s4140_s1 + $0x68] sm:$0xff] }
   0x3   :  { %1272 = vmatpush.bf16.msra.mxu1 %v2809_v1  ;;  %2975 = vmatpush.bf16.msra.mxu3 %v2809_v1  ;;  %v2798_v6 = vld [vmem:[%s4140_s1 + $0x20] sm:$0xff]  ;;  %v2797_v8 = vld [vmem:[%s4140_s1 + $0x18] sm:$0xff]  ;;  %v2796_v10 = vld [vmem:[%s4140_s1 + $0x10] sm:$0xff] }
   0x4   :  { %v2806_v7 = vld [vmem:[%s4140_s1 + $0x60] sm:$0xff]  ;;  %v2805_v9 = vld [vmem:[%s4140_s1 + $0x58] sm:$0xff]  ;;  %v2804_v11 = vld [vmem:[%s4140_s1 + $0x50] sm:$0xff] }
   0x5   :  { %v2795_v12 = vld [vmem:[%s4140_s1 + $0x8] sm:$0xff]  ;;  %v2794_v14 = vld [vmem:[%s4140_s1] sm:$0xff]  ;;  %v2671_v17 = vld [vmem:[%s4142_s0 + $0x14] sm:$0xf0] }
   0x6   :  { %1159 = vmatpush.bf16.msra.mxu0 %v2800_v2  ;;  %2968 = vmatpush.bf16.msra.mxu2 %v2800_v2  ;;  %v2803_v13 = vld [vmem:[%s4140_s1 + $0x48] sm:$0xff]  ;;  %v2802_v15 = vld [vmem:[%s4140_s1 + $0x40] sm:$0xff]  ;;  %v2238_v18 = vld [vmem:[%s4142_s0 + $0x210] sm:$0xf] }
   0x7   :  { %1273 = vmatpush.bf16.msra.mxu1 %v2808_v3  ;;  %2976 = vmatpush.bf16.msra.mxu3 %v2808_v3  ;;  %v1974_v16 = vld [vmem:[%s4142_s0] sm:$0xf]  ;;  %v2737_v19 = vld [vmem:[%s4142_s0 + $0x224] sm:$0xf0]  ;;  %v2668_v20 = vld [vmem:[%s4142_s0 + $0x4] sm:$0xf] }
   0x8   :  { %v1976_v21 = vld [vmem:[%s4142_s0 + $0x18] sm:$0xf0]  ;;  %v2734_v22 = vld [vmem:[%s4142_s0 + $0x214] sm:$0xf]  ;;  %v2240_v23 = vld [vmem:[%s4142_s0 + $0x228] sm:$0xf0]  ;;  %v1975_v26 = vor.u32 %v2671_v17, %v1974_v16  ;;  %v2239_v27 = vor.u32 %v2737_v19, %v2238_v18 }
   0x9   :  { %v2833_v24 = vld [vmem:[%s4140_s1 + $0x138] sm:$0xff]  ;;  %v1979_v28 = vor.u32 %v2668_v20, %v1976_v21  ;;  %v2243_v29 = vor.u32 %v2734_v22, %v2240_v23  ;;  %v2832_v32 = vld [vmem:[%s4140_s1 + $0x130] sm:$0xff]  ;;  %v2831_v36 = vld [vmem:[%s4140_s1 + $0x128] sm:$0xff] }
   0xa   :  { %1160 = vmatpush.bf16.msra.mxu0 %v2799_v4  ;;  %2969 = vmatpush.bf16.msra.mxu2 %v2799_v4  ;;  %v2841_v25 = vld [vmem:[%s4140_s1 + $0x178] sm:$0xff]  ;;  %v2840_v33 = vld [vmem:[%s4140_s1 + $0x170] sm:$0xff]  ;;  %v2839_v37 = vld [vmem:[%s4140_s1 + $0x168] sm:$0xff] }
   0xb   :  { %1274 = vmatpush.bf16.msra.mxu1 %v2807_v5  ;;  %2977 = vmatpush.bf16.msra.mxu3 %v2807_v5  ;;  %v2817_v30 = vld [vmem:[%s4140_s1 + $0xb8] sm:$0xff]  ;;  %v2816_v34 = vld [vmem:[%s4140_s1 + $0xb0] sm:$0xff]  ;;  %v2815_v38 = vld [vmem:[%s4140_s1 + $0xa8] sm:$0xff] }
   0xc   :  { %v2825_v31 = vld [vmem:[%s4140_s1 + $0xf8] sm:$0xff]  ;;  %v2824_v35 = vld [vmem:[%s4140_s1 + $0xf0] sm:$0xff]  ;;  %v2677_v40 = vld [vmem:[%s4142_s0 + $0x44] sm:$0xf0] }
   0xd   :  { %v1998_v39 = vld [vmem:[%s4142_s0 + $0x30] sm:$0xf]  ;;  %v2262_v41 = vld [vmem:[%s4142_s0 + $0x240] sm:$0xf]  ;;  %v2743_v42 = vld [vmem:[%s4142_s0 + $0x254] sm:$0xf0] }
   0xe   :  { %1161 = vmatpush.bf16.msra.mxu0 %v2798_v6  ;;  %2970 = vmatpush.bf16.msra.mxu2 %v2798_v6  ;;  %v2674_v43 = vld [vmem:[%s4142_s0 + $0x34] sm:$0xf]  ;;  %v2000_v44 = vld [vmem:[%s4142_s0 + $0x48] sm:$0xf0]  ;;  %v2740_v45 = vld [vmem:[%s4142_s0 + $0x244] sm:$0xf]  ;;  %v1999_v47 = vor.u32 %v2677_v40, %v1998_v39  ;;  %v2263_v48 = vor.u32 %v2743_v42, %v2262_v41 }
   0xf   :  { %1275 = vmatpush.bf16.msra.mxu1 %v2806_v7  ;;  %2978 = vmatpush.bf16.msra.mxu3 %v2806_v7  ;;  %v2264_v46 = vld [vmem:[%s4142_s0 + $0x258] sm:$0xf0]  ;;  %v2003_v49 = vor.u32 %v2674_v43, %v2000_v44  ;;  %v2823_v51 = vld [vmem:[%s4140_s1 + $0xe8] sm:$0xff]  ;;  %v2022_v52 = vld [vmem:[%s4142_s0 + $0x60] sm:$0xf] }
  0x10   :  { %v2267_v50 = vor.u32 %v2740_v45, %v2264_v46  ;;  %v2683_v53 = vld [vmem:[%s4142_s0 + $0x74] sm:$0xf0]  ;;  %v2286_v54 = vld [vmem:[%s4142_s0 + $0x270] sm:$0xf]  ;;  %v2749_v55 = vld [vmem:[%s4142_s0 + $0x284] sm:$0xf0] }
  0x11   :  { %v2680_v56 = vld [vmem:[%s4142_s0 + $0x64] sm:$0xf]  ;;  %v2024_v57 = vld [vmem:[%s4142_s0 + $0x78] sm:$0xf0]  ;;  %v2746_v58 = vld [vmem:[%s4142_s0 + $0x274] sm:$0xf]  ;;  %v2023_v60 = vor.u32 %v2683_v53, %v2022_v52  ;;  %v2287_v61 = vor.u32 %v2749_v55, %v2286_v54 }
  0x12   :  { %1162 = vmatpush.bf16.msra.mxu0 %v2797_v8  ;;  %2971 = vmatpush.bf16.msra.mxu2 %v2797_v8  ;;  %v2288_v59 = vld [vmem:[%s4142_s0 + $0x288] sm:$0xf0]  ;;  %v2027_v62 = vor.u32 %v2680_v56, %v2024_v57  ;;  %v2814_v0 = vld [vmem:[%s4140_s1 + $0xa0] sm:$0xff]  ;;  %v2046_v4 = vld [vmem:[%s4142_s0 + $0x90] sm:$0xf] }
  0x13   :  { %1276 = vmatpush.bf16.msra.mxu1 %v2805_v9  ;;  %2979 = vmatpush.bf16.msra.mxu3 %v2805_v9  ;;  %v2291_v63 = vor.u32 %v2746_v58, %v2288_v59  ;;  %v2830_v1 = vld [vmem:[%s4140_s1 + $0x120] sm:$0xff]  ;;  %v2689_v5 = vld [vmem:[%s4142_s0 + $0xa4] sm:$0xf0]  ;;  %v2755_v7 = vld [vmem:[%s4142_s0 + $0x2b4] sm:$0xf0] }
  0x14   :  { %v2822_v2 = vld [vmem:[%s4140_s1 + $0xe0] sm:$0xff]  ;;  %v2686_v8 = vld [vmem:[%s4142_s0 + $0x94] sm:$0xf]  ;;  %v2048_v9 = vld [vmem:[%s4142_s0 + $0xa8] sm:$0xf0] }
  0x15   :  { %v2838_v3 = vld [vmem:[%s4140_s1 + $0x160] sm:$0xff]  ;;  %v2813_v16 = vld [vmem:[%s4140_s1 + $0x98] sm:$0xff]  ;;  %v2334_v22 = vld [vmem:[%s4142_s0 + $0x2d0] sm:$0xf] }
  0x16   :  { %1163 = vmatpush.bf16.msra.mxu0 %v2796_v10  ;;  %2972 = vmatpush.bf16.msra.mxu2 %v2796_v10  ;;  %v2310_v6 = vld [vmem:[%s4142_s0 + $0x2a0] sm:$0xf]  ;;  %v2752_v10 = vld [vmem:[%s4142_s0 + $0x2a4] sm:$0xf]  ;;  %v2821_v17 = vld [vmem:[%s4140_s1 + $0xd8] sm:$0xff] }
  0x17   :  { %1277 = vmatpush.bf16.msra.mxu1 %v2804_v11  ;;  %2980 = vmatpush.bf16.msra.mxu3 %v2804_v11  ;;  %v2312_v11 = vld [vmem:[%s4142_s0 + $0x2b8] sm:$0xf0]  ;;  %v2070_v20 = vld [vmem:[%s4142_s0 + $0xc0] sm:$0xf]  ;;  %v2695_v21 = vld [vmem:[%s4142_s0 + $0xd4] sm:$0xf0] }
  0x18   :  { %v2829_v18 = vld [vmem:[%s4140_s1 + $0x118] sm:$0xff]  ;;  %v2761_v23 = vld [vmem:[%s4142_s0 + $0x2e4] sm:$0xf0]  ;;  %v2698_v39 = vld [vmem:[%s4142_s0 + $0xf4] sm:$0xf] }
  0x19   :  { %v2837_v19 = vld [vmem:[%s4140_s1 + $0x158] sm:$0xff]  ;;  %v2096_v40 = vld [vmem:[%s4142_s0 + $0x108] sm:$0xf0]  ;;  %v2764_v41 = vld [vmem:[%s4142_s0 + $0x304] sm:$0xf] }
  0x1a   :  { %1164 = vmatpush.bf16.msra.mxu0 %v2795_v12  ;;  %2973 = vmatpush.bf16.msra.mxu2 %v2795_v12  ;;  %v2047_v12 = vor.u32 %v2689_v5, %v2046_v4  ;;  %v2360_v42 = vld [vmem:[%s4142_s0 + $0x318] sm:$0xf0]  ;;  %v2099_v45 = vor.u32 %v2698_v39, %v2096_v40  ;;  %v2704_v52 = vld [vmem:[%s4142_s0 + $0x124] sm:$0xf]  ;;  %v2770_v54 = vld [vmem:[%s4142_s0 + $0x334] sm:$0xf] }
  0x1b   :  { %1278 = vmatpush.bf16.msra.mxu1 %v2803_v13  ;;  %2981 = vmatpush.bf16.msra.mxu3 %v2803_v13  ;;  %v2311_v13 = vor.u32 %v2755_v7, %v2310_v6  ;;  %v2363_v46 = vor.u32 %v2764_v41, %v2360_v42  ;;  %v2120_v53 = vld [vmem:[%s4142_s0 + $0x138] sm:$0xf0]  ;;  %v2384_v55 = vld [vmem:[%s4142_s0 + $0x348] sm:$0xf0]  ;;  %v2710_v4 = vld [vmem:[%s4142_s0 + $0x154] sm:$0xf] }
  0x1c   :  { %v2123_v58 = vor.u32 %v2704_v52, %v2120_v53  ;;  %v2387_v59 = vor.u32 %v2770_v54, %v2384_v55  ;;  %v2144_v5 = vld [vmem:[%s4142_s0 + $0x168] sm:$0xf0]  ;;  %v2776_v6 = vld [vmem:[%s4142_s0 + $0x364] sm:$0xf]  ;;  %v2408_v7 = vld [vmem:[%s4142_s0 + $0x378] sm:$0xf0] }
  0x1d   :  { %v2190_v41 = vld [vmem:[%s4142_s0 + $0x1b0] sm:$0xf]  ;;  %v2725_v42 = vld [vmem:[%s4142_s0 + $0x1c4] sm:$0xf0] }
  0x1e   :  { %1165 = vmatpush.bf16.msra.mxu0 %v2794_v14  ;;  %2974 = vmatpush.bf16.msra.mxu2 %v2794_v14  ;;  %v2051_v14 = vor.u32 %v2686_v8, %v2048_v9  ;;  %v2191_v52 = vor.u32 %v2725_v42, %v2190_v41  ;;  %v2673_v41 = vld [vmem:[%s4142_s0 + $0x24] sm:$0xf0]  ;;  %v2008_v42 = vld [vmem:[%s4142_s0 + $0x50] sm:$0xf0] }
  0x1f   :  { %1279 = vmatpush.bf16.msra.mxu1 %v2802_v15  ;;  %2982 = vmatpush.bf16.msra.mxu3 %v2802_v15  ;;  %v2315_v15 = vor.u32 %v2752_v10, %v2312_v11  ;;  %v2147_v10 = vor.u32 %v2710_v4, %v2144_v5  ;;  %v2411_v11 = vor.u32 %v2776_v6, %v2408_v7  ;;  %v2214_v5 = vld [vmem:[%s4142_s0 + $0x1e0] sm:$0xf]  ;;  %v2731_v6 = vld [vmem:[%s4142_s0 + $0x1f4] sm:$0xf0]  ;;  %v2728_v7 = vld [vmem:[%s4142_s0 + $0x1e4] sm:$0xf] }
  0x21   :  { %1166 = vmatmul.bf16.vlgmr.msra.gmra.mxu0 %v1975_v26  ;;  %1221 = vmatmul.bf16.vlgmr.msra.gmra.mxu2 %v2239_v27  ;;  %v2758_v26 = vld [vmem:[%s4142_s0 + $0x2d4] sm:$0xf]  ;;  %v2336_v27 = vld [vmem:[%s4142_s0 + $0x2e8] sm:$0xf0] }
  0x22   :  { %1614 = vmatpush.bf16.msrb.mxu0 %v2833_v24  ;;  %1280 = vmatmul.bf16.vlgmr.msra.gmra.mxu1 %v1979_v28  ;;  %v2692_v24 = vld [vmem:[%s4142_s0 + $0xc4] sm:$0xf]  ;;  %v2071_v28 = vor.u32 %v2695_v21, %v2070_v20  ;;  %v2168_v21 = vld [vmem:[%s4142_s0 + $0x198] sm:$0xf0] }
  0x23   :  { %1728 = vmatpush.bf16.msrb.mxu1 %v2841_v25  ;;  %1335 = vmatmul.bf16.vlgmr.msra.gmra.mxu3 %v2243_v29  ;;  %v2072_v25 = vld [vmem:[%s4142_s0 + $0xd8] sm:$0xf0]  ;;  %v2335_v29 = vor.u32 %v2761_v23, %v2334_v22  ;;  %v2716_v20 = vld [vmem:[%s4142_s0 + $0x184] sm:$0xf]  ;;  %v2782_v22 = vld [vmem:[%s4142_s0 + $0x394] sm:$0xf] }
  0x24   :  { %1386 = vmatpush.bf16.msrb.mxu2 %v2817_v30  ;;  %1500 = vmatpush.bf16.msrb.mxu3 %v2825_v31  ;;  %v2075_v30 = vor.u32 %v2692_v24, %v2072_v25  ;;  %v2339_v31 = vor.u32 %v2758_v26, %v2336_v27  ;;  %v2432_v23 = vld [vmem:[%s4142_s0 + $0x3a8] sm:$0xf0]  ;;  %v2171_v27 = vor.u32 %v2716_v20, %v2168_v21 }
  0x26   :  { %1615 = vmatpush.bf16.msrb.mxu0 %v2832_v32  ;;  %v2812_v32 = vld [vmem:[%s4140_s1 + $0x90] sm:$0xff] }
  0x27   :  { %1729 = vmatpush.bf16.msrb.mxu1 %v2840_v33  ;;  %v2820_v33 = vld [vmem:[%s4140_s1 + $0xd0] sm:$0xff] }
  0x28   :  { %1387 = vmatpush.bf16.msrb.mxu2 %v2816_v34  ;;  %1501 = vmatpush.bf16.msrb.mxu3 %v2824_v35  ;;  %v2828_v34 = vld [vmem:[%s4140_s1 + $0x110] sm:$0xff] }
  0x29   :  { %v2094_v35 = vld [vmem:[%s4142_s0 + $0xf0] sm:$0xf] }
  0x2a   :  { %1616 = vmatpush.bf16.msrb.mxu0 %v2831_v36  ;;  %v2701_v36 = vld [vmem:[%s4142_s0 + $0x104] sm:$0xf0] }
  0x2b   :  { %1730 = vmatpush.bf16.msrb.mxu1 %v2839_v37  ;;  %v2358_v37 = vld [vmem:[%s4142_s0 + $0x300] sm:$0xf]  ;;  %v2095_v43 = vor.u32 %v2701_v36, %v2094_v35 }
  0x2c   :  { %1388 = vmatpush.bf16.msrb.mxu2 %v2815_v38  ;;  %1502 = vmatpush.bf16.msrb.mxu3 %v2823_v51  ;;  %v2767_v38 = vld [vmem:[%s4142_s0 + $0x314] sm:$0xf0]  ;;  %v2773_v51 = vld [vmem:[%s4142_s0 + $0x344] sm:$0xf0] }
  0x2d   :  { %v2359_v44 = vor.u32 %v2767_v38, %v2358_v37 }
  0x2e   :  { %1617 = vmatpush.bf16.msrb.mxu0 %v2830_v1  ;;  %v2835_v1 = vld [vmem:[%s4140_s1 + $0x148] sm:$0xff] }
  0x2f   :  { %1731 = vmatpush.bf16.msrb.mxu1 %v2838_v3  ;;  %v2779_v3 = vld [vmem:[%s4142_s0 + $0x374] sm:$0xf0] }
  0x30   :  { %1389 = vmatpush.bf16.msrb.mxu2 %v2814_v0  ;;  %1503 = vmatpush.bf16.msrb.mxu3 %v2822_v2  ;;  %v2713_v0 = vld [vmem:[%s4142_s0 + $0x164] sm:$0xf0]  ;;  %v2406_v2 = vld [vmem:[%s4142_s0 + $0x360] sm:$0xf] }
  0x31   :  { %1171 = vmatmul.bf16.gmra.mxu0 %v1999_v47  ;;  %1226 = vmatmul.bf16.gmra.mxu2 %v2263_v48  ;;  %v2836_v47 = vld [vmem:[%s4140_s1 + $0x150] sm:$0xff]  ;;  %v2118_v48 = vld [vmem:[%s4142_s0 + $0x120] sm:$0xf]  ;;  %v2407_v9 = vor.u32 %v2779_v3, %v2406_v2 }
  0x32   :  { %1285 = vmatmul.bf16.gmra.mxu1 %v2003_v49  ;;  %1618 = vmatpush.bf16.msrb.mxu0 %v2829_v18  ;;  %v2707_v49 = vld [vmem:[%s4142_s0 + $0x134] sm:$0xf0]  ;;  %v2430_v18 = vld [vmem:[%s4142_s0 + $0x390] sm:$0xf] }
  0x33   :  { %1340 = vmatmul.bf16.gmra.mxu3 %v2267_v50  ;;  %1732 = vmatpush.bf16.msrb.mxu1 %v2837_v19  ;;  %v2382_v50 = vld [vmem:[%s4142_s0 + $0x330] sm:$0xf]  ;;  %v2119_v56 = vor.u32 %v2707_v49, %v2118_v48  ;;  %v2785_v19 = vld [vmem:[%s4142_s0 + $0x3a4] sm:$0xf0]  ;;  %v2456_v48 = vld [vmem:[%s4142_s0 + $0x3d8] sm:$0xf0] }
  0x34   :  { %1390 = vmatpush.bf16.msrb.mxu2 %v2813_v16  ;;  %1504 = vmatpush.bf16.msrb.mxu3 %v2821_v17  ;;  %v2383_v57 = vor.u32 %v2773_v51, %v2382_v50  ;;  %v2719_v16 = vld [vmem:[%s4142_s0 + $0x194] sm:$0xf0]  ;;  %v2826_v17 = vld [vmem:[%s4140_s1 + $0x100] sm:$0xff]  ;;  %v2431_v25 = vor.u32 %v2785_v19, %v2430_v18 }
  0x36   :  { %1619 = vmatpush.bf16.msrb.mxu0 %v2828_v34 }
  0x37   :  { %1733 = vmatpush.bf16.msrb.mxu1 %v2836_v47  ;;  %v2788_v47 = vld [vmem:[%s4142_s0 + $0x3c4] sm:$0xf] }
  0x38   :  { %1391 = vmatpush.bf16.msrb.mxu2 %v2812_v32  ;;  %1505 = vmatpush.bf16.msrb.mxu3 %v2820_v33 }
  0x3b   :  { %1734 = vmatpush.bf16.msrb.mxu1 %v2835_v1 }
  0x41   :  { %1176 = vmatmul.bf16.gmra.mxu0 %v2023_v60  ;;  %1231 = vmatmul.bf16.gmra.mxu2 %v2287_v61  ;;  %v2811_v60 = vld [vmem:[%s4140_s1 + $0x88] sm:$0xff] }
  0x42   :  { %1290 = vmatmul.bf16.gmra.mxu1 %v2027_v62  ;;  %v2819_v61 = vld [vmem:[%s4140_s1 + $0xc8] sm:$0xff]  ;;  %1392 = vmatpush.bf16.msrb.mxu2 %v2811_v60 }
  0x43   :  { %1345 = vmatmul.bf16.gmra.mxu3 %v2291_v63  ;;  %v2827_v62 = vld [vmem:[%s4140_s1 + $0x108] sm:$0xff]  ;;  %v2142_v63 = vld [vmem:[%s4142_s0 + $0x150] sm:$0xf] }
  0x44   :  { %1506 = vmatpush.bf16.msrb.mxu3 %v2819_v61  ;;  %1620 = vmatpush.bf16.msrb.mxu0 %v2827_v62  ;;  %v2143_v8 = vor.u32 %v2713_v0, %v2142_v63 }
  0x48   :  { %1621 = vmatpush.bf16.msrb.mxu0 %v2826_v17  ;;  %v2215_v17 = vor.u32 %v2731_v6, %v2214_v5  ;;  %v2030_v5 = vld [vmem:[%s4142_s0 + $0x68] sm:$0xf]  ;;  %v2684_v6 = vld [vmem:[%s4142_s0 + $0x7c] sm:$0xf0] }
  0x51   :  { %1181 = vmatmul.bf16.gmra.mxu0 %v2047_v12  ;;  %1236 = vmatmul.bf16.gmra.mxu2 %v2311_v13  ;;  %v2810_v12 = vld [vmem:[%s4140_s1 + $0x80] sm:$0xff] }
  0x52   :  { %1295 = vmatmul.bf16.gmra.mxu1 %v2051_v14  ;;  %1393 = vmatpush.bf16.msrb.mxu2 %v2810_v12  ;;  %v2818_v13 = vld [vmem:[%s4140_s1 + $0xc0] sm:$0xff] }
  0x53   :  { %1350 = vmatmul.bf16.gmra.mxu3 %v2315_v15  ;;  %v3337_v14 = vld [vmem:[%s4141_s2] ss:$0 sm:$0xff]  ;;  %v1984_v12 = vld [vmem:[%s4142_s0 + $0x20] sm:$0xf0] }
  0x54   :  { %v2166_v15 = vld [vmem:[%s4142_s0 + $0x180] sm:$0xf]  ;;  %1507 = vmatpush.bf16.msrb.mxu3 %v2818_v13 }
  0x55   :  { %v2167_v24 = vor.u32 %v2719_v16, %v2166_v15 }
  0x61   :  { %1186 = vmatmul.bf16.gmra.mxu0 %v2071_v28  ;;  %1241 = vmatmul.bf16.gmra.mxu2 %v2335_v29  ;;  %v2435_v28 = vor.u32 %v2782_v22, %v2432_v23 }
  0x62   :  { %1300 = vmatmul.bf16.gmra.mxu1 %v2075_v30 }
  0x63   :  { %1355 = vmatmul.bf16.gmra.mxu3 %v2339_v31  ;;  %v2834_v31 = vld [vmem:[%s4140_s1 + $0x140] sm:$0xff] }
  0x64   :  { %1735 = vmatpush.bf16.msrb.mxu1 %v2834_v31 }
  0x71   :  { %1191 = vmatmul.bf16.gmra.mxu0 %v2095_v43  ;;  %1246 = vmatmul.bf16.gmra.mxu2 %v2359_v44  ;;  %v2454_v43 = vld [vmem:[%s4142_s0 + $0x3c0] sm:$0xf]  ;;  %v2791_v44 = vld [vmem:[%s4142_s0 + $0x3d4] sm:$0xf0] }
  0x72   :  { %1305 = vmatmul.bf16.gmra.mxu1 %v2099_v45  ;;  %v2722_v45 = vld [vmem:[%s4142_s0 + $0x1b4] sm:$0xf]  ;;  %v2455_v53 = vor.u32 %v2791_v44, %v2454_v43  ;;  %v1992_v44 = vld [vmem:[%s4142_s0 + $0x28] sm:$0xf0] }
  0x73   :  { %1360 = vmatmul.bf16.gmra.mxu3 %v2363_v46  ;;  %v2192_v46 = vld [vmem:[%s4142_s0 + $0x1c8] sm:$0xf0]  ;;  %v2670_v43 = vld [vmem:[%s4142_s0 + $0x14] sm:$0xf] }
  0x74   :  { %v2195_v55 = vor.u32 %v2722_v45, %v2192_v46 }
  0x81   :  { %1196 = vmatmul.bf16.gmra.mxu0 %v2119_v56  ;;  %1251 = vmatmul.bf16.gmra.mxu2 %v2383_v57  ;;  %v2459_v56 = vor.u32 %v2788_v47, %v2456_v48 }
  0x82   :  { %1310 = vmatmul.bf16.gmra.mxu1 %v2123_v58 }
  0x83   :  { %1365 = vmatmul.bf16.gmra.mxu3 %v2387_v59 }
  0x91   :  { %1201 = vmatmul.bf16.gmra.mxu0 %v2143_v8  ;;  %1256 = vmatmul.bf16.gmra.mxu2 %v2407_v9  ;;  %v1982_v8 = vld [vmem:[%s4142_s0 + $0x8] sm:$0xf]  ;;  %v2672_v9 = vld [vmem:[%s4142_s0 + $0x1c] sm:$0xf0] }
  0x92   :  { %1315 = vmatmul.bf16.gmra.mxu1 %v2147_v10  ;;  %v2216_v10 = vld [vmem:[%s4142_s0 + $0x1f8] sm:$0xf0]  ;;  %v1983_v18 = vor.u32 %v2672_v9, %v1982_v8  ;;  %v2014_v8 = vld [vmem:[%s4142_s0 + $0x40] sm:$0xf]  ;;  %v2679_v9 = vld [vmem:[%s4142_s0 + $0x54] sm:$0xf0] }
  0x93   :  { %1370 = vmatmul.bf16.gmra.mxu3 %v2411_v11  ;;  %v2669_v11 = vld [vmem:[%s4142_s0 + $0xc] sm:$0xf]  ;;  %v2219_v20 = vor.u32 %v2728_v7, %v2216_v10  ;;  %v2032_v10 = vld [vmem:[%s4142_s0 + $0x80] sm:$0xf0] }
  0x94   :  { %v1987_v21 = vor.u32 %v2669_v11, %v1984_v12  ;;  %v2681_v7 = vld [vmem:[%s4142_s0 + $0x6c] sm:$0xf]  ;;  %v2676_v11 = vld [vmem:[%s4142_s0 + $0x44] sm:$0xf]  ;;  %v2016_v12 = vld [vmem:[%s4142_s0 + $0x58] sm:$0xf0] }
  0x9e   :  { %v1167_v26 = vpop.f32.mrf.mxu0 }
  0x9f   :  { %v1168_v29 = vadd.f32 %v3337_v14, %v1167_v26  ;;  %v1281_v30 = vpop.f32.mrf.mxu1 }
  0xa1   :  { %v3370_v32 = vadd.f32 %v1281_v30, %v1168_v29  ;;  %1206 = vmatmul.bf16.gmra.mxu0 %v2167_v24  ;;  %1261 = vmatmul.bf16.gmra.mxu2 %v2431_v25 }
  0xa2   :  { %1320 = vmatmul.bf16.gmra.mxu1 %v2171_v27 }
  0xa3   :  { %1375 = vmatmul.bf16.gmra.mxu3 %v2435_v28 }
  0xa4   :  { %v1222_v33 = vpop.f32.mrf.mxu2 }
  0xa5   :  { %v1223_v34 = vadd.f32 %v3337_v14, %v1222_v33 }
  0xa6   :  { %v1336_v35 = vpop.f32.mrf.mxu3  ;;  %v1169_v36 = vpop.f32.mrf.mxu0 }
  0xa7   :  { %v3373_v37 = vadd.f32 %v1336_v35, %v1223_v34  ;;  %v1170_v38 = vadd.f32 %v3337_v14, %v1169_v36  ;;  %v1283_v39 = vpop.f32.mrf.mxu1  ;;  %v2006_v35 = vld [vmem:[%s4142_s0 + $0x38] sm:$0xf]  ;;  %v2678_v36 = vld [vmem:[%s4142_s0 + $0x4c] sm:$0xf0] }
  0xa8   :  { %v2007_v48 = vor.u32 %v2678_v36, %v2006_v35 }
  0xa9   :  { %v3376_v40 = vadd.f32 %v1283_v39, %v1170_v38  ;;  %v2675_v38 = vld [vmem:[%s4142_s0 + $0x3c] sm:$0xf]  ;;  %v1990_v39 = vld [vmem:[%s4142_s0 + $0x10] sm:$0xf] }
  0xac   :  { %v1224_v49 = vpop.f32.mrf.mxu2 }
  0xad   :  { %v1225_v50 = vadd.f32 %v3337_v14, %v1224_v49  ;;  %v1991_v49 = vor.u32 %v2673_v41, %v1990_v39  ;;  %v2054_v41 = vld [vmem:[%s4142_s0 + $0x98] sm:$0xf] }
  0xae   :  { %v1338_v51 = vpop.f32.mrf.mxu3  ;;  %v1172_v54 = vpop.f32.mrf.mxu0 }
  0xaf   :  { %v3403_v57 = vadd.f32 %v1338_v51, %v1225_v50  ;;  %v1173_v58 = vadd.f32 %v3337_v14, %v1172_v54  ;;  %v1286_v59 = vpop.f32.mrf.mxu1  ;;  %v2011_v51 = vor.u32 %v2675_v38, %v2008_v42  ;;  %v2690_v42 = vld [vmem:[%s4142_s0 + $0xac] sm:$0xf0] }
  0xb1   :  { %v3406_v60 = vadd.f32 %v1286_v59, %v1173_v58  ;;  %1211 = vmatmul.bf16.gmra.mxu0 %v2191_v52  ;;  %1266 = vmatmul.bf16.gmra.mxu2 %v2455_v53  ;;  %v1995_v52 = vor.u32 %v2670_v43, %v1992_v44  ;;  %v2687_v43 = vld [vmem:[%s4142_s0 + $0x9c] sm:$0xf]  ;;  %v2038_v44 = vld [vmem:[%s4142_s0 + $0x70] sm:$0xf] }
  0xb2   :  { %1325 = vmatmul.bf16.gmra.mxu1 %v2195_v55 }
  0xb3   :  { %1380 = vmatmul.bf16.gmra.mxu3 %v2459_v56 }
  0xb4   :  { %v1227_v61 = vpop.f32.mrf.mxu2 }
  0xb5   :  { %v1228_v62 = vadd.f32 %v3337_v14, %v1227_v61 }
  0xb6   :  { %v1341_v63 = vpop.f32.mrf.mxu3  ;;  %v1174_v0 = vpop.f32.mrf.mxu0 }
  0xb7   :  { %v3409_v1 = vadd.f32 %v1341_v63, %v1228_v62  ;;  %v1175_v2 = vadd.f32 %v3337_v14, %v1174_v0  ;;  %v1288_v3 = vpop.f32.mrf.mxu1 }
  0xb9   :  { %v3412_v4 = vadd.f32 %v1288_v3, %v1175_v2 }
  0xbc   :  { %v1229_v13 = vpop.f32.mrf.mxu2 }
  0xbd   :  { %v1230_v15 = vadd.f32 %v3337_v14, %v1229_v13 }
  0xbe   :  { %v1343_v16 = vpop.f32.mrf.mxu3  ;;  %v1177_v19 = vpop.f32.mrf.mxu0 }
  0xbf   :  { %v3439_v22 = vadd.f32 %v1343_v16, %v1230_v15  ;;  %v1178_v23 = vadd.f32 %v3337_v14, %v1177_v19  ;;  %v1291_v24 = vpop.f32.mrf.mxu1 }
  0xc1   :  { %v3442_v25 = vadd.f32 %v1291_v24, %v1178_v23  ;;  %1216 = vmatmul.bf16.gmra.mxu0 %v2215_v17  ;;  %1394 = vmatmul.bf16.vlgmr.msrb.gmra.mxu2 %v1983_v18  ;;  %v2031_v17 = vor.u32 %v2684_v6, %v2030_v5  ;;  %v2015_v18 = vor.u32 %v2679_v9, %v2014_v8 }
  0xc2   :  { %1330 = vmatmul.bf16.gmra.mxu1 %v2219_v20  ;;  %v2035_v20 = vor.u32 %v2681_v7, %v2032_v10 }
  0xc3   :  { %1508 = vmatmul.bf16.vlgmr.msrb.gmra.mxu3 %v1987_v21  ;;  %v2019_v21 = vor.u32 %v2676_v11, %v2016_v12 }
  0xc4   :  { %v1232_v26 = vpop.f32.mrf.mxu2 }
  0xc5   :  { %v1233_v27 = vadd.f32 %v3337_v14, %v1232_v26 }
  0xc6   :  { %v1346_v28 = vpop.f32.mrf.mxu3  ;;  %v1179_v29 = vpop.f32.mrf.mxu0 }
  0xc7   :  { %v3445_v30 = vadd.f32 %v1346_v28, %v1233_v27  ;;  %v1180_v31 = vadd.f32 %v3337_v14, %v1179_v29  ;;  %v1293_v33 = vpop.f32.mrf.mxu1 }
  0xc9   :  { %v3448_v34 = vadd.f32 %v1293_v33, %v1180_v31 }
  0xcc   :  { %v1234_v45 = vpop.f32.mrf.mxu2 }
  0xcd   :  { %v1235_v46 = vadd.f32 %v3337_v14, %v1234_v45  ;;  %v2685_v45 = vld [vmem:[%s4142_s0 + $0x84] sm:$0xf0] }
  0xce   :  { %v1348_v47 = vpop.f32.mrf.mxu3  ;;  %v1182_v50 = vpop.f32.mrf.mxu0 }
  0xcf   :  { %v3475_v53 = vadd.f32 %v1348_v47, %v1235_v46  ;;  %v1183_v54 = vadd.f32 %v3337_v14, %v1182_v50  ;;  %v1296_v55 = vpop.f32.mrf.mxu1  ;;  %v2056_v46 = vld [vmem:[%s4142_s0 + $0xb0] sm:$0xf0] }
  0xd0   :  { %v2682_v47 = vld [vmem:[%s4142_s0 + $0x74] sm:$0xf] }
  0xd1   :  { %v3478_v56 = vadd.f32 %v1296_v55, %v1183_v54  ;;  %1399 = vmatmul.bf16.gmra.mxu2 %v2007_v48  ;;  %1622 = vmatmul.bf16.vlgmr.msrb.gmra.mxu0 %v1991_v49  ;;  %v2040_v48 = vld [vmem:[%s4142_s0 + $0x88] sm:$0xf0]  ;;  %v2039_v54 = vor.u32 %v2685_v45, %v2038_v44 }
  0xd2   :  { %1736 = vmatmul.bf16.vlgmr.msrb.gmra.mxu1 %v1995_v52  ;;  %v2055_v52 = vor.u32 %v2690_v42, %v2054_v41 }
  0xd3   :  { %1513 = vmatmul.bf16.gmra.mxu3 %v2011_v51 }
  0xd4   :  { %v1237_v58 = vpop.f32.mrf.mxu2 }
  0xd5   :  { %v1238_v59 = vadd.f32 %v3337_v14, %v1237_v58  ;;  %v2059_v58 = vor.u32 %v2687_v43, %v2056_v46 }
  0xd6   :  { %v1351_v61 = vpop.f32.mrf.mxu3  ;;  %v1184_v62 = vpop.f32.mrf.mxu0 }
  0xd7   :  { %v3481_v63 = vadd.f32 %v1351_v61, %v1238_v59  ;;  %v1185_v0 = vadd.f32 %v3337_v14, %v1184_v62  ;;  %v1298_v2 = vpop.f32.mrf.mxu1  ;;  %v2043_v59 = vor.u32 %v2682_v47, %v2040_v48 }
  0xd9   :  { %v3484_v3 = vadd.f32 %v1298_v2, %v1185_v0 }
  0xdc   :  { %v1239_v13 = vpop.f32.mrf.mxu2 }
  0xdd   :  { %v1240_v15 = vadd.f32 %v3337_v14, %v1239_v13  ;;  %v2078_v13 = vld [vmem:[%s4142_s0 + $0xc8] sm:$0xf] }
  0xde   :  { %v1353_v16 = vpop.f32.mrf.mxu3  ;;  %v1187_v19 = vpop.f32.mrf.mxu0 }
  0xdf   :  { %v3511_v23 = vadd.f32 %v1353_v16, %v1240_v15  ;;  %v1188_v24 = vadd.f32 %v3337_v14, %v1187_v19  ;;  %v1301_v26 = vpop.f32.mrf.mxu1  ;;  %v2696_v15 = vld [vmem:[%s4142_s0 + $0xdc] sm:$0xf0]  ;;  %v2693_v16 = vld [vmem:[%s4142_s0 + $0xcc] sm:$0xf]  ;;  %v2080_v19 = vld [vmem:[%s4142_s0 + $0xe0] sm:$0xf0] }
  0xe1   :  { %v3514_v27 = vadd.f32 %v1301_v26, %v1188_v24  ;;  %1404 = vmatmul.bf16.gmra.mxu2 %v2031_v17  ;;  %1627 = vmatmul.bf16.gmra.mxu0 %v2015_v18  ;;  %v2062_v17 = vld [vmem:[%s4142_s0 + $0xa0] sm:$0xf]  ;;  %v2691_v18 = vld [vmem:[%s4142_s0 + $0xb4] sm:$0xf0] }
  0xe2   :  { %1741 = vmatmul.bf16.gmra.mxu1 %v2019_v21  ;;  %v2064_v21 = vld [vmem:[%s4142_s0 + $0xb8] sm:$0xf0] }
  0xe3   :  { %1518 = vmatmul.bf16.gmra.mxu3 %v2035_v20  ;;  %v2688_v20 = vld [vmem:[%s4142_s0 + $0xa4] sm:$0xf] }
  0xe4   :  { %v1242_v28 = vpop.f32.mrf.mxu2 }
  0xe5   :  { %v1243_v29 = vadd.f32 %v3337_v14, %v1242_v28 }
  0xe6   :  { %v1356_v31 = vpop.f32.mrf.mxu3  ;;  %v1189_v33 = vpop.f32.mrf.mxu0 }
  0xe7   :  { %v3517_v35 = vadd.f32 %v1356_v31, %v1243_v29  ;;  %v1190_v36 = vadd.f32 %v3337_v14, %v1189_v33  ;;  %v1303_v38 = vpop.f32.mrf.mxu1  ;;  %v2079_v29 = vor.u32 %v2696_v15, %v2078_v13  ;;  %v2063_v31 = vor.u32 %v2691_v18, %v2062_v17 }
  0xe9   :  { %v3520_v39 = vadd.f32 %v1303_v38, %v1190_v36  ;;  %v2083_v36 = vor.u32 %v2693_v16, %v2080_v19  ;;  %v2067_v38 = vor.u32 %v2688_v20, %v2064_v21 }
  0xec   :  { %v1244_v49 = vpop.f32.mrf.mxu2 }
  0xed   :  { %v1245_v50 = vadd.f32 %v3337_v14, %v1244_v49 }
  0xee   :  { %v1358_v51 = vpop.f32.mrf.mxu3  ;;  %v1192_v55 = vpop.f32.mrf.mxu0 }
  0xef   :  { %v3547_v61 = vadd.f32 %v1358_v51, %v1245_v50  ;;  %v1193_v62 = vadd.f32 %v3337_v14, %v1192_v55  ;;  %v1306_v0 = vpop.f32.mrf.mxu1  ;;  %v2702_v55 = vld [vmem:[%s4142_s0 + $0x10c] sm:$0xf0] }
  0xf1   :  { %v3550_v2 = vadd.f32 %v1306_v0, %v1193_v62  ;;  %1409 = vmatmul.bf16.gmra.mxu2 %v2055_v52  ;;  %1632 = vmatmul.bf16.gmra.mxu0 %v2039_v54  ;;  %v2102_v54 = vld [vmem:[%s4142_s0 + $0xf8] sm:$0xf]  ;;  %v2697_v62 = vld [vmem:[%s4142_s0 + $0xe4] sm:$0xf0]  ;;  %v2104_v0 = vld [vmem:[%s4142_s0 + $0x110] sm:$0xf0] }
  0xf2   :  { %1746 = vmatmul.bf16.gmra.mxu1 %v2043_v59  ;;  %v2086_v59 = vld [vmem:[%s4142_s0 + $0xd0] sm:$0xf] }
  0xf3   :  { %1523 = vmatmul.bf16.gmra.mxu3 %v2059_v58  ;;  %v2699_v58 = vld [vmem:[%s4142_s0 + $0xfc] sm:$0xf]  ;;  %v2087_v13 = vor.u32 %v2697_v62, %v2086_v59 }
  0xf4   :  { %v1247_v5 = vpop.f32.mrf.mxu2  ;;  %v2107_v16 = vor.u32 %v2699_v58, %v2104_v0 }
  0xf5   :  { %v1248_v6 = vadd.f32 %v3337_v14, %v1247_v5  ;;  %v2694_v5 = vld [vmem:[%s4142_s0 + $0xd4] sm:$0xf] }
  0xf6   :  { %v1361_v7 = vpop.f32.mrf.mxu3  ;;  %v1194_v8 = vpop.f32.mrf.mxu0 }
  0xf7   :  { %v3553_v9 = vadd.f32 %v1361_v7, %v1248_v6  ;;  %v1195_v10 = vadd.f32 %v3337_v14, %v1194_v8  ;;  %v1308_v11 = vpop.f32.mrf.mxu1  ;;  %v2088_v6 = vld [vmem:[%s4142_s0 + $0xe8] sm:$0xf0] }
  0xf8   :  { %v2091_v17 = vor.u32 %v2694_v5, %v2088_v6 }
  0xf9   :  { %v3556_v12 = vadd.f32 %v1308_v11, %v1195_v10  ;;  %v2103_v11 = vor.u32 %v2702_v55, %v2102_v54 }
  0xfc   :  { %v1249_v24 = vpop.f32.mrf.mxu2 }
  0xfd   :  { %v1250_v26 = vadd.f32 %v3337_v14, %v1249_v24 }
  0xfe   :  { %v1363_v28 = vpop.f32.mrf.mxu3  ;;  %v1197_v33 = vpop.f32.mrf.mxu0 }
  0xff   :  { %v3583_v41 = vadd.f32 %v1363_v28, %v1250_v26  ;;  %v1198_v42 = vadd.f32 %v3337_v14, %v1197_v33  ;;  %v1311_v43 = vpop.f32.mrf.mxu1 }
 0x101   :  { %v3586_v44 = vadd.f32 %v1311_v43, %v1198_v42  ;;  %1414 = vmatmul.bf16.gmra.mxu2 %v2079_v29  ;;  %1637 = vmatmul.bf16.gmra.mxu0 %v2063_v31  ;;  %v2126_v42 = vld [vmem:[%s4142_s0 + $0x128] sm:$0xf]  ;;  %v2708_v43 = vld [vmem:[%s4142_s0 + $0x13c] sm:$0xf0] }
 0x102   :  { %1751 = vmatmul.bf16.gmra.mxu1 %v2067_v38  ;;  %v2127_v59 = vor.u32 %v2708_v43, %v2126_v42  ;;  %v2709_v42 = vld [vmem:[%s4142_s0 + $0x144] sm:$0xf0]  ;;  %v2152_v43 = vld [vmem:[%s4142_s0 + $0x170] sm:$0xf0] }
 0x103   :  { %1528 = vmatmul.bf16.gmra.mxu3 %v2083_v36 }
 0x104   :  { %v1252_v45 = vpop.f32.mrf.mxu2 }
 0x105   :  { %v1253_v46 = vadd.f32 %v3337_v14, %v1252_v45  ;;  %v2705_v45 = vld [vmem:[%s4142_s0 + $0x12c] sm:$0xf] }
 0x106   :  { %v1366_v47 = vpop.f32.mrf.mxu3  ;;  %v1199_v48 = vpop.f32.mrf.mxu0 }
 0x107   :  { %v3589_v49 = vadd.f32 %v1366_v47, %v1253_v46  ;;  %v1200_v50 = vadd.f32 %v3337_v14, %v1199_v48  ;;  %v1313_v51 = vpop.f32.mrf.mxu1  ;;  %v2110_v46 = vld [vmem:[%s4142_s0 + $0x100] sm:$0xf]  ;;  %v2703_v47 = vld [vmem:[%s4142_s0 + $0x114] sm:$0xf0]  ;;  %v2128_v48 = vld [vmem:[%s4142_s0 + $0x140] sm:$0xf0] }
 0x108   :  { %v2111_v62 = vor.u32 %v2703_v47, %v2110_v46  ;;  %v2131_v5 = vor.u32 %v2705_v45, %v2128_v48  ;;  %v2706_v45 = vld [vmem:[%s4142_s0 + $0x134] sm:$0xf]  ;;  %v2136_v46 = vld [vmem:[%s4142_s0 + $0x148] sm:$0xf0] }
 0x109   :  { %v3592_v52 = vadd.f32 %v1313_v51, %v1200_v50  ;;  %v2700_v50 = vld [vmem:[%s4142_s0 + $0x104] sm:$0xf]  ;;  %v2112_v51 = vld [vmem:[%s4142_s0 + $0x118] sm:$0xf0] }
 0x10a   :  { %v2115_v6 = vor.u32 %v2700_v50, %v2112_v51 }
 0x10c   :  { %v1254_v7 = vpop.f32.mrf.mxu2 }
 0x10d   :  { %v1255_v8 = vadd.f32 %v3337_v14, %v1254_v7 }
 0x10e   :  { %v1368_v10 = vpop.f32.mrf.mxu3  ;;  %v1202_v15 = vpop.f32.mrf.mxu0 }
 0x10f   :  { %v3619_v18 = vadd.f32 %v1368_v10, %v1255_v8  ;;  %v1203_v19 = vadd.f32 %v3337_v14, %v1202_v15  ;;  %v1316_v20 = vpop.f32.mrf.mxu1 }
 0x111   :  { %v3622_v21 = vadd.f32 %v1316_v20, %v1203_v19  ;;  %1419 = vmatmul.bf16.gmra.mxu2 %v2103_v11  ;;  %1642 = vmatmul.bf16.gmra.mxu0 %v2087_v13 }
 0x112   :  { %1756 = vmatmul.bf16.gmra.mxu1 %v2091_v17 }
 0x113   :  { %1533 = vmatmul.bf16.gmra.mxu3 %v2107_v16 }
 0x114   :  { %v1257_v24 = vpop.f32.mrf.mxu2 }
 0x115   :  { %v1258_v26 = vadd.f32 %v3337_v14, %v1257_v24 }
 0x116   :  { %v1371_v28 = vpop.f32.mrf.mxu3  ;;  %v1204_v29 = vpop.f32.mrf.mxu0 }
 0x117   :  { %v3625_v31 = vadd.f32 %v1371_v28, %v1258_v26  ;;  %v1205_v33 = vadd.f32 %v3337_v14, %v1204_v29  ;;  %v1318_v36 = vpop.f32.mrf.mxu1  ;;  %v2150_v28 = vld [vmem:[%s4142_s0 + $0x158] sm:$0xf]  ;;  %v2714_v29 = vld [vmem:[%s4142_s0 + $0x16c] sm:$0xf0] }
 0x118   :  { %v2151_v51 = vor.u32 %v2714_v29, %v2150_v28  ;;  %v2174_v28 = vld [vmem:[%s4142_s0 + $0x188] sm:$0xf]  ;;  %v2720_v29 = vld [vmem:[%s4142_s0 + $0x19c] sm:$0xf0] }
 0x119   :  { %v3628_v38 = vadd.f32 %v1318_v36, %v1205_v33  ;;  %v2711_v33 = vld [vmem:[%s4142_s0 + $0x15c] sm:$0xf]  ;;  %v2134_v36 = vld [vmem:[%s4142_s0 + $0x130] sm:$0xf] }
 0x11c   :  { %v1259_v54 = vpop.f32.mrf.mxu2 }
 0x11d   :  { %v1260_v55 = vadd.f32 %v3337_v14, %v1259_v54  ;;  %v2135_v54 = vor.u32 %v2709_v42, %v2134_v36  ;;  %v2158_v36 = vld [vmem:[%s4142_s0 + $0x160] sm:$0xf]  ;;  %v2715_v42 = vld [vmem:[%s4142_s0 + $0x174] sm:$0xf0] }
 0x11e   :  { %v1373_v58 = vpop.f32.mrf.mxu3  ;;  %v1207_v0 = vpop.f32.mrf.mxu0 }
 0x11f   :  { %v3655_v7 = vadd.f32 %v1373_v58, %v1260_v55  ;;  %v1208_v8 = vadd.f32 %v3337_v14, %v1207_v0  ;;  %v1321_v10 = vpop.f32.mrf.mxu1  ;;  %v2155_v58 = vor.u32 %v2711_v33, %v2152_v43  ;;  %v2717_v33 = vld [vmem:[%s4142_s0 + $0x18c] sm:$0xf]  ;;  %v2176_v43 = vld [vmem:[%s4142_s0 + $0x1a0] sm:$0xf0] }
 0x121   :  { %v3658_v11 = vadd.f32 %v1321_v10, %v1208_v8  ;;  %1424 = vmatmul.bf16.gmra.mxu2 %v2127_v59  ;;  %1647 = vmatmul.bf16.gmra.mxu0 %v2111_v62  ;;  %v2139_v59 = vor.u32 %v2706_v45, %v2136_v46  ;;  %v2712_v45 = vld [vmem:[%s4142_s0 + $0x164] sm:$0xf]  ;;  %v2160_v46 = vld [vmem:[%s4142_s0 + $0x178] sm:$0xf0] }
 0x122   :  { %1761 = vmatmul.bf16.gmra.mxu1 %v2115_v6 }
 0x123   :  { %1538 = vmatmul.bf16.gmra.mxu3 %v2131_v5 }
 0x124   :  { %v1262_v13 = vpop.f32.mrf.mxu2 }
 0x125   :  { %v1263_v15 = vadd.f32 %v3337_v14, %v1262_v13 }
 0x126   :  { %v1376_v16 = vpop.f32.mrf.mxu3  ;;  %v1209_v17 = vpop.f32.mrf.mxu0 }
 0x127   :  { %v3661_v19 = vadd.f32 %v1376_v16, %v1263_v15  ;;  %v1210_v20 = vadd.f32 %v3337_v14, %v1209_v17  ;;  %v1323_v24 = vpop.f32.mrf.mxu1 }
 0x129   :  { %4144 = vst [vmem:[#allocation2_spill] sm:$0xff] %v3661_v19  ;;  %v3664_v26 = vadd.f32 %v1323_v24, %v1210_v20 }
 0x12c   :  { %v1264_v47 = vpop.f32.mrf.mxu2 }
 0x12d   :  { %v1265_v48 = vadd.f32 %v3337_v14, %v1264_v47 }
 0x12e   :  { %v1378_v50 = vpop.f32.mrf.mxu3  ;;  %v1212_v55 = vpop.f32.mrf.mxu0 }
 0x12f   :  { %v3691_v62 = vadd.f32 %v1378_v50, %v1265_v48  ;;  %v1213_v0 = vadd.f32 %v3337_v14, %v1212_v55  ;;  %v1326_v5 = vpop.f32.mrf.mxu1 }
 0x131   :  { %4145 = vst [vmem:[#allocation3_spill] sm:$0xff] %v3691_v62  ;;  %v3694_v6 = vadd.f32 %v1326_v5, %v1213_v0  ;;  %1429 = vmatmul.bf16.gmra.mxu2 %v2151_v51  ;;  %1652 = vmatmul.bf16.gmra.mxu0 %v2135_v54  ;;  %v2175_v51 = vor.u32 %v2720_v29, %v2174_v28 }
 0x132   :  { %1766 = vmatmul.bf16.gmra.mxu1 %v2139_v59  ;;  %v2159_v54 = vor.u32 %v2715_v42, %v2158_v36  ;;  %v2163_v59 = vor.u32 %v2712_v45, %v2160_v46  ;;  %v2726_v36 = vld [vmem:[%s4142_s0 + $0x1cc] sm:$0xf0]  ;;  %v2723_v42 = vld [vmem:[%s4142_s0 + $0x1bc] sm:$0xf]  ;;  %v2200_v45 = vld [vmem:[%s4142_s0 + $0x1d0] sm:$0xf0] }
 0x133   :  { %1543 = vmatmul.bf16.gmra.mxu3 %v2155_v58  ;;  %v2179_v58 = vor.u32 %v2717_v33, %v2176_v43  ;;  %v2198_v33 = vld [vmem:[%s4142_s0 + $0x1b8] sm:$0xf]  ;;  %v2182_v43 = vld [vmem:[%s4142_s0 + $0x190] sm:$0xf]  ;;  %v2718_v46 = vld [vmem:[%s4142_s0 + $0x194] sm:$0xf] }
 0x134   :  { %v1267_v8 = vpop.f32.mrf.mxu2 }
 0x135   :  { %v1268_v10 = vadd.f32 %v3337_v14, %v1267_v8 }
 0x136   :  { %v1381_v13 = vpop.f32.mrf.mxu3  ;;  %v1214_v15 = vpop.f32.mrf.mxu0 }
 0x137   :  { %v3697_v16 = vadd.f32 %v1381_v13, %v1268_v10  ;;  %v1215_v17 = vadd.f32 %v3337_v14, %v1214_v15  ;;  %v1328_v20 = vpop.f32.mrf.mxu1 }
 0x139   :  { %4146 = vst [vmem:[#allocation4_spill] sm:$0xff] %v3697_v16  ;;  %v3700_v24 = vadd.f32 %v1328_v20, %v1215_v17 }
 0x13c   :  { %v1269_v47 = vpop.f32.mrf.mxu2 }
 0x13d   :  { %v1270_v48 = vadd.f32 %v3337_v14, %v1269_v47  ;;  %v2184_v47 = vld [vmem:[%s4142_s0 + $0x1a8] sm:$0xf0] }
 0x13e   :  { %v1383_v50 = vpop.f32.mrf.mxu3  ;;  %v1217_v55 = vpop.f32.mrf.mxu0 }
 0x13f   :  { %v3727_v0 = vadd.f32 %v1383_v50, %v1270_v48  ;;  %v1218_v5 = vadd.f32 %v3337_v14, %v1217_v55  ;;  %v1331_v8 = vpop.f32.mrf.mxu1 }
 0x141   :  { %4147 = vst [vmem:[#allocation5_spill] sm:$0xff] %v3727_v0  ;;  %v3730_v10 = vadd.f32 %v1331_v8, %v1218_v5  ;;  %1434 = vmatmul.bf16.gmra.mxu2 %v2175_v51  ;;  %1657 = vmatmul.bf16.gmra.mxu0 %v2159_v54  ;;  %v2199_v54 = vor.u32 %v2726_v36, %v2198_v33 }
 0x142   :  { %1771 = vmatmul.bf16.gmra.mxu1 %v2163_v59  ;;  %v2203_v59 = vor.u32 %v2723_v42, %v2200_v45  ;;  %v2187_v5 = vor.u32 %v2718_v46, %v2184_v47  ;;  %v2222_v42 = vld [vmem:[%s4142_s0 + $0x1e8] sm:$0xf]  ;;  %v2724_v46 = vld [vmem:[%s4142_s0 + $0x1c4] sm:$0xf]  ;;  %v2208_v47 = vld [vmem:[%s4142_s0 + $0x1d8] sm:$0xf0] }
 0x143   :  { %1548 = vmatmul.bf16.gmra.mxu3 %v2179_v58 }
 0x144   :  { %v1395_v13 = vpop.f32.mrf.mxu2 }
 0x145   :  { %v1396_v50 = vadd.f32 %v1395_v13, %v3370_v32 }
 0x146   :  { %v1509_v15 = vpop.f32.mrf.mxu3  ;;  %v1219_v17 = vpop.f32.mrf.mxu0 }
 0x147   :  { %v1220_v20 = vadd.f32 %v3337_v14, %v1219_v17  ;;  %v1333_v28 = vpop.f32.mrf.mxu1  ;;  %v2721_v14 = vld [vmem:[%s4142_s0 + $0x1a4] sm:$0xf0]  ;;  %v1510_v17 = vadd.f32 %v1509_v15, %v1396_v50  ;;  %v2729_v15 = vld [vmem:[%s4142_s0 + $0x1ec] sm:$0xf] }
 0x148   :  { %v2183_v55 = vor.u32 %v2721_v14, %v2182_v43  ;;  %v2224_v43 = vld [vmem:[%s4142_s0 + $0x200] sm:$0xf0] }
 0x149   :  { %v3733_v29 = vadd.f32 %v1333_v28, %v1220_v20 }
 0x14c   :  { %v1397_v48 = vpop.f32.mrf.mxu2 }
 0x14d   :  { %v1398_v20 = vadd.f32 %v1397_v48, %v3376_v40  ;;  %v2732_v40 = vld [vmem:[%s4142_s0 + $0x1fc] sm:$0xf0] }
 0x14e   :  { %v1511_v51 = vpop.f32.mrf.mxu3  ;;  %v1623_v58 = vpop.f32.mrf.mxu0 }
 0x14f   :  { %v1737_v8 = vpop.f32.mrf.mxu1  ;;  %v1624_v28 = vadd.f32 %v1623_v58, %v1510_v17  ;;  %v1512_v16 = vadd.f32 %v1511_v51, %v1398_v20 }
 0x151   :  { %1439 = vmatmul.bf16.gmra.mxu2 %v2199_v54  ;;  %1662 = vmatmul.bf16.gmra.mxu0 %v2183_v55  ;;  %v1738_v32 = vadd.f32 %v1737_v8, %v1624_v28  ;;  %v2223_v55 = vor.u32 %v2732_v40, %v2222_v42  ;;  %v2211_v8 = vor.u32 %v2724_v46, %v2208_v47  ;;  %v2730_v47 = vld [vmem:[%s4142_s0 + $0x1f4] sm:$0xf] }
 0x152   :  { %1776 = vmatmul.bf16.gmra.mxu1 %v2187_v5  ;;  %v2227_v5 = vor.u32 %v2729_v15, %v2224_v43  ;;  %v2246_v43 = vld [vmem:[%s4142_s0 + $0x218] sm:$0xf] }
 0x153   :  { %1553 = vmatmul.bf16.gmra.mxu3 %v2203_v59  ;;  %v1842_v14 = vmax.f32 %v1738_v32, 0.0 }
 0x154   :  { %v1400_v0 = vpop.f32.mrf.mxu2 }
 0x155   :  { %v1401_v50 = vadd.f32 %v1400_v0, %v3406_v60 }
 0x156   :  { %v1514_v62 = vpop.f32.mrf.mxu3  ;;  %v1625_v19 = vpop.f32.mrf.mxu0 }
 0x157   :  { %v1626_v13 = vadd.f32 %v1625_v19, %v1512_v16  ;;  %v1739_v33 = vpop.f32.mrf.mxu1  ;;  %v2206_v19 = vld [vmem:[%s4142_s0 + $0x1c0] sm:$0xf]  ;;  %v2727_v16 = vld [vmem:[%s4142_s0 + $0x1d4] sm:$0xf0]  ;;  %v1515_v20 = vadd.f32 %v1514_v62, %v1401_v50  ;;  %v2735_v62 = vld [vmem:[%s4142_s0 + $0x21c] sm:$0xf] }
 0x158   :  { %v2207_v58 = vor.u32 %v2727_v16, %v2206_v19  ;;  %v2248_v19 = vld [vmem:[%s4142_s0 + $0x230] sm:$0xf0]  ;;  %v2230_v16 = vld [vmem:[%s4142_s0 + $0x1f0] sm:$0xf] }
 0x159   :  { %v1740_v36 = vadd.f32 %v1739_v33, %v1626_v13 }
 0x15b   :  { %v1843_v45 = vmax.f32 %v1740_v36, 0.0 }
 0x15c   :  { %v1402_v48 = vpop.f32.mrf.mxu2 }
 0x15d   :  { %v2845_v51 = vpack.c.bf16 %v1843_v45, %v1842_v14  ;;  %v1403_v28 = vadd.f32 %v1402_v48, %v3412_v4  ;;  %v2738_v4 = vld [vmem:[%s4142_s0 + $0x22c] sm:$0xf0]  ;;  %v2733_v14 = vld [vmem:[%s4142_s0 + $0x204] sm:$0xf0]  ;;  %v2232_v48 = vld [vmem:[%s4142_s0 + $0x208] sm:$0xf0] }
 0x15e   :  { %v1516_v54 = vpop.f32.mrf.mxu3  ;;  %v1628_v59 = vpop.f32.mrf.mxu0 }
 0x15f   :  { %2846 = vst [vmem:[%s4143_s3] sm:$0xff] %v2845_v51   ;;  %v1742_v17 = vpop.f32.mrf.mxu1  ;;  %v1629_v60 = vadd.f32 %v1628_v59, %v1515_v20  ;;  %v1517_v32 = vadd.f32 %v1516_v54, %v1403_v28  ;;  %v2231_v59 = vor.u32 %v2733_v14, %v2230_v16  ;;  %v2739_v16 = vld [vmem:[%s4142_s0 + $0x234] sm:$0xf0] }
 0x161   :  { %1444 = vmatmul.bf16.gmra.mxu2 %v2223_v55  ;;  %1667 = vmatmul.bf16.gmra.mxu0 %v2207_v58  ;;  %v1743_v36 = vadd.f32 %v1742_v17, %v1629_v60  ;;  %v2247_v58 = vor.u32 %v2738_v4, %v2246_v43  ;;  %v2235_v17 = vor.u32 %v2730_v47, %v2232_v48  ;;  %v2270_v4 = vld [vmem:[%s4142_s0 + $0x248] sm:$0xf]  ;;  %v2256_v47 = vld [vmem:[%s4142_s0 + $0x238] sm:$0xf0] }
 0x162   :  { %1781 = vmatmul.bf16.gmra.mxu1 %v2211_v8  ;;  %v2251_v8 = vor.u32 %v2735_v62, %v2248_v19  ;;  %v2272_v62 = vld [vmem:[%s4142_s0 + $0x260] sm:$0xf0]  ;;  %v2254_v19 = vld [vmem:[%s4142_s0 + $0x220] sm:$0xf] }
 0x163   :  { %1558 = vmatmul.bf16.gmra.mxu3 %v2227_v5  ;;  %v1844_v45 = vmax.f32 %v1743_v36, 0.0 }
 0x164   :  { %v1405_v0 = vpop.f32.mrf.mxu2 }
 0x165   :  { %v1406_v51 = vadd.f32 %v1405_v0, %v3442_v25 }
 0x166   :  { %v1519_v13 = vpop.f32.mrf.mxu3  ;;  %v1630_v33 = vpop.f32.mrf.mxu0 }
 0x167   :  { %v1631_v42 = vadd.f32 %v1630_v33, %v1517_v32  ;;  %v1744_v40 = vpop.f32.mrf.mxu1  ;;  %v1520_v28 = vadd.f32 %v1519_v13, %v1406_v51  ;;  %v2741_v13 = vld [vmem:[%s4142_s0 + $0x24c] sm:$0xf] }
 0x169   :  { %v1745_v15 = vadd.f32 %v1744_v40, %v1631_v42 }
 0x16b   :  { %v1845_v46 = vmax.f32 %v1745_v15, 0.0 }
 0x16c   :  { %v1407_v50 = vpop.f32.mrf.mxu2 }
 0x16d   :  { %v2850_v54 = vpack.c.bf16 %v1845_v46, %v1844_v45  ;;  %v1408_v60 = vadd.f32 %v1407_v50, %v3448_v34  ;;  %v2744_v34 = vld [vmem:[%s4142_s0 + $0x25c] sm:$0xf0]  ;;  %v2736_v46 = vld [vmem:[%s4142_s0 + $0x224] sm:$0xf] }
 0x16e   :  { %v1521_v55 = vpop.f32.mrf.mxu3  ;;  %v1633_v5 = vpop.f32.mrf.mxu0 }
 0x16f   :  { %2947 = vst [vmem:[%s4143_s3 + $0x8] sm:$0xff] %v2850_v54   ;;  %v1747_v20 = vpop.f32.mrf.mxu1  ;;  %v1634_v25 = vadd.f32 %v1633_v5, %v1520_v28  ;;  %v1522_v32 = vadd.f32 %v1521_v55, %v1408_v60  ;;  %v2271_v55 = vor.u32 %v2744_v34, %v2270_v4  ;;  %v2275_v5 = vor.u32 %v2741_v13, %v2272_v62  ;;  %v2296_v4 = vld [vmem:[%s4142_s0 + $0x290] sm:$0xf0]  ;;  %v2278_v34 = vld [vmem:[%s4142_s0 + $0x250] sm:$0xf] }
 0x170   :  { %v2745_v13 = vld [vmem:[%s4142_s0 + $0x264] sm:$0xf0] }
 0x171   :  { %1449 = vmatmul.bf16.gmra.mxu2 %v2247_v58  ;;  %1672 = vmatmul.bf16.gmra.mxu0 %v2231_v59  ;;  %v1748_v42 = vadd.f32 %v1747_v20, %v1634_v25  ;;  %v2255_v58 = vor.u32 %v2739_v16, %v2254_v19  ;;  %v2742_v16 = vld [vmem:[%s4142_s0 + $0x254] sm:$0xf] }
 0x172   :  { %1786 = vmatmul.bf16.gmra.mxu1 %v2235_v17 }
 0x173   :  { %1563 = vmatmul.bf16.gmra.mxu3 %v2251_v8  ;;  %v1846_v14 = vmax.f32 %v1748_v42, 0.0  ;;  %v2259_v8 = vor.u32 %v2736_v46, %v2256_v47 }
 0x174   :  { %v1410_v0 = vpop.f32.mrf.mxu2 }
 0x175   :  { %v1411_v50 = vadd.f32 %v1410_v0, %v3478_v56 }
 0x176   :  { %v1524_v33 = vpop.f32.mrf.mxu3  ;;  %v1635_v36 = vpop.f32.mrf.mxu0 }
 0x177   :  { %v1636_v40 = vadd.f32 %v1635_v36, %v1522_v32  ;;  %v1749_v15 = vpop.f32.mrf.mxu1  ;;  %v1525_v20 = vadd.f32 %v1524_v33, %v1411_v50  ;;  %v2747_v33 = vld [vmem:[%s4142_s0 + $0x27c] sm:$0xf] }
 0x179   :  { %v1750_v43 = vadd.f32 %v1749_v15, %v1636_v40 }
 0x17b   :  { %v1847_v45 = vmax.f32 %v1750_v43, 0.0  ;;  %v2294_v43 = vld [vmem:[%s4142_s0 + $0x278] sm:$0xf] }
 0x17c   :  { %v1412_v48 = vpop.f32.mrf.mxu2 }
 0x17d   :  { %v2855_v51 = vpack.c.bf16 %v1847_v45, %v1846_v14  ;;  %v1413_v28 = vadd.f32 %v1412_v48, %v3484_v3  ;;  %v2750_v3 = vld [vmem:[%s4142_s0 + $0x28c] sm:$0xf0]  ;;  %v2280_v14 = vld [vmem:[%s4142_s0 + $0x268] sm:$0xf0] }
 0x17e   :  { %v1526_v54 = vpop.f32.mrf.mxu3  ;;  %v1638_v59 = vpop.f32.mrf.mxu0  ;;  %v2295_v50 = vor.u32 %v2750_v3, %v2294_v43  ;;  %v2751_v43 = vld [vmem:[%s4142_s0 + $0x294] sm:$0xf0] }
 0x17f   :  { %2948 = vst [vmem:[%s4143_s3 + $0x10] sm:$0xff] %v2855_v51   ;;  %v1752_v17 = vpop.f32.mrf.mxu1  ;;  %v1639_v56 = vadd.f32 %v1638_v59, %v1525_v20  ;;  %v1527_v25 = vadd.f32 %v1526_v54, %v1413_v28  ;;  %v2279_v51 = vor.u32 %v2745_v13, %v2278_v34  ;;  %v2304_v34 = vld [vmem:[%s4142_s0 + $0x298] sm:$0xf0] }
 0x181   :  { %1454 = vmatmul.bf16.gmra.mxu2 %v2271_v55  ;;  %1677 = vmatmul.bf16.gmra.mxu0 %v2255_v58  ;;  %v1753_v36 = vadd.f32 %v1752_v17, %v1639_v56  ;;  %v2299_v55 = vor.u32 %v2747_v33, %v2296_v4  ;;  %v2283_v58 = vor.u32 %v2742_v16, %v2280_v14  ;;  %v2748_v4 = vld [vmem:[%s4142_s0 + $0x284] sm:$0xf] }
 0x182   :  { %1791 = vmatmul.bf16.gmra.mxu1 %v2259_v8 }
 0x183   :  { %1568 = vmatmul.bf16.gmra.mxu3 %v2275_v5  ;;  %v1848_v62 = vmax.f32 %v1753_v36, 0.0 }
 0x184   :  { %v1415_v60 = vpop.f32.mrf.mxu2 }
 0x185   :  { %v1416_v46 = vadd.f32 %v1415_v60, %v3514_v27 }
 0x186   :  { %v1529_v0 = vpop.f32.mrf.mxu3  ;;  %v1640_v32 = vpop.f32.mrf.mxu0 }
 0x187   :  { %v1641_v42 = vadd.f32 %v1640_v32, %v1527_v25  ;;  %v1754_v40 = vpop.f32.mrf.mxu1  ;;  %v1530_v5 = vadd.f32 %v1529_v0, %v1416_v46  ;;  %v2753_v0 = vld [vmem:[%s4142_s0 + $0x2ac] sm:$0xf] }
 0x189   :  { %v1755_v15 = vadd.f32 %v1754_v40, %v1641_v42  ;;  %v2318_v42 = vld [vmem:[%s4142_s0 + $0x2a8] sm:$0xf]  ;;  %v2320_v40 = vld [vmem:[%s4142_s0 + $0x2c0] sm:$0xf0] }
 0x18b   :  { %v1849_v19 = vmax.f32 %v1755_v15, 0.0  ;;  %v2302_v15 = vld [vmem:[%s4142_s0 + $0x280] sm:$0xf] }
 0x18c   :  { %v1417_v45 = vpop.f32.mrf.mxu2 }
 0x18d   :  { %v2860_v47 = vpack.c.bf16 %v1849_v19, %v1848_v62  ;;  %v1418_v8 = vadd.f32 %v1417_v45, %v3520_v39  ;;  %v2756_v39 = vld [vmem:[%s4142_s0 + $0x2bc] sm:$0xf0]  ;;  %v2303_v45 = vor.u32 %v2751_v43, %v2302_v15 }
 0x18e   :  { %v1531_v48 = vpop.f32.mrf.mxu3  ;;  %v1643_v54 = vpop.f32.mrf.mxu0  ;;  %v2319_v14 = vor.u32 %v2756_v39, %v2318_v42  ;;  %v2754_v39 = vld [vmem:[%s4142_s0 + $0x2b4] sm:$0xf] }
 0x18f   :  { %2949 = vst [vmem:[%s4143_s3 + $0x18] sm:$0xff] %v2860_v47   ;;  %v1757_v59 = vpop.f32.mrf.mxu1  ;;  %v1644_v27 = vadd.f32 %v1643_v54, %v1530_v5  ;;  %v1532_v20 = vadd.f32 %v1531_v48, %v1418_v8  ;;  %v2323_v47 = vor.u32 %v2753_v0, %v2320_v40  ;;  %v2307_v48 = vor.u32 %v2748_v4, %v2304_v34  ;;  %v2328_v0 = vld [vmem:[%s4142_s0 + $0x2c8] sm:$0xf0] }
 0x191   :  { %1459 = vmatmul.bf16.gmra.mxu2 %v2295_v50  ;;  %1682 = vmatmul.bf16.gmra.mxu0 %v2279_v51  ;;  %v1758_v60 = vadd.f32 %v1757_v59, %v1644_v27 }
 0x192   :  { %1796 = vmatmul.bf16.gmra.mxu1 %v2283_v58 }
 0x193   :  { %1573 = vmatmul.bf16.gmra.mxu3 %v2299_v55  ;;  %v1850_v3 = vmax.f32 %v1758_v60, 0.0  ;;  %v2344_v60 = vld [vmem:[%s4142_s0 + $0x2f0] sm:$0xf0] }
 0x194   :  { %v1420_v17 = vpop.f32.mrf.mxu2 }
 0x195   :  { %v1421_v62 = vadd.f32 %v1420_v17, %v3550_v2 }
 0x196   :  { %v1534_v28 = vpop.f32.mrf.mxu3  ;;  %v1645_v56 = vpop.f32.mrf.mxu0 }
 0x197   :  { %v1646_v25 = vadd.f32 %v1645_v56, %v1532_v20  ;;  %v1759_v32 = vpop.f32.mrf.mxu1  ;;  %v1535_v51 = vadd.f32 %v1534_v28, %v1421_v62  ;;  %v2342_v56 = vld [vmem:[%s4142_s0 + $0x2d8] sm:$0xf]  ;;  %v2759_v28 = vld [vmem:[%s4142_s0 + $0x2dc] sm:$0xf]  ;;  %v2331_v62 = vor.u32 %v2754_v39, %v2328_v0 }
 0x199   :  { %v1760_v36 = vadd.f32 %v1759_v32, %v1646_v25  ;;  %v2326_v25 = vld [vmem:[%s4142_s0 + $0x2b0] sm:$0xf]  ;;  %v2757_v32 = vld [vmem:[%s4142_s0 + $0x2c4] sm:$0xf0] }
 0x19a   :  { %v2327_v4 = vor.u32 %v2757_v32, %v2326_v25 }
 0x19b   :  { %v1851_v33 = vmax.f32 %v1760_v36, 0.0 }
 0x19c   :  { %v1422_v13 = vpop.f32.mrf.mxu2 }
 0x19d   :  { %v2865_v19 = vpack.c.bf16 %v1851_v33, %v1850_v3  ;;  %v1423_v54 = vadd.f32 %v1422_v13, %v3556_v12  ;;  %v2762_v12 = vld [vmem:[%s4142_s0 + $0x2ec] sm:$0xf0]  ;;  %v2347_v13 = vor.u32 %v2759_v28, %v2344_v60 }
 0x19e   :  { %v1536_v16 = vpop.f32.mrf.mxu3  ;;  %v1648_v46 = vpop.f32.mrf.mxu0  ;;  %v2343_v33 = vor.u32 %v2762_v12, %v2342_v56  ;;  %v2352_v56 = vld [vmem:[%s4142_s0 + $0x2f8] sm:$0xf0] }
 0x19f   :  { %2950 = vst [vmem:[%s4143_s3 + $0x20] sm:$0xff] %v2865_v19   ;;  %v1762_v50 = vpop.f32.mrf.mxu1  ;;  %v1649_v2 = vadd.f32 %v1648_v46, %v1535_v51  ;;  %v1537_v58 = vadd.f32 %v1536_v16, %v1423_v54 }
 0x1a1   :  { %1464 = vmatmul.bf16.gmra.mxu2 %v2319_v14  ;;  %1687 = vmatmul.bf16.gmra.mxu0 %v2303_v45  ;;  %v1763_v8 = vadd.f32 %v1762_v50, %v1649_v2 }
 0x1a2   :  { %1801 = vmatmul.bf16.gmra.mxu1 %v2307_v48 }
 0x1a3   :  { %1578 = vmatmul.bf16.gmra.mxu3 %v2323_v47  ;;  %v1852_v36 = vmax.f32 %v1763_v8, 0.0  ;;  %v2763_v8 = vld [vmem:[%s4142_s0 + $0x2f4] sm:$0xf0] }
 0x1a4   :  { %v1425_v55 = vpop.f32.mrf.mxu2 }
 0x1a5   :  { %v1426_v15 = vadd.f32 %v1425_v55, %v3586_v44  ;;  %v2366_v55 = vld [vmem:[%s4142_s0 + $0x308] sm:$0xf] }
 0x1a6   :  { %v1539_v59 = vpop.f32.mrf.mxu3  ;;  %v1650_v5 = vpop.f32.mrf.mxu0 }
 0x1a7   :  { %v1651_v27 = vadd.f32 %v1650_v5, %v1537_v58  ;;  %v1764_v17 = vpop.f32.mrf.mxu1  ;;  %v1540_v16 = vadd.f32 %v1539_v59, %v1426_v15  ;;  %v2765_v58 = vld [vmem:[%s4142_s0 + $0x30c] sm:$0xf]  ;;  %v2368_v59 = vld [vmem:[%s4142_s0 + $0x320] sm:$0xf0]  ;;  %v2350_v5 = vld [vmem:[%s4142_s0 + $0x2e0] sm:$0xf] }
 0x1a8   :  { %v2371_v39 = vor.u32 %v2765_v58, %v2368_v59 }
 0x1a9   :  { %v1765_v20 = vadd.f32 %v1764_v17, %v1651_v27 }
 0x1ab   :  { %v1853_v42 = vmax.f32 %v1765_v20, 0.0  ;;  %v2760_v20 = vld [vmem:[%s4142_s0 + $0x2e4] sm:$0xf] }
 0x1ac   :  { %v1427_v40 = vpop.f32.mrf.mxu2  ;;  %v2355_v0 = vor.u32 %v2760_v20, %v2352_v56 }
 0x1ad   :  { %v2870_v43 = vpack.c.bf16 %v1853_v42, %v1852_v36  ;;  %v1428_v14 = vadd.f32 %v1427_v40, %v3592_v52  ;;  %v2768_v52 = vld [vmem:[%s4142_s0 + $0x31c] sm:$0xf0]  ;;  %v2351_v36 = vor.u32 %v2763_v8, %v2350_v5 }
 0x1ae   :  { %v1541_v3 = vpop.f32.mrf.mxu3  ;;  %v1653_v34 = vpop.f32.mrf.mxu0  ;;  %v2367_v32 = vor.u32 %v2768_v52, %v2366_v55 }
 0x1af   :  { %2951 = vst [vmem:[%s4143_s3 + $0x28] sm:$0xff] %v2870_v43   ;;  %v1767_v19 = vpop.f32.mrf.mxu1  ;;  %v1654_v44 = vadd.f32 %v1653_v34, %v1540_v16  ;;  %v1542_v46 = vadd.f32 %v1541_v3, %v1428_v14  ;;  %v2390_v14 = vld [vmem:[%s4142_s0 + $0x338] sm:$0xf] }
 0x1b1   :  { %1469 = vmatmul.bf16.gmra.mxu2 %v2343_v33  ;;  %1692 = vmatmul.bf16.gmra.mxu0 %v2327_v4  ;;  %v1768_v50 = vadd.f32 %v1767_v19, %v1654_v44  ;;  %v2771_v44 = vld [vmem:[%s4142_s0 + $0x33c] sm:$0xf] }
 0x1b2   :  { %1806 = vmatmul.bf16.gmra.mxu1 %v2331_v62 }
 0x1b3   :  { %1583 = vmatmul.bf16.gmra.mxu3 %v2347_v13  ;;  %v1854_v27 = vmax.f32 %v1768_v50, 0.0 }
 0x1b4   :  { %v1430_v45 = vpop.f32.mrf.mxu2 }
 0x1b5   :  { %v1431_v28 = vadd.f32 %v1430_v45, %v3622_v21  ;;  %v2392_v45 = vld [vmem:[%s4142_s0 + $0x350] sm:$0xf0] }
 0x1b6   :  { %v1544_v47 = vpop.f32.mrf.mxu3  ;;  %v1655_v48 = vpop.f32.mrf.mxu0 }
 0x1b7   :  { %v1656_v51 = vadd.f32 %v1655_v48, %v1542_v46  ;;  %v1769_v54 = vpop.f32.mrf.mxu1  ;;  %v1545_v15 = vadd.f32 %v1544_v47, %v1431_v28  ;;  %v2374_v46 = vld [vmem:[%s4142_s0 + $0x310] sm:$0xf]  ;;  %v2769_v47 = vld [vmem:[%s4142_s0 + $0x324] sm:$0xf0] }
 0x1b8   :  { %v2375_v5 = vor.u32 %v2769_v47, %v2374_v46 }
 0x1b9   :  { %v1770_v2 = vadd.f32 %v1769_v54, %v1656_v51  ;;  %v2766_v51 = vld [vmem:[%s4142_s0 + $0x314] sm:$0xf]  ;;  %v2376_v54 = vld [vmem:[%s4142_s0 + $0x328] sm:$0xf0] }
 0x1bb   :  { %v1855_v17 = vmax.f32 %v1770_v2, 0.0 }
 0x1bc   :  { %v1432_v12 = vpop.f32.mrf.mxu2 }
 0x1bd   :  { %v2875_v60 = vpack.c.bf16 %v1855_v17, %v1854_v27  ;;  %v1433_v43 = vadd.f32 %v1432_v12, %v3628_v38  ;;  %v2774_v38 = vld [vmem:[%s4142_s0 + $0x34c] sm:$0xf0]  ;;  %v2395_v27 = vor.u32 %v2771_v44, %v2392_v45  ;;  %v2379_v17 = vor.u32 %v2766_v51, %v2376_v54 }
 0x1be   :  { %v1546_v25 = vpop.f32.mrf.mxu3  ;;  %v1658_v42 = vpop.f32.mrf.mxu0  ;;  %v2391_v59 = vor.u32 %v2774_v38, %v2390_v14 }
 0x1bf   :  { %2952 = vst [vmem:[%s4143_s3 + $0x30] sm:$0xff] %v2875_v60   ;;  %v1772_v40 = vpop.f32.mrf.mxu1  ;;  %v1659_v21 = vadd.f32 %v1658_v42, %v1545_v15  ;;  %v1547_v33 = vadd.f32 %v1546_v25, %v1433_v43  ;;  %v2777_v15 = vld [vmem:[%s4142_s0 + $0x36c] sm:$0xf]  ;;  %v2416_v43 = vld [vmem:[%s4142_s0 + $0x380] sm:$0xf0] }
 0x1c0   :  { %v2419_v46 = vor.u32 %v2777_v15, %v2416_v43 }
 0x1c1   :  { %1474 = vmatmul.bf16.gmra.mxu2 %v2367_v32  ;;  %1697 = vmatmul.bf16.gmra.mxu0 %v2351_v36  ;;  %v1773_v13 = vadd.f32 %v1772_v40, %v1659_v21  ;;  %v2414_v40 = vld [vmem:[%s4142_s0 + $0x368] sm:$0xf]  ;;  %v2398_v21 = vld [vmem:[%s4142_s0 + $0x340] sm:$0xf] }
 0x1c2   :  { %1811 = vmatmul.bf16.gmra.mxu1 %v2355_v0 }
 0x1c3   :  { %1588 = vmatmul.bf16.gmra.mxu3 %v2371_v39  ;;  %v1856_v48 = vmax.f32 %v1773_v13, 0.0  ;;  %v2400_v13 = vld [vmem:[%s4142_s0 + $0x358] sm:$0xf0] }
 0x1c4   :  { %v1435_v3 = vpop.f32.mrf.mxu2 }
 0x1c5   :  { %v1436_v55 = vadd.f32 %v1435_v3, %v3658_v11  ;;  %v2775_v3 = vld [vmem:[%s4142_s0 + $0x354] sm:$0xf0] }
 0x1c6   :  { %v1549_v4 = vpop.f32.mrf.mxu3  ;;  %v1660_v34 = vpop.f32.mrf.mxu0  ;;  %v2399_v44 = vor.u32 %v2775_v3, %v2398_v21 }
 0x1c7   :  { %v1661_v62 = vadd.f32 %v1660_v34, %v1547_v33  ;;  %v1774_v19 = vpop.f32.mrf.mxu1  ;;  %v1550_v56 = vadd.f32 %v1549_v4, %v1436_v55  ;;  %v2772_v34 = vld [vmem:[%s4142_s0 + $0x344] sm:$0xf] }
 0x1c8   :  { %v2403_v47 = vor.u32 %v2772_v34, %v2400_v13 }
 0x1c9   :  { %v1775_v16 = vadd.f32 %v1774_v19, %v1661_v62 }
 0x1cb   :  { %v1857_v50 = vmax.f32 %v1775_v16, 0.0 }
 0x1cc   :  { %v1437_v2 = vpop.f32.mrf.mxu2 }
 0x1cd   :  { %v2880_v52 = vpack.c.bf16 %v1857_v50, %v1856_v48  ;;  %v1438_v12 = vadd.f32 %v1437_v2, %v3664_v26  ;;  %v2780_v26 = vld [vmem:[%s4142_s0 + $0x37c] sm:$0xf0] }
 0x1ce   :  { %v1551_v58 = vpop.f32.mrf.mxu3  ;;  %v1663_v8 = vpop.f32.mrf.mxu0  ;;  %v2415_v38 = vor.u32 %v2780_v26, %v2414_v40 }
 0x1cf   :  { %2953 = vst [vmem:[%s4143_s3 + $0x38] sm:$0xff] %v2880_v52   ;;  %v1777_v20 = vpop.f32.mrf.mxu1  ;;  %v1664_v11 = vadd.f32 %v1663_v8, %v1550_v56  ;;  %v1552_v60 = vadd.f32 %v1551_v58, %v1438_v12  ;;  %v2422_v56 = vld [vmem:[%s4142_s0 + $0x370] sm:$0xf]  ;;  %v2781_v12 = vld [vmem:[%s4142_s0 + $0x384] sm:$0xf0] }
 0x1d0   :  { %v2423_v40 = vor.u32 %v2781_v12, %v2422_v56 }
 0x1d1   :  { %1479 = vmatmul.bf16.gmra.mxu2 %v2391_v59  ;;  %1702 = vmatmul.bf16.gmra.mxu0 %v2375_v5  ;;  %v1778_v36 = vadd.f32 %v1777_v20, %v1664_v11  ;;  %v2440_v20 = vld [vmem:[%s4142_s0 + $0x3b0] sm:$0xf0] }
 0x1d2   :  { %1816 = vmatmul.bf16.gmra.mxu1 %v2379_v17  ;;  %v2783_v17 = vld [vmem:[%s4142_s0 + $0x39c] sm:$0xf] }
 0x1d3   :  { %1593 = vmatmul.bf16.gmra.mxu3 %v2395_v27  ;;  %v1858_v33 = vmax.f32 %v1778_v36, 0.0  ;;  %v2438_v27 = vld [vmem:[%s4142_s0 + $0x398] sm:$0xf]  ;;  %v2443_v15 = vor.u32 %v2783_v17, %v2440_v20 }
 0x1d4   :  { %v1440_v28 = vpop.f32.mrf.mxu2 }
 0x1d5   :  { %v1441_v19 = vadd.f32 %v1440_v28, %v3694_v6 }
 0x1d6   :  { %v1554_v25 = vpop.f32.mrf.mxu3  ;;  %v1665_v32 = vpop.f32.mrf.mxu0 }
 0x1d7   :  { %v1666_v42 = vadd.f32 %v1665_v32, %v1552_v60  ;;  %v1779_v39 = vpop.f32.mrf.mxu1  ;;  %v1555_v50 = vadd.f32 %v1554_v25, %v1441_v19  ;;  %v2778_v60 = vld [vmem:[%s4142_s0 + $0x374] sm:$0xf]  ;;  %v2424_v25 = vld [vmem:[%s4142_s0 + $0x388] sm:$0xf0] }
 0x1d8   :  { %v2427_v43 = vor.u32 %v2778_v60, %v2424_v25 }
 0x1d9   :  { %v1780_v0 = vadd.f32 %v1779_v39, %v1666_v42 }
 0x1db   :  { %v1859_v4 = vmax.f32 %v1780_v0, 0.0 }
 0x1dc   :  { %v1442_v62 = vpop.f32.mrf.mxu2 }
 0x1dd   :  { %v2885_v16 = vpack.c.bf16 %v1859_v4, %v1858_v33  ;;  %v1443_v51 = vadd.f32 %v1442_v62, %v3700_v24  ;;  %v2786_v24 = vld [vmem:[%s4142_s0 + $0x3ac] sm:$0xf0] }
 0x1de   :  { %v1556_v14 = vpop.f32.mrf.mxu3  ;;  %v1668_v45 = vpop.f32.mrf.mxu0  ;;  %v2439_v0 = vor.u32 %v2786_v24, %v2438_v27 }
 0x1df   :  { %2954 = vst [vmem:[%s4143_s3 + $0x40] sm:$0xff] %v2885_v16   ;;  %v1782_v48 = vpop.f32.mrf.mxu1  ;;  %v1669_v6 = vadd.f32 %v1668_v45, %v1555_v50  ;;  %v1557_v2 = vadd.f32 %v1556_v14, %v1443_v51  ;;  %v2789_v45 = vld [vmem:[%s4142_s0 + $0x3cc] sm:$0xf] }
 0x1e1   :  { %1484 = vmatmul.bf16.gmra.mxu2 %v2415_v38  ;;  %1707 = vmatmul.bf16.gmra.mxu0 %v2399_v44  ;;  %v1783_v58 = vadd.f32 %v1782_v48, %v1669_v6  ;;  %v2462_v44 = vld [vmem:[%s4142_s0 + $0x3c8] sm:$0xf]  ;;  %v2787_v48 = vld [vmem:[%s4142_s0 + $0x3b4] sm:$0xf0]  ;;  %v2784_v6 = vld [vmem:[%s4142_s0 + $0x3a4] sm:$0xf] }
 0x1e2   :  { %1821 = vmatmul.bf16.gmra.mxu1 %v2403_v47  ;;  %v2446_v47 = vld [vmem:[%s4142_s0 + $0x3a0] sm:$0xf] }
 0x1e3   :  { %1598 = vmatmul.bf16.gmra.mxu3 %v2419_v46  ;;  %v1860_v11 = vmax.f32 %v1783_v58, 0.0  ;;  %v2464_v46 = vld [vmem:[%s4142_s0 + $0x3e0] sm:$0xf0] }
 0x1e4   :  { %v1445_v54 = vpop.f32.mrf.mxu2  ;;  %v2467_v27 = vor.u32 %v2789_v45, %v2464_v46 }
 0x1e5   :  { %v1446_v36 = vadd.f32 %v1445_v54, %v3730_v10  ;;  %v2448_v54 = vld [vmem:[%s4142_s0 + $0x3b8] sm:$0xf0] }
 0x1e6   :  { %v1559_v55 = vpop.f32.mrf.mxu3  ;;  %v1670_v52 = vpop.f32.mrf.mxu0  ;;  %v2451_v24 = vor.u32 %v2784_v6, %v2448_v54 }
 0x1e7   :  { %v1671_v59 = vadd.f32 %v1670_v52, %v1557_v2  ;;  %v1784_v5 = vpop.f32.mrf.mxu1  ;;  %v1560_v3 = vadd.f32 %v1559_v55, %v1446_v36 }
 0x1e9   :  { %v1785_v8 = vadd.f32 %v1784_v5, %v1671_v59  ;;  %v2447_v5 = vor.u32 %v2787_v48, %v2446_v47 }
 0x1eb   :  { %v1861_v28 = vmax.f32 %v1785_v8, 0.0 }
 0x1ec   :  { %v1447_v32 = vpop.f32.mrf.mxu2 }
 0x1ed   :  { %v2890_v42 = vpack.c.bf16 %v1861_v28, %v1860_v11  ;;  %v1448_v33 = vadd.f32 %v1447_v32, %v3733_v29  ;;  %v2792_v29 = vld [vmem:[%s4142_s0 + $0x3dc] sm:$0xf0] }
 0x1ee   :  { %v1561_v39 = vpop.f32.mrf.mxu3  ;;  %v1673_v26 = vpop.f32.mrf.mxu0  ;;  %v2463_v59 = vor.u32 %v2792_v29, %v2462_v44 }
 0x1ef   :  { %2955 = vst [vmem:[%s4143_s3 + $0x48] sm:$0xff] %v2890_v42   ;;  %v1787_v21 = vpop.f32.mrf.mxu1  ;;  %v1674_v10 = vadd.f32 %v1673_v26, %v1560_v3  ;;  %v1562_v34 = vadd.f32 %v1561_v39, %v1448_v33  ;;  %v2470_v39 = vld [vmem:[%s4142_s0 + $0x3d0] sm:$0xf]  ;;  %v2790_v26 = vld [vmem:[%s4142_s0 + $0x3d4] sm:$0xf] }
 0x1f1   :  { %1489 = vmatmul.bf16.gmra.mxu2 %v2439_v0  ;;  %1712 = vmatmul.bf16.gmra.mxu0 %v2423_v40  ;;  %v1788_v19 = vadd.f32 %v1787_v21, %v1674_v10 }
 0x1f2   :  { %1826 = vmatmul.bf16.gmra.mxu1 %v2427_v43 }
 0x1f3   :  { %1603 = vmatmul.bf16.gmra.mxu3 %v2443_v15  ;;  %v1862_v50 = vmax.f32 %v1788_v19, 0.0  ;;  %v2472_v15 = vld [vmem:[%s4142_s0 + $0x3e8] sm:$0xf0] }
 0x1f4   :  { %v1450_v4 = vpop.f32.mrf.mxu2 }
 0x1f5   :  { %v1451_v55 = vadd.f32 %v1450_v4, %v3373_v37 }
 0x1f6   :  { %v1564_v13 = vpop.f32.mrf.mxu3  ;;  %v1675_v62 = vpop.f32.mrf.mxu0 }
 0x1f7   :  { %v1676_v16 = vadd.f32 %v1675_v62, %v1562_v34  ;;  %v1789_v14 = vpop.f32.mrf.mxu1  ;;  %v1565_v20 = vadd.f32 %v1564_v13, %v1451_v55  ;;  %v2475_v34 = vor.u32 %v2790_v26, %v2472_v15 }
 0x1f9   :  { %v1790_v38 = vadd.f32 %v1789_v14, %v1676_v16 }
 0x1fb   :  { %v1863_v51 = vmax.f32 %v1790_v38, 0.0 }
 0x1fc   :  { %v1452_v2 = vpop.f32.mrf.mxu2 }
 0x1fd   :  { %v2895_v52 = vpack.c.bf16 %v1863_v51, %v1862_v50  ;;  %v1453_v56 = vadd.f32 %v1452_v2, %v3403_v57  ;;  %v2793_v57 = vld [vmem:[%s4142_s0 + $0x3e4] sm:$0xf0] }
 0x1fe   :  { %v1566_v58 = vpop.f32.mrf.mxu3  ;;  %v1678_v8 = vpop.f32.mrf.mxu0  ;;  %v2471_v10 = vor.u32 %v2793_v57, %v2470_v39 }
 0x1ff   :  { %2956 = vst [vmem:[%s4143_s3 + $0x50] sm:$0xff] %v2895_v52   ;;  %v1792_v17 = vpop.f32.mrf.mxu1  ;;  %v1679_v37 = vadd.f32 %v1678_v8, %v1565_v20  ;;  %v1567_v11 = vadd.f32 %v1566_v58, %v1453_v56 }
 0x201   :  { %1494 = vmatmul.bf16.gmra.mxu2 %v2463_v59  ;;  %1717 = vmatmul.bf16.gmra.mxu0 %v2447_v5  ;;  %v1793_v25 = vadd.f32 %v1792_v17, %v1679_v37 }
 0x202   :  { %1831 = vmatmul.bf16.gmra.mxu1 %v2451_v24 }
 0x203   :  { %1608 = vmatmul.bf16.gmra.mxu3 %v2467_v27  ;;  %v1864_v0 = vmax.f32 %v1793_v25, 0.0 }
 0x204   :  { %v1455_v12 = vpop.f32.mrf.mxu2 }
 0x205   :  { %v1456_v21 = vadd.f32 %v1455_v12, %v3409_v1 }
 0x206   :  { %v1569_v28 = vpop.f32.mrf.mxu3  ;;  %v1680_v60 = vpop.f32.mrf.mxu0 }
 0x207   :  { %v1681_v32 = vadd.f32 %v1680_v60, %v1567_v11  ;;  %v1794_v36 = vpop.f32.mrf.mxu1  ;;  %v1570_v62 = vadd.f32 %v1569_v28, %v1456_v21 }
 0x209   :  { %v1795_v42 = vadd.f32 %v1794_v36, %v1681_v32 }
 0x20b   :  { %v1865_v40 = vmax.f32 %v1795_v42, 0.0 }
 0x20c   :  { %v1457_v43 = vpop.f32.mrf.mxu2 }
 0x20d   :  { %v2900_v3 = vpack.c.bf16 %v1865_v40, %v1864_v0  ;;  %v1458_v19 = vadd.f32 %v1457_v43, %v3439_v22 }
 0x20e   :  { %v1571_v33 = vpop.f32.mrf.mxu3  ;;  %v1683_v4 = vpop.f32.mrf.mxu0 }
 0x20f   :  { %2957 = vst [vmem:[%s4143_s3 + $0x58] sm:$0xff] %v2900_v3   ;;  %v1797_v13 = vpop.f32.mrf.mxu1  ;;  %v1684_v16 = vadd.f32 %v1683_v4, %v1570_v62  ;;  %v1572_v38 = vadd.f32 %v1571_v33, %v1458_v19 }
 0x211   :  { %1722 = vmatmul.bf16.gmra.mxu0 %v2471_v10  ;;  %v1798_v29 = vadd.f32 %v1797_v13, %v1684_v16 }
 0x212   :  { %1836 = vmatmul.bf16.gmra.mxu1 %v2475_v34 }
 0x213   :  { %v1866_v48 = vmax.f32 %v1798_v29, 0.0 }
 0x214   :  { %v1460_v14 = vpop.f32.mrf.mxu2 }
 0x215   :  { %v1461_v6 = vadd.f32 %v1460_v14, %v3445_v30 }
 0x216   :  { %v1574_v44 = vpop.f32.mrf.mxu3  ;;  %v1685_v1 = vpop.f32.mrf.mxu0 }
 0x217   :  { %v1686_v45 = vadd.f32 %v1685_v1, %v1572_v38  ;;  %v1799_v46 = vpop.f32.mrf.mxu1  ;;  %v1575_v52 = vadd.f32 %v1574_v44, %v1461_v6 }
 0x219   :  { %v1800_v47 = vadd.f32 %v1799_v46, %v1686_v45 }
 0x21b   :  { %v1867_v50 = vmax.f32 %v1800_v47, 0.0 }
 0x21c   :  { %v1462_v51 = vpop.f32.mrf.mxu2 }
 0x21d   :  { %v2905_v54 = vpack.c.bf16 %v1867_v50, %v1866_v48  ;;  %v1463_v58 = vadd.f32 %v1462_v51, %v3475_v53 }
 0x21e   :  { %v1576_v2 = vpop.f32.mrf.mxu3  ;;  %v1688_v55 = vpop.f32.mrf.mxu0 }
 0x21f   :  { %2958 = vst [vmem:[%s4143_s3 + $0x60] sm:$0xff] %v2905_v54   ;;  %v1802_v22 = vpop.f32.mrf.mxu1  ;;  %v1689_v59 = vadd.f32 %v1688_v55, %v1575_v52  ;;  %v1577_v8 = vadd.f32 %v1576_v2, %v1463_v58 }
 0x221   :  { %v1803_v17 = vadd.f32 %v1802_v22, %v1689_v59 }
 0x223   :  { %v1868_v37 = vmax.f32 %v1803_v17, 0.0 }
 0x224   :  { %v1465_v5 = vpop.f32.mrf.mxu2 }
 0x225   :  { %v1466_v28 = vadd.f32 %v1465_v5, %v3481_v63 }
 0x226   :  { %v1579_v27 = vpop.f32.mrf.mxu3  ;;  %v1690_v24 = vpop.f32.mrf.mxu0 }
 0x227   :  { %v1691_v20 = vadd.f32 %v1690_v24, %v1577_v8  ;;  %v1804_v56 = vpop.f32.mrf.mxu1  ;;  %v1580_v36 = vadd.f32 %v1579_v27, %v1466_v28 }
 0x229   :  { %v1805_v30 = vadd.f32 %v1804_v56, %v1691_v20 }
 0x22b   :  { %v1869_v12 = vmax.f32 %v1805_v30, 0.0 }
 0x22c   :  { %v1467_v11 = vpop.f32.mrf.mxu2 }
 0x22d   :  { %v2910_v60 = vpack.c.bf16 %v1869_v12, %v1868_v37  ;;  %v1468_v42 = vadd.f32 %v1467_v11, %v3511_v23 }
 0x22e   :  { %v1581_v25 = vpop.f32.mrf.mxu3  ;;  %v1693_v32 = vpop.f32.mrf.mxu0 }
 0x22f   :  { %2959 = vst [vmem:[%s4143_s3 + $0x68] sm:$0xff] %v2910_v60   ;;  %v1807_v53 = vpop.f32.mrf.mxu1  ;;  %v1694_v39 = vadd.f32 %v1693_v32, %v1580_v36  ;;  %v1582_v0 = vadd.f32 %v1581_v25, %v1468_v42 }
 0x231   :  { %v1808_v15 = vadd.f32 %v1807_v53, %v1694_v39 }
 0x233   :  { %v1870_v3 = vmax.f32 %v1808_v15, 0.0 }
 0x234   :  { %v1470_v57 = vpop.f32.mrf.mxu2 }
 0x235   :  { %v1471_v4 = vadd.f32 %v1470_v57, %v3517_v35 }
 0x236   :  { %v1584_v40 = vpop.f32.mrf.mxu3  ;;  %v1695_v26 = vpop.f32.mrf.mxu0 }
 0x237   :  { %v1696_v43 = vadd.f32 %v1695_v26, %v1582_v0  ;;  %v1809_v21 = vpop.f32.mrf.mxu1  ;;  %v1585_v19 = vadd.f32 %v1584_v40, %v1471_v4 }
 0x239   :  { %v1810_v63 = vadd.f32 %v1809_v21, %v1696_v43 }
 0x23b   :  { %v1871_v33 = vmax.f32 %v1810_v63, 0.0 }
 0x23c   :  { %v1472_v10 = vpop.f32.mrf.mxu2 }
 0x23d   :  { %v2915_v34 = vpack.c.bf16 %v1871_v33, %v1870_v3  ;;  %v1473_v16 = vadd.f32 %v1472_v10, %v3547_v61 }
 0x23e   :  { %v1586_v13 = vpop.f32.mrf.mxu3  ;;  %v1698_v62 = vpop.f32.mrf.mxu0 }
 0x23f   :  { %2960 = vst [vmem:[%s4143_s3 + $0x70] sm:$0xff] %v2915_v34   ;;  %v1812_v23 = vpop.f32.mrf.mxu1  ;;  %v1699_v14 = vadd.f32 %v1698_v62, %v1585_v19  ;;  %v1587_v44 = vadd.f32 %v1586_v13, %v1473_v16 }
 0x241   :  { %v1813_v45 = vadd.f32 %v1812_v23, %v1699_v14 }
 0x243   :  { %v1872_v48 = vmax.f32 %v1813_v45, 0.0 }
 0x244   :  { %v1475_v38 = vpop.f32.mrf.mxu2 }
 0x245   :  { %v1476_v6 = vadd.f32 %v1475_v38, %v3553_v9 }
 0x246   :  { %v1589_v1 = vpop.f32.mrf.mxu3  ;;  %v1700_v29 = vpop.f32.mrf.mxu0 }
 0x247   :  { %v1701_v46 = vadd.f32 %v1700_v29, %v1587_v44  ;;  %v1814_v47 = vpop.f32.mrf.mxu1  ;;  %v1590_v22 = vadd.f32 %v1589_v1, %v1476_v6  ;;  %v4149_v6 = vld [vmem:[#allocation3_spill] sm:$0xff] }
 0x249   :  { %v1815_v35 = vadd.f32 %v1814_v47, %v1701_v46  ;;  %v4148_v46 = vld [vmem:[#allocation2_spill] sm:$0xff] }
 0x24b   :  { %v1873_v50 = vmax.f32 %v1815_v35, 0.0 }
 0x24c   :  { %v1477_v51 = vpop.f32.mrf.mxu2 }
 0x24d   :  { %v2920_v54 = vpack.c.bf16 %v1873_v50, %v1872_v48  ;;  %v1478_v52 = vadd.f32 %v1477_v51, %v3583_v41 }
 0x24e   :  { %v1591_v2 = vpop.f32.mrf.mxu3  ;;  %v1703_v55 = vpop.f32.mrf.mxu0 }
 0x24f   :  { %2961 = vst [vmem:[%s4143_s3 + $0x78] sm:$0xff] %v2920_v54   ;;  %v1817_v61 = vpop.f32.mrf.mxu1  ;;  %v1704_v58 = vadd.f32 %v1703_v55, %v1590_v22  ;;  %v1592_v5 = vadd.f32 %v1591_v2, %v1478_v52 }
 0x251   :  { %v1818_v24 = vadd.f32 %v1817_v61, %v1704_v58 }
 0x253   :  { %v1874_v56 = vmax.f32 %v1818_v24, 0.0 }
 0x254   :  { %v1480_v59 = vpop.f32.mrf.mxu2 }
 0x255   :  { %v1481_v12 = vadd.f32 %v1480_v59, %v3589_v49 }
 0x256   :  { %v1594_v8 = vpop.f32.mrf.mxu3  ;;  %v1705_v27 = vpop.f32.mrf.mxu0 }
 0x257   :  { %v1706_v17 = vadd.f32 %v1705_v27, %v1592_v5  ;;  %v1819_v20 = vpop.f32.mrf.mxu1  ;;  %v1595_v25 = vadd.f32 %v1594_v8, %v1481_v12 }
 0x259   :  { %v1820_v9 = vadd.f32 %v1819_v20, %v1706_v17  ;;  %v4150_v17 = vld [vmem:[#allocation4_spill] sm:$0xff] }
 0x25b   :  { %v1875_v30 = vmax.f32 %v1820_v9, 0.0 }
 0x25c   :  { %v1482_v37 = vpop.f32.mrf.mxu2 }
 0x25d   :  { %v2925_v11 = vpack.c.bf16 %v1875_v30, %v1874_v56  ;;  %v1483_v32 = vadd.f32 %v1482_v37, %v3619_v18 }
 0x25e   :  { %v1596_v28 = vpop.f32.mrf.mxu3  ;;  %v1708_v60 = vpop.f32.mrf.mxu0 }
 0x25f   :  { %2962 = vst [vmem:[%s4143_s3 + $0x80] sm:$0xff] %v2925_v11   ;;  %v1822_v41 = vpop.f32.mrf.mxu1  ;;  %v1709_v53 = vadd.f32 %v1708_v60, %v1595_v25  ;;  %v1597_v42 = vadd.f32 %v1596_v28, %v1483_v32  ;;  %v4151_v11 = vld [vmem:[#allocation5_spill] sm:$0xff] }
 0x261   :  { %v1823_v0 = vadd.f32 %v1822_v41, %v1709_v53 }
 0x263   :  { %v1876_v15 = vmax.f32 %v1823_v0, 0.0 }
 0x264   :  { %v1485_v36 = vpop.f32.mrf.mxu2 }
 0x265   :  { %v1486_v63 = vadd.f32 %v1485_v36, %v3625_v31 }
 0x266   :  { %v1599_v39 = vpop.f32.mrf.mxu3  ;;  %v1710_v57 = vpop.f32.mrf.mxu0 }
 0x267   :  { %v1711_v40 = vadd.f32 %v1710_v57, %v1597_v42  ;;  %v1824_v26 = vpop.f32.mrf.mxu1  ;;  %v1600_v4 = vadd.f32 %v1599_v39, %v1486_v63 }
 0x269   :  { %v1825_v49 = vadd.f32 %v1824_v26, %v1711_v40 }
 0x26b   :  { %v1877_v43 = vmax.f32 %v1825_v49, 0.0 }
 0x26c   :  { %v1487_v21 = vpop.f32.mrf.mxu2 }
 0x26d   :  { %v2930_v3 = vpack.c.bf16 %v1877_v43, %v1876_v15  ;;  %v1488_v34 = vadd.f32 %v1487_v21, %v3655_v7 }
 0x26e   :  { %v1601_v33 = vpop.f32.mrf.mxu3  ;;  %v1713_v10 = vpop.f32.mrf.mxu0 }
 0x26f   :  { %2963 = vst [vmem:[%s4143_s3 + $0x88] sm:$0xff] %v2930_v3   ;;  %v1827_v18 = vpop.f32.mrf.mxu1  ;;  %v1714_v13 = vadd.f32 %v1713_v10, %v1600_v4  ;;  %v1602_v23 = vadd.f32 %v1601_v33, %v1488_v34 }
 0x271   :  { %v1828_v14 = vadd.f32 %v1827_v18, %v1714_v13 }
 0x273   :  { %v1878_v1 = vmax.f32 %v1828_v14, 0.0 }
 0x274   :  { %v1490_v62 = vpop.f32.mrf.mxu2 }
 0x275   :  { %v1491_v47 = vadd.f32 %v1490_v62, %v4148_v46 }
 0x276   :  { %v1604_v19 = vpop.f32.mrf.mxu3  ;;  %v1715_v16 = vpop.f32.mrf.mxu0 }
 0x277   :  { %v1716_v38 = vadd.f32 %v1715_v16, %v1602_v23  ;;  %v1829_v44 = vpop.f32.mrf.mxu1  ;;  %v1605_v51 = vadd.f32 %v1604_v19, %v1491_v47 }
 0x279   :  { %v1830_v31 = vadd.f32 %v1829_v44, %v1716_v38 }
 0x27b   :  { %v1879_v29 = vmax.f32 %v1830_v31, 0.0 }
 0x27c   :  { %v1492_v45 = vpop.f32.mrf.mxu2 }
 0x27d   :  { %v2935_v35 = vpack.c.bf16 %v1879_v29, %v1878_v1  ;;  %v1493_v54 = vadd.f32 %v1492_v45, %v4149_v6 }
 0x27e   :  { %v1718_v48 = vpop.f32.mrf.mxu0  ;;  %v1606_v50 = vpop.f32.mrf.mxu3 }
 0x27f   :  { %2964 = vst [vmem:[%s4143_s3 + $0x90] sm:$0xff] %v2935_v35   ;;  %v1832_v7 = vpop.f32.mrf.mxu1  ;;  %v1719_v2 = vadd.f32 %v1718_v48, %v1605_v51  ;;  %v1607_v61 = vadd.f32 %v1606_v50, %v1493_v54 }
 0x281   :  { %v1833_v52 = vadd.f32 %v1832_v7, %v1719_v2 }
 0x283   :  { %v1880_v27 = vmax.f32 %v1833_v52, 0.0 }
 0x284   :  { %v1495_v55 = vpop.f32.mrf.mxu2 }
 0x285   :  { %v1496_v20 = vadd.f32 %v1495_v55, %v4150_v17 }
 0x286   :  { %v1720_v22 = vpop.f32.mrf.mxu0  ;;  %v1609_v8 = vpop.f32.mrf.mxu3 }
 0x287   :  { %v1721_v58 = vadd.f32 %v1720_v22, %v1607_v61  ;;  %v1834_v59 = vpop.f32.mrf.mxu1  ;;  %v1610_v12 = vadd.f32 %v1609_v8, %v1496_v20 }
 0x289   :  { %v1835_v5 = vadd.f32 %v1834_v59, %v1721_v58 }
 0x28b   :  { %v1881_v24 = vmax.f32 %v1835_v5, 0.0 }
 0x28c   :  { %v1497_v56 = vpop.f32.mrf.mxu2 }
 0x28d   :  { %v2940_v9 = vpack.c.bf16 %v1881_v24, %v1880_v27  ;;  %v1498_v28 = vadd.f32 %v1497_v56, %v4151_v11 }
 0x28e   :  { %v1723_v30 = vpop.f32.mrf.mxu0  ;;  %v1611_v41 = vpop.f32.mrf.mxu3 }
 0x28f   :  { %2965 = vst [vmem:[%s4143_s3 + $0x98] sm:$0xff] %v2940_v9   ;;  %v1837_v37 = vpop.f32.mrf.mxu1  ;;  %v1724_v60 = vadd.f32 %v1723_v30, %v1610_v12  ;;  %v1612_v25 = vadd.f32 %v1611_v41, %v1498_v28 }
 0x291   :  { %v1838_v53 = vadd.f32 %v1837_v37, %v1724_v60 }
 0x293   :  { %v1882_v57 = vmax.f32 %v1838_v53, 0.0 }
 0x296   :  { %v1725_v32 = vpop.f32.mrf.mxu0 }
 0x297   :  { %v1726_v36 = vadd.f32 %v1725_v32, %v1612_v25  ;;  %v1839_v42 = vpop.f32.mrf.mxu1 }
 0x299   :  { %v1840_v39 = vadd.f32 %v1839_v42, %v1726_v36 }
 0x29b   :  { %v1883_v0 = vmax.f32 %v1840_v39, 0.0 }
 0x29d   :  { %v2945_v40 = vpack.c.bf16 %v1883_v0, %v1882_v57 }
 0x29f   :  { %2966 = vst [vmem:[%s4143_s3 + $0xa0] sm:$0xff] %v2945_v40  }

// kernel: dqn_forward.5
= control target key start
LH: loop header
LB: loop body
LE: loop exit
PB: predicated region body
PF: predicated region fallthrough
CT: control target
= control target key end

     0   :  { %s902_s1 = inlined_call_operand.vmem [shape: bf16[512,128], index: 1, kind: input, shape index: {}]   ;;  %s903_s2 = inlined_call_operand.vmem [shape: f32[1,128], index: 2, kind: input, shape index: {}]   ;;  %s904_s0 = inlined_call_operand.vmem [shape: bf16[48,512], index: 0, kind: input, shape index: {}]   ;;  %s905_s3 = inlined_call_operand.vmem [shape: bf16[48,128], index: 3, kind: output, shape index: {}]  }
   0x1   :  { %v659_v0 = vld [vmem:[%s902_s1 + $0x38] sm:$0xff]  ;;  %v658_v4 = vld [vmem:[%s902_s1 + $0x30] sm:$0xff]  ;;  %v657_v8 = vld [vmem:[%s902_s1 + $0x28] sm:$0xff] }
   0x2   :  { %v667_v1 = vld [vmem:[%s902_s1 + $0x78] sm:$0xff]  ;;  %346 = vmatpush.bf16.msra.mxu0 %v659_v0  ;;  %v666_v5 = vld [vmem:[%s902_s1 + $0x70] sm:$0xff]  ;;  %v665_v9 = vld [vmem:[%s902_s1 + $0x68] sm:$0xff] }
   0x3   :  { %v675_v2 = vld [vmem:[%s902_s1 + $0xb8] sm:$0xff]  ;;  %370 = vmatpush.bf16.msra.mxu1 %v667_v1  ;;  %v674_v6 = vld [vmem:[%s902_s1 + $0xb0] sm:$0xff]  ;;  %v673_v10 = vld [vmem:[%s902_s1 + $0xa8] sm:$0xff] }
   0x4   :  { %v683_v3 = vld [vmem:[%s902_s1 + $0xf8] sm:$0xff]  ;;  %394 = vmatpush.bf16.msra.mxu2 %v675_v2  ;;  %v682_v7 = vld [vmem:[%s902_s1 + $0xf0] sm:$0xff]  ;;  %v681_v11 = vld [vmem:[%s902_s1 + $0xe8] sm:$0xff] }
   0x5   :  { %418 = vmatpush.bf16.msra.mxu3 %v683_v3  ;;  %v656_v12 = vld [vmem:[%s902_s1 + $0x20] sm:$0xff]  ;;  %v655_v16 = vld [vmem:[%s902_s1 + $0x18] sm:$0xff]  ;;  %v654_v20 = vld [vmem:[%s902_s1 + $0x10] sm:$0xff] }
   0x6   :  { %347 = vmatpush.bf16.msra.mxu0 %v658_v4  ;;  %v664_v13 = vld [vmem:[%s902_s1 + $0x60] sm:$0xff]  ;;  %v663_v17 = vld [vmem:[%s902_s1 + $0x58] sm:$0xff]  ;;  %v662_v21 = vld [vmem:[%s902_s1 + $0x50] sm:$0xff] }
   0x7   :  { %371 = vmatpush.bf16.msra.mxu1 %v666_v5  ;;  %v672_v14 = vld [vmem:[%s902_s1 + $0xa0] sm:$0xff]  ;;  %v671_v18 = vld [vmem:[%s902_s1 + $0x98] sm:$0xff]  ;;  %v670_v22 = vld [vmem:[%s902_s1 + $0x90] sm:$0xff] }
   0x8   :  { %395 = vmatpush.bf16.msra.mxu2 %v674_v6  ;;  %v680_v15 = vld [vmem:[%s902_s1 + $0xe0] sm:$0xff]  ;;  %v679_v19 = vld [vmem:[%s902_s1 + $0xd8] sm:$0xff]  ;;  %v678_v23 = vld [vmem:[%s902_s1 + $0xd0] sm:$0xff] }
   0x9   :  { %419 = vmatpush.bf16.msra.mxu3 %v682_v7  ;;  %v653_v24 = vld [vmem:[%s902_s1 + $0x8] sm:$0xff]  ;;  %v652_v28 = vld [vmem:[%s902_s1] sm:$0xff]  ;;  %v642_v33 = vld [vmem:[%s904_s0 + $0xc] sm:$0xf0] }
   0xa   :  { %348 = vmatpush.bf16.msra.mxu0 %v657_v8  ;;  %v661_v25 = vld [vmem:[%s902_s1 + $0x48] sm:$0xff]  ;;  %v660_v29 = vld [vmem:[%s902_s1 + $0x40] sm:$0xff]  ;;  %v468_v35 = vld [vmem:[%s904_s0 + $0x10] sm:$0xf0] }
   0xb   :  { %372 = vmatpush.bf16.msra.mxu1 %v665_v9  ;;  %v669_v26 = vld [vmem:[%s902_s1 + $0x88] sm:$0xff]  ;;  %v668_v30 = vld [vmem:[%s902_s1 + $0x80] sm:$0xff]  ;;  %v643_v37 = vld [vmem:[%s904_s0 + $0x14] sm:$0xf0] }
   0xc   :  { %396 = vmatpush.bf16.msra.mxu2 %v673_v10  ;;  %v677_v27 = vld [vmem:[%s902_s1 + $0xc8] sm:$0xff]  ;;  %v676_v31 = vld [vmem:[%s902_s1 + $0xc0] sm:$0xff]  ;;  %v476_v39 = vld [vmem:[%s904_s0 + $0x18] sm:$0xf0] }
   0xd   :  { %420 = vmatpush.bf16.msra.mxu3 %v681_v11  ;;  %v466_v32 = vld [vmem:[%s904_s0] sm:$0xf]  ;;  %v640_v34 = vld [vmem:[%s904_s0 + $0x4] sm:$0xf]  ;;  %v474_v36 = vld [vmem:[%s904_s0 + $0x8] sm:$0xf] }
   0xe   :  { %349 = vmatpush.bf16.msra.mxu0 %v656_v12  ;;  %v641_v38 = vld [vmem:[%s904_s0 + $0xc] sm:$0xf]  ;;  %v467_v40 = vor.u32 %v642_v33, %v466_v32  ;;  %v471_v41 = vor.u32 %v640_v34, %v468_v35  ;;  %v475_v42 = vor.u32 %v643_v37, %v474_v36  ;;  %v482_v44 = vld [vmem:[%s904_s0 + $0x20] sm:$0xf]  ;;  %v646_v45 = vld [vmem:[%s904_s0 + $0x2c] sm:$0xf0] }
   0xf   :  { %373 = vmatpush.bf16.msra.mxu1 %v664_v13  ;;  %v479_v43 = vor.u32 %v641_v38, %v476_v39  ;;  %v644_v46 = vld [vmem:[%s904_s0 + $0x24] sm:$0xf]  ;;  %v484_v47 = vld [vmem:[%s904_s0 + $0x30] sm:$0xf0]  ;;  %v490_v48 = vld [vmem:[%s904_s0 + $0x28] sm:$0xf]  ;;  %v483_v52 = vor.u32 %v646_v45, %v482_v44 }
  0x10   :  { %397 = vmatpush.bf16.msra.mxu2 %v672_v14  ;;  %v647_v49 = vld [vmem:[%s904_s0 + $0x34] sm:$0xf0]  ;;  %v645_v50 = vld [vmem:[%s904_s0 + $0x2c] sm:$0xf]  ;;  %v492_v51 = vld [vmem:[%s904_s0 + $0x38] sm:$0xf0]  ;;  %v487_v53 = vor.u32 %v644_v46, %v484_v47 }
  0x11   :  { %421 = vmatpush.bf16.msra.mxu3 %v680_v15  ;;  %v491_v54 = vor.u32 %v647_v49, %v490_v48  ;;  %v495_v55 = vor.u32 %v645_v50, %v492_v51  ;;  %v498_v56 = vld [vmem:[%s904_s0 + $0x40] sm:$0xf]  ;;  %v650_v57 = vld [vmem:[%s904_s0 + $0x4c] sm:$0xf0]  ;;  %v648_v58 = vld [vmem:[%s904_s0 + $0x44] sm:$0xf] }
  0x12   :  { %350 = vmatpush.bf16.msra.mxu0 %v655_v16  ;;  %v500_v59 = vld [vmem:[%s904_s0 + $0x50] sm:$0xf0]  ;;  %v506_v60 = vld [vmem:[%s904_s0 + $0x48] sm:$0xf]  ;;  %v651_v61 = vld [vmem:[%s904_s0 + $0x54] sm:$0xf0]  ;;  %v499_v0 = vor.u32 %v650_v57, %v498_v56 }
  0x13   :  { %374 = vmatpush.bf16.msra.mxu1 %v663_v17  ;;  %v649_v62 = vld [vmem:[%s904_s0 + $0x4c] sm:$0xf]  ;;  %v508_v63 = vld [vmem:[%s904_s0 + $0x58] sm:$0xf0]  ;;  %v503_v1 = vor.u32 %v648_v58, %v500_v59  ;;  %v507_v2 = vor.u32 %v651_v61, %v506_v60  ;;  %v701_v4 = vld [vmem:[%s903_s2] ss:$0 sm:$0xff] }
  0x14   :  { %398 = vmatpush.bf16.msra.mxu2 %v671_v18  ;;  %v511_v3 = vor.u32 %v649_v62, %v508_v63 }
  0x15   :  { %422 = vmatpush.bf16.msra.mxu3 %v679_v19 }
  0x16   :  { %351 = vmatpush.bf16.msra.mxu0 %v654_v20 }
  0x17   :  { %375 = vmatpush.bf16.msra.mxu1 %v662_v21 }
  0x18   :  { %399 = vmatpush.bf16.msra.mxu2 %v670_v22 }
  0x19   :  { %423 = vmatpush.bf16.msra.mxu3 %v678_v23 }
  0x1a   :  { %352 = vmatpush.bf16.msra.mxu0 %v653_v24 }
  0x1b   :  { %376 = vmatpush.bf16.msra.mxu1 %v661_v25 }
  0x1c   :  { %400 = vmatpush.bf16.msra.mxu2 %v669_v26 }
  0x1d   :  { %424 = vmatpush.bf16.msra.mxu3 %v677_v27 }
  0x1e   :  { %353 = vmatpush.bf16.msra.mxu0 %v652_v28 }
  0x1f   :  { %377 = vmatpush.bf16.msra.mxu1 %v660_v29 }
  0x20   :  { %401 = vmatpush.bf16.msra.mxu2 %v668_v30 }
  0x21   :  { %425 = vmatpush.bf16.msra.mxu3 %v676_v31  ;;  %354 = vmatmul.bf16.vlgmr.msra.gmra.mxu0 %v467_v40 }
  0x22   :  { %378 = vmatmul.bf16.vlgmr.msra.gmra.mxu1 %v471_v41 }
  0x23   :  { %402 = vmatmul.bf16.vlgmr.msra.gmra.mxu2 %v475_v42 }
  0x24   :  { %426 = vmatmul.bf16.vlgmr.msra.gmra.mxu3 %v479_v43 }
  0x31   :  { %359 = vmatmul.bf16.gmra.mxu0 %v483_v52 }
  0x32   :  { %383 = vmatmul.bf16.gmra.mxu1 %v487_v53 }
  0x33   :  { %407 = vmatmul.bf16.gmra.mxu2 %v491_v54 }
  0x34   :  { %431 = vmatmul.bf16.gmra.mxu3 %v495_v55 }
  0x41   :  { %364 = vmatmul.bf16.gmra.mxu0 %v499_v0 }
  0x42   :  { %388 = vmatmul.bf16.gmra.mxu1 %v503_v1 }
  0x43   :  { %412 = vmatmul.bf16.gmra.mxu2 %v507_v2 }
  0x44   :  { %436 = vmatmul.bf16.gmra.mxu3 %v511_v3 }
  0x9e   :  { %v355_v5 = vpop.f32.mrf.mxu0 }
  0x9f   :  { %v379_v6 = vpop.f32.mrf.mxu1  ;;  %v356_v7 = vadd.f32 %v701_v4, %v355_v5 }
  0xa1   :  { %v380_v10 = vadd.f32 %v379_v6, %v356_v7 }
  0xa6   :  { %v403_v8 = vpop.f32.mrf.mxu2  ;;  %v357_v11 = vpop.f32.mrf.mxu0 }
  0xa7   :  { %v427_v9 = vpop.f32.mrf.mxu3  ;;  %v381_v12 = vpop.f32.mrf.mxu1  ;;  %v358_v13 = vadd.f32 %v701_v4, %v357_v11  ;;  %v404_v14 = vadd.f32 %v403_v8, %v380_v10 }
  0xa9   :  { %v382_v15 = vadd.f32 %v381_v12, %v358_v13  ;;  %v428_v18 = vadd.f32 %v427_v9, %v404_v14 }
  0xab   :  { %v442_v23 = vmax.f32 %v428_v18, 0.0 }
  0xae   :  { %v405_v16 = vpop.f32.mrf.mxu2  ;;  %v360_v20 = vpop.f32.mrf.mxu0 }
  0xaf   :  { %v429_v17 = vpop.f32.mrf.mxu3  ;;  %v406_v19 = vadd.f32 %v405_v16, %v382_v15  ;;  %v384_v21 = vpop.f32.mrf.mxu1  ;;  %v361_v25 = vadd.f32 %v701_v4, %v360_v20 }
  0xb1   :  { %v430_v22 = vadd.f32 %v429_v17, %v406_v19  ;;  %v385_v29 = vadd.f32 %v384_v21, %v361_v25 }
  0xb3   :  { %v443_v24 = vmax.f32 %v430_v22, 0.0 }
  0xb5   :  { %v687_v26 = vpack.c.bf16 %v443_v24, %v442_v23 }
  0xb6   :  { %v408_v27 = vpop.f32.mrf.mxu2  ;;  %v362_v30 = vpop.f32.mrf.mxu0 }
  0xb7   :  { %v432_v28 = vpop.f32.mrf.mxu3  ;;  %688 = vst [vmem:[%s905_s3] sm:$0xff] %v687_v26   ;;  %v386_v31 = vpop.f32.mrf.mxu1  ;;  %v363_v32 = vadd.f32 %v701_v4, %v362_v30  ;;  %v409_v33 = vadd.f32 %v408_v27, %v385_v29 }
  0xb9   :  { %v387_v34 = vadd.f32 %v386_v31, %v363_v32  ;;  %v433_v37 = vadd.f32 %v432_v28, %v409_v33 }
  0xbb   :  { %v444_v42 = vmax.f32 %v433_v37, 0.0 }
  0xbe   :  { %v410_v35 = vpop.f32.mrf.mxu2  ;;  %v365_v39 = vpop.f32.mrf.mxu0 }
  0xbf   :  { %v434_v36 = vpop.f32.mrf.mxu3  ;;  %v411_v38 = vadd.f32 %v410_v35, %v387_v34  ;;  %v389_v41 = vpop.f32.mrf.mxu1  ;;  %v366_v44 = vadd.f32 %v701_v4, %v365_v39 }
  0xc1   :  { %v435_v40 = vadd.f32 %v434_v36, %v411_v38  ;;  %v390_v48 = vadd.f32 %v389_v41, %v366_v44 }
  0xc3   :  { %v445_v43 = vmax.f32 %v435_v40, 0.0 }
  0xc5   :  { %v692_v45 = vpack.c.bf16 %v445_v43, %v444_v42 }
  0xc6   :  { %v413_v46 = vpop.f32.mrf.mxu2  ;;  %v367_v49 = vpop.f32.mrf.mxu0 }
  0xc7   :  { %v437_v47 = vpop.f32.mrf.mxu3  ;;  %699 = vst [vmem:[%s905_s3 + $0x8] sm:$0xff] %v692_v45   ;;  %v368_v50 = vadd.f32 %v701_v4, %v367_v49  ;;  %v414_v51 = vadd.f32 %v413_v46, %v390_v48  ;;  %v391_v52 = vpop.f32.mrf.mxu1 }
  0xc9   :  { %v392_v53 = vadd.f32 %v391_v52, %v368_v50  ;;  %v438_v55 = vadd.f32 %v437_v47, %v414_v51 }
  0xcb   :  { %v446_v59 = vmax.f32 %v438_v55, 0.0 }
  0xce   :  { %v415_v54 = vpop.f32.mrf.mxu2 }
  0xcf   :  { %v416_v56 = vadd.f32 %v415_v54, %v392_v53  ;;  %v439_v57 = vpop.f32.mrf.mxu3 }
  0xd1   :  { %v440_v58 = vadd.f32 %v439_v57, %v416_v56 }
  0xd3   :  { %v447_v60 = vmax.f32 %v440_v58, 0.0 }
  0xd5   :  { %v697_v61 = vpack.c.bf16 %v447_v60, %v446_v59 }
  0xd7   :  { %700 = vst [vmem:[%s905_s3 + $0x10] sm:$0xff] %v697_v61  }

// kernel: dqn_forward.6
= control target key start
LH: loop header
LB: loop body
LE: loop exit
PB: predicated region body
PF: predicated region fallthrough
CT: control target
= control target key end

     0   :  { %vm338_vm0 = vcmask 523264   ;;  %s798_s1 = inlined_call_operand.vmem [shape: bf16[576,128], index: 1, kind: input, shape index: {}]   ;;  %s799_s2 = inlined_call_operand.vmem [shape: f32[1,128], index: 2, kind: input, shape index: {}]   ;;  %s800_s0 = inlined_call_operand.vmem [shape: bf16[16,576], index: 0, kind: input, shape index: {}]   ;;  %s801_s3 = inlined_call_operand.vmem [shape: bf16[16,128], index: 3, kind: output, shape index: {}]  }
   0x1   :  { %v599_v0 = vld [vmem:[%s798_s1 + $0x38] sm:$0xff]  ;;  %v598_v4 = vld [vmem:[%s798_s1 + $0x30] sm:$0xff]  ;;  %v597_v8 = vld [vmem:[%s798_s1 + $0x28] sm:$0xff] }
   0x2   :  { %v615_v1 = vld [vmem:[%s798_s1 + $0xb8] sm:$0xff]  ;;  %342 = vmatpush.bf16.msra.mxu0 %v599_v0  ;;  %v614_v5 = vld [vmem:[%s798_s1 + $0xb0] sm:$0xff]  ;;  %v613_v9 = vld [vmem:[%s798_s1 + $0xa8] sm:$0xff] }
   0x3   :  { %v623_v2 = vld [vmem:[%s798_s1 + $0xf8] sm:$0xff]  ;;  %370 = vmatpush.bf16.msra.mxu2 %v615_v1  ;;  %v622_v6 = vld [vmem:[%s798_s1 + $0xf0] sm:$0xff]  ;;  %v621_v10 = vld [vmem:[%s798_s1 + $0xe8] sm:$0xff] }
   0x4   :  { %v607_v3 = vld [vmem:[%s798_s1 + $0x78] sm:$0xff]  ;;  %384 = vmatpush.bf16.msra.mxu3 %v623_v2  ;;  %v606_v7 = vld [vmem:[%s798_s1 + $0x70] sm:$0xff]  ;;  %v605_v11 = vld [vmem:[%s798_s1 + $0x68] sm:$0xff] }
   0x5   :  { %356 = vmatpush.bf16.msra.mxu1 %v607_v3  ;;  %v596_v12 = vld [vmem:[%s798_s1 + $0x20] sm:$0xff]  ;;  %v595_v16 = vld [vmem:[%s798_s1 + $0x18] sm:$0xff]  ;;  %v594_v20 = vld [vmem:[%s798_s1 + $0x10] sm:$0xff] }
   0x6   :  { %343 = vmatpush.bf16.msra.mxu0 %v598_v4  ;;  %v612_v13 = vld [vmem:[%s798_s1 + $0xa0] sm:$0xff]  ;;  %v611_v17 = vld [vmem:[%s798_s1 + $0x98] sm:$0xff]  ;;  %v610_v21 = vld [vmem:[%s798_s1 + $0x90] sm:$0xff] }
   0x7   :  { %371 = vmatpush.bf16.msra.mxu2 %v614_v5  ;;  %v620_v14 = vld [vmem:[%s798_s1 + $0xe0] sm:$0xff]  ;;  %v619_v18 = vld [vmem:[%s798_s1 + $0xd8] sm:$0xff]  ;;  %v618_v22 = vld [vmem:[%s798_s1 + $0xd0] sm:$0xff] }
   0x8   :  { %385 = vmatpush.bf16.msra.mxu3 %v622_v6  ;;  %v604_v15 = vld [vmem:[%s798_s1 + $0x60] sm:$0xff]  ;;  %v603_v19 = vld [vmem:[%s798_s1 + $0x58] sm:$0xff]  ;;  %v602_v23 = vld [vmem:[%s798_s1 + $0x50] sm:$0xff] }
   0x9   :  { %357 = vmatpush.bf16.msra.mxu1 %v606_v7  ;;  %v593_v24 = vld [vmem:[%s798_s1 + $0x8] sm:$0xff]  ;;  %v592_v28 = vld [vmem:[%s798_s1] sm:$0xff]  ;;  %v589_v33 = vld [vmem:[%s800_s0 + $0x10] sm:$0xf0] }
   0xa   :  { %344 = vmatpush.bf16.msra.mxu0 %v597_v8  ;;  %v609_v25 = vld [vmem:[%s798_s1 + $0x88] sm:$0xff]  ;;  %v608_v29 = vld [vmem:[%s798_s1 + $0x80] sm:$0xff]  ;;  %v590_v35 = vld [vmem:[%s800_s0 + $0x18] sm:$0xf0] }
   0xb   :  { %372 = vmatpush.bf16.msra.mxu2 %v613_v9  ;;  %v617_v26 = vld [vmem:[%s798_s1 + $0xc8] sm:$0xff]  ;;  %v616_v30 = vld [vmem:[%s798_s1 + $0xc0] sm:$0xff]  ;;  %v426_v39 = vld [vmem:[%s800_s0 + $0x14] sm:$0xf0] }
   0xc   :  { %386 = vmatpush.bf16.msra.mxu3 %v621_v10  ;;  %v601_v27 = vld [vmem:[%s798_s1 + $0x48] sm:$0xff]  ;;  %v600_v31 = vld [vmem:[%s798_s1 + $0x40] sm:$0xff]  ;;  %v627_v40 = vld [vmem:[%s798_s1 + $0x118] sm:$0xff] }
   0xd   :  { %358 = vmatpush.bf16.msra.mxu1 %v605_v11  ;;  %v424_v32 = vld [vmem:[%s800_s0] sm:$0xf]  ;;  %v432_v34 = vld [vmem:[%s800_s0 + $0x8] sm:$0xf]  ;;  %v588_v36 = vld [vmem:[%s800_s0 + $0xc] sm:$0xf] }
   0xe   :  { %345 = vmatpush.bf16.msra.mxu0 %v596_v12  ;;  %v434_v37 = vld [vmem:[%s800_s0 + $0x1c] sm:$0xf0]  ;;  %v587_v38 = vld [vmem:[%s800_s0 + $0x4] sm:$0xf]  ;;  %v425_v41 = vor.u32 %v589_v33, %v424_v32  ;;  %v433_v42 = vor.u32 %v590_v35, %v432_v34  ;;  %v626_v45 = vld [vmem:[%s798_s1 + $0x110] sm:$0xff] }
   0xf   :  { %373 = vmatpush.bf16.msra.mxu2 %v612_v13  ;;  %v437_v43 = vor.u32 %v588_v36, %v434_v37  ;;  %v429_v44 = vor.u32 %v587_v38, %v426_v39  ;;  %v625_v46 = vld [vmem:[%s798_s1 + $0x108] sm:$0xff]  ;;  %v624_v47 = vld [vmem:[%s798_s1 + $0x100] sm:$0xff]  ;;  %v440_v48 = vld [vmem:[%s800_s0 + $0x10] sm:$0xf] }
  0x10   :  { %387 = vmatpush.bf16.msra.mxu3 %v620_v14  ;;  %v591_v49 = vld [vmem:[%s800_s0 + $0x20] sm:$0xf0]  ;;  %v633_v54 = vld [vmem:[%s799_s2] ss:$0 sm:$0xff] }
  0x11   :  { %359 = vmatpush.bf16.msra.mxu1 %v604_v15  ;;  %v441_v50 = vor.u32 %v591_v49, %v440_v48 }
  0x12   :  { %346 = vmatpush.bf16.msra.mxu0 %v595_v16 }
  0x13   :  { %374 = vmatpush.bf16.msra.mxu2 %v611_v17 }
  0x14   :  { %388 = vmatpush.bf16.msra.mxu3 %v619_v18 }
  0x15   :  { %360 = vmatpush.bf16.msra.mxu1 %v603_v19 }
  0x16   :  { %347 = vmatpush.bf16.msra.mxu0 %v594_v20 }
  0x17   :  { %375 = vmatpush.bf16.msra.mxu2 %v610_v21 }
  0x18   :  { %389 = vmatpush.bf16.msra.mxu3 %v618_v22 }
  0x19   :  { %361 = vmatpush.bf16.msra.mxu1 %v602_v23 }
  0x1a   :  { %348 = vmatpush.bf16.msra.mxu0 %v593_v24 }
  0x1b   :  { %376 = vmatpush.bf16.msra.mxu2 %v609_v25 }
  0x1c   :  { %390 = vmatpush.bf16.msra.mxu3 %v617_v26 }
  0x1d   :  { %362 = vmatpush.bf16.msra.mxu1 %v601_v27 }
  0x1e   :  { %349 = vmatpush.bf16.msra.mxu0 %v592_v28 }
  0x1f   :  { %377 = vmatpush.bf16.msra.mxu2 %v608_v29 }
  0x20   :  { %391 = vmatpush.bf16.msra.mxu3 %v616_v30 }
  0x21   :  { %363 = vmatpush.bf16.msra.mxu1 %v600_v31  ;;  %350 = vmatmul.bf16.vlgmr.msra.gmra.mxu0 %v425_v41 }
  0x22   :  { %402 = vmatpush.bf16.msrb.mxu0 %v627_v40  ;;  %378 = vmatmul.bf16.vlgmr.msra.gmra.mxu2 %v433_v42 }
  0x23   :  { %392 = vmatmul.bf16.vlgmr.msra.gmra.mxu3 %v437_v43 }
  0x24   :  { %364 = vmatmul.bf16.vlgmr.msra.gmra.mxu1 %v429_v44 }
  0x26   :  { %403 = vmatpush.bf16.msrb.mxu0 %v626_v45 }
  0x2a   :  { %404 = vmatpush.bf16.msrb.mxu0 %v625_v46 }
  0x2e   :  { %405 = vmatpush.bf16.msrb.mxu0 %v624_v47 }
  0x31   :  { %586 = vmatmul.msk.bf16.vlgmr.msrb.gmra.mxu0 %vm338_vm0, %v441_v50 }
  0x9e   :  { %v351_v51 = vpop.f32.mrf.mxu0 }
  0x9f   :  { %v352_v56 = vadd.f32 %v633_v54, %v351_v51 }
  0xa1   :  { %v365_v52 = vpop.f32.mrf.mxu1 }
  0xa2   :  { %v366_v60 = vadd.f32 %v365_v52, %v352_v56 }
  0xa5   :  { %v379_v53 = vpop.f32.mrf.mxu2 }
  0xa6   :  { %v353_v55 = vpop.f32.mrf.mxu0  ;;  %v393_v57 = vpop.f32.mrf.mxu3  ;;  %v380_v63 = vadd.f32 %v379_v53, %v366_v60 }
  0xa7   :  { %v354_v58 = vadd.f32 %v633_v54, %v353_v55 }
  0xa8   :  { %v394_v2 = vadd.f32 %v393_v57, %v380_v63 }
  0xa9   :  { %v367_v59 = vpop.f32.mrf.mxu1 }
  0xaa   :  { %v368_v0 = vadd.f32 %v367_v59, %v354_v58 }
  0xad   :  { %v381_v61 = vpop.f32.mrf.mxu2 }
  0xae   :  { %v407_v62 = vpop.f32.mrf.mxu0  ;;  %v382_v1 = vadd.f32 %v381_v61, %v368_v0  ;;  %v395_v3 = vpop.f32.mrf.mxu3 }
  0xaf   :  { %v408_v5 = vadd.f32 %v407_v62, %v394_v2 }
  0xb0   :  { %v396_v4 = vadd.f32 %v395_v3, %v382_v1 }
  0xb1   :  { %v412_v8 = vmax.f32 %v408_v5, 0.0 }
  0xb6   :  { %v409_v6 = vpop.f32.mrf.mxu0 }
  0xb7   :  { %v410_v7 = vadd.f32 %v409_v6, %v396_v4 }
  0xb9   :  { %v413_v9 = vmax.f32 %v410_v7, 0.0 }
  0xbb   :  { %v631_v10 = vpack.c.bf16 %v413_v9, %v412_v8 }
  0xbd   :  { %632 = vst [vmem:[%s801_s3] sm:$0xff] %v631_v10  }

// kernel: dqn_forward.7
= control target key start
LH: loop header
LB: loop body
LE: loop exit
PB: predicated region body
PF: predicated region fallthrough
CT: control target
= control target key end

     0   :  { %s3102_s1 = inlined_call_operand.vmem [shape: bf16[512,512], index: 1, kind: input, shape index: {}]   ;;  %s3103_s0 = inlined_call_operand.vmem [shape: bf16[8,512], index: 0, kind: input, shape index: {}]   ;;  %s3104_s3 = inlined_call_operand.vmem [shape: bf16[512,128], index: 3, kind: input, shape index: {}]   ;;  %s3105_s2 = inlined_call_operand.vmem [shape: f32[1,512], index: 2, kind: input, shape index: {}]   ;;  %s3106_s4 = inlined_call_operand.vmem [shape: f32[1,8,128], index: 4, kind: output, shape index: {}]  }
   0x1   :  { %v1485_v0 = vld [vmem:[%s3102_s1 + $0xe0] sm:$0xf]  ;;  %v2041_v1 = vld [vmem:[%s3102_s1 + $0xec] sm:$0xf0] }
   0x2   :  { %v1613_v2 = vld [vmem:[%s3102_s1 + $0x1e0] sm:$0xf]  ;;  %v1486_v3 = vor.u32 %v2041_v1, %v1485_v0  ;;  %v2073_v4 = vld [vmem:[%s3102_s1 + $0x1ec] sm:$0xf0] }
   0x3   :  { %v1741_v5 = vld [vmem:[%s3102_s1 + $0x2e0] sm:$0xf]  ;;  %v2105_v6 = vld [vmem:[%s3102_s1 + $0x2ec] sm:$0xf0]  ;;  %v1614_v7 = vor.u32 %v2073_v4, %v1613_v2 }
   0x4   :  { %v1742_v8 = vor.u32 %v2105_v6, %v1741_v5  ;;  %v1869_v9 = vld [vmem:[%s3102_s1 + $0x3e0] sm:$0xf]  ;;  %v2137_v10 = vld [vmem:[%s3102_s1 + $0x3ec] sm:$0xf0]  ;;  %813 = vmatpush.bf16.msra.mxu0 %v1486_v3 }
   0x5   :  { %v1469_v11 = vld [vmem:[%s3102_s1 + $0xc0] sm:$0xf]  ;;  %v1870_v12 = vor.u32 %v2137_v10, %v1869_v9  ;;  %v2037_v13 = vld [vmem:[%s3102_s1 + $0xcc] sm:$0xf0]  ;;  %826 = vmatpush.bf16.msra.mxu1 %v1614_v7 }
   0x6   :  { %v1597_v14 = vld [vmem:[%s3102_s1 + $0x1c0] sm:$0xf]  ;;  %v2069_v15 = vld [vmem:[%s3102_s1 + $0x1cc] sm:$0xf0]  ;;  %839 = vmatpush.bf16.msra.mxu2 %v1742_v8  ;;  %v1470_v16 = vor.u32 %v2037_v13, %v1469_v11 }
   0x7   :  { %v1598_v17 = vor.u32 %v2069_v15, %v1597_v14  ;;  %v1725_v18 = vld [vmem:[%s3102_s1 + $0x2c0] sm:$0xf]  ;;  %v2101_v19 = vld [vmem:[%s3102_s1 + $0x2cc] sm:$0xf0]  ;;  %852 = vmatpush.bf16.msra.mxu3 %v1870_v12 }
   0x8   :  { %v1853_v20 = vld [vmem:[%s3102_s1 + $0x3c0] sm:$0xf]  ;;  %v1726_v21 = vor.u32 %v2101_v19, %v1725_v18  ;;  %v2133_v22 = vld [vmem:[%s3102_s1 + $0x3cc] sm:$0xf0]  ;;  %814 = vmatpush.bf16.msra.mxu0 %v1470_v16 }
   0x9   :  { %v1453_v23 = vld [vmem:[%s3102_s1 + $0xa0] sm:$0xf]  ;;  %v2033_v24 = vld [vmem:[%s3102_s1 + $0xac] sm:$0xf0]  ;;  %v1854_v25 = vor.u32 %v2133_v22, %v1853_v20  ;;  %827 = vmatpush.bf16.msra.mxu1 %v1598_v17 }
   0xa   :  { %v1581_v26 = vld [vmem:[%s3102_s1 + $0x1a0] sm:$0xf]  ;;  %v2065_v27 = vld [vmem:[%s3102_s1 + $0x1ac] sm:$0xf0]  ;;  %v1454_v29 = vor.u32 %v2033_v24, %v1453_v23  ;;  %840 = vmatpush.bf16.msra.mxu2 %v1726_v21 }
   0xb   :  { %v1709_v28 = vld [vmem:[%s3102_s1 + $0x2a0] sm:$0xf]  ;;  %v2097_v30 = vld [vmem:[%s3102_s1 + $0x2ac] sm:$0xf0]  ;;  %v1582_v33 = vor.u32 %v2065_v27, %v1581_v26  ;;  %853 = vmatpush.bf16.msra.mxu3 %v1854_v25 }
   0xc   :  { %v1837_v31 = vld [vmem:[%s3102_s1 + $0x3a0] sm:$0xf]  ;;  %v2129_v32 = vld [vmem:[%s3102_s1 + $0x3ac] sm:$0xf0]  ;;  %v1710_v34 = vor.u32 %v2097_v30, %v1709_v28  ;;  %815 = vmatpush.bf16.msra.mxu0 %v1454_v29  ;;  %v2039_v28 = vld [vmem:[%s3102_s1 + $0xe4] sm:$0xf] }
   0xd   :  { %v1437_v35 = vld [vmem:[%s3102_s1 + $0x80] sm:$0xf]  ;;  %v2029_v36 = vld [vmem:[%s3102_s1 + $0x8c] sm:$0xf0]  ;;  %v1838_v38 = vor.u32 %v2129_v32, %v1837_v31  ;;  %828 = vmatpush.bf16.msra.mxu1 %v1582_v33  ;;  %v1487_v29 = vld [vmem:[%s3102_s1 + $0xf0] sm:$0xf0] }
   0xe   :  { %v1565_v37 = vld [vmem:[%s3102_s1 + $0x180] sm:$0xf]  ;;  %v2061_v39 = vld [vmem:[%s3102_s1 + $0x18c] sm:$0xf0]  ;;  %v1438_v44 = vor.u32 %v2029_v36, %v1437_v35  ;;  %841 = vmatpush.bf16.msra.mxu2 %v1710_v34  ;;  %v2071_v30 = vld [vmem:[%s3102_s1 + $0x1e4] sm:$0xf] }
   0xf   :  { %v1693_v40 = vld [vmem:[%s3102_s1 + $0x280] sm:$0xf]  ;;  %v2093_v41 = vld [vmem:[%s3102_s1 + $0x28c] sm:$0xf0]  ;;  %v1566_v45 = vor.u32 %v2061_v39, %v1565_v37  ;;  %854 = vmatpush.bf16.msra.mxu3 %v1838_v38  ;;  %v1615_v32 = vld [vmem:[%s3102_s1 + $0x1f0] sm:$0xf0] }
  0x10   :  { %v1821_v42 = vld [vmem:[%s3102_s1 + $0x380] sm:$0xf]  ;;  %v2125_v43 = vld [vmem:[%s3102_s1 + $0x38c] sm:$0xf0]  ;;  %v1694_v46 = vor.u32 %v2093_v41, %v1693_v40  ;;  %816 = vmatpush.bf16.msra.mxu0 %v1438_v44  ;;  %v2103_v33 = vld [vmem:[%s3102_s1 + $0x2e4] sm:$0xf]  ;;  %v1490_v40 = vor.u32 %v2039_v28, %v1487_v29  ;;  %v1618_v41 = vor.u32 %v2071_v30, %v1615_v32 }
  0x11   :  { %v1421_v47 = vld [vmem:[%s3102_s1 + $0x60] sm:$0xf]  ;;  %v2025_v48 = vld [vmem:[%s3102_s1 + $0x6c] sm:$0xf0]  ;;  %v1822_v50 = vor.u32 %v2125_v43, %v1821_v42  ;;  %829 = vmatpush.bf16.msra.mxu1 %v1566_v45  ;;  %v1743_v34 = vld [vmem:[%s3102_s1 + $0x2f0] sm:$0xf0] }
  0x12   :  { %v1549_v49 = vld [vmem:[%s3102_s1 + $0x160] sm:$0xf]  ;;  %v2057_v51 = vld [vmem:[%s3102_s1 + $0x16c] sm:$0xf0]  ;;  %v1422_v56 = vor.u32 %v2025_v48, %v1421_v47  ;;  %842 = vmatpush.bf16.msra.mxu2 %v1694_v46  ;;  %v2135_v37 = vld [vmem:[%s3102_s1 + $0x3e4] sm:$0xf]  ;;  %v1746_v42 = vor.u32 %v2103_v33, %v1743_v34 }
  0x13   :  { %v1677_v52 = vld [vmem:[%s3102_s1 + $0x260] sm:$0xf]  ;;  %v2089_v53 = vld [vmem:[%s3102_s1 + $0x26c] sm:$0xf0]  ;;  %v1550_v57 = vor.u32 %v2057_v51, %v1549_v49  ;;  %855 = vmatpush.bf16.msra.mxu3 %v1822_v50  ;;  %v1871_v38 = vld [vmem:[%s3102_s1 + $0x3f0] sm:$0xf0] }
  0x14   :  { %v1805_v54 = vld [vmem:[%s3102_s1 + $0x360] sm:$0xf]  ;;  %v2121_v55 = vld [vmem:[%s3102_s1 + $0x36c] sm:$0xf0]  ;;  %v1678_v58 = vor.u32 %v2089_v53, %v1677_v52  ;;  %817 = vmatpush.bf16.msra.mxu0 %v1422_v56  ;;  %v2035_v43 = vld [vmem:[%s3102_s1 + $0xc4] sm:$0xf]  ;;  %v1874_v46 = vor.u32 %v2135_v37, %v1871_v38 }
  0x15   :  { %v1405_v59 = vld [vmem:[%s3102_s1 + $0x40] sm:$0xf]  ;;  %v2021_v60 = vld [vmem:[%s3102_s1 + $0x4c] sm:$0xf0]  ;;  %v1806_v62 = vor.u32 %v2121_v55, %v1805_v54  ;;  %830 = vmatpush.bf16.msra.mxu1 %v1550_v57  ;;  %v1471_v44 = vld [vmem:[%s3102_s1 + $0xd0] sm:$0xf0] }
  0x16   :  { %v1533_v61 = vld [vmem:[%s3102_s1 + $0x140] sm:$0xf]  ;;  %v2053_v63 = vld [vmem:[%s3102_s1 + $0x14c] sm:$0xf0]  ;;  %v1406_v4 = vor.u32 %v2021_v60, %v1405_v59  ;;  %843 = vmatpush.bf16.msra.mxu2 %v1678_v58  ;;  %v2067_v45 = vld [vmem:[%s3102_s1 + $0x1c4] sm:$0xf]  ;;  %v1474_v53 = vor.u32 %v2035_v43, %v1471_v44 }
  0x17   :  { %v1661_v0 = vld [vmem:[%s3102_s1 + $0x240] sm:$0xf]  ;;  %v2085_v1 = vld [vmem:[%s3102_s1 + $0x24c] sm:$0xf0]  ;;  %v1534_v5 = vor.u32 %v2053_v63, %v1533_v61  ;;  %856 = vmatpush.bf16.msra.mxu3 %v1806_v62  ;;  %v1599_v47 = vld [vmem:[%s3102_s1 + $0x1d0] sm:$0xf0] }
  0x18   :  { %v1789_v2 = vld [vmem:[%s3102_s1 + $0x340] sm:$0xf]  ;;  %v2117_v3 = vld [vmem:[%s3102_s1 + $0x34c] sm:$0xf0]  ;;  %v1662_v6 = vor.u32 %v2085_v1, %v1661_v0  ;;  %818 = vmatpush.bf16.msra.mxu0 %v1406_v4  ;;  %v2099_v48 = vld [vmem:[%s3102_s1 + $0x2c4] sm:$0xf]  ;;  %v1602_v57 = vor.u32 %v2067_v45, %v1599_v47 }
  0x19   :  { %v1389_v7 = vld [vmem:[%s3102_s1 + $0x20] sm:$0xf]  ;;  %v2017_v8 = vld [vmem:[%s3102_s1 + $0x2c] sm:$0xf0]  ;;  %v1790_v10 = vor.u32 %v2117_v3, %v1789_v2  ;;  %831 = vmatpush.bf16.msra.mxu1 %v1534_v5  ;;  %v1727_v49 = vld [vmem:[%s3102_s1 + $0x2d0] sm:$0xf0] }
  0x1a   :  { %v1517_v9 = vld [vmem:[%s3102_s1 + $0x120] sm:$0xf]  ;;  %v2049_v11 = vld [vmem:[%s3102_s1 + $0x12c] sm:$0xf0]  ;;  %v1390_v16 = vor.u32 %v2017_v8, %v1389_v7  ;;  %844 = vmatpush.bf16.msra.mxu2 %v1662_v6  ;;  %v2131_v50 = vld [vmem:[%s3102_s1 + $0x3c4] sm:$0xf]  ;;  %v1730_v58 = vor.u32 %v2099_v48, %v1727_v49 }
  0x1b   :  { %v1645_v12 = vld [vmem:[%s3102_s1 + $0x220] sm:$0xf]  ;;  %v2081_v13 = vld [vmem:[%s3102_s1 + $0x22c] sm:$0xf0]  ;;  %v1518_v19 = vor.u32 %v2049_v11, %v1517_v9  ;;  %857 = vmatpush.bf16.msra.mxu3 %v1790_v10  ;;  %v1855_v51 = vld [vmem:[%s3102_s1 + $0x3d0] sm:$0xf0] }
  0x1c   :  { %v1773_v14 = vld [vmem:[%s3102_s1 + $0x320] sm:$0xf]  ;;  %v2113_v15 = vld [vmem:[%s3102_s1 + $0x32c] sm:$0xf0]  ;;  %v1646_v20 = vor.u32 %v2081_v13, %v1645_v12  ;;  %819 = vmatpush.bf16.msra.mxu0 %v1390_v16  ;;  %v30_v52 = vld [vmem:[%s3103_s0 + $0x8] sm:$0xff]  ;;  %v1858_v62 = vor.u32 %v2131_v50, %v1855_v51 }
  0x1d   :  { %v1373_v17 = vld [vmem:[%s3102_s1] sm:$0xf]  ;;  %v2013_v18 = vld [vmem:[%s3102_s1 + $0xc] sm:$0xf0]  ;;  %v1774_v24 = vor.u32 %v2113_v15, %v1773_v14  ;;  %832 = vmatpush.bf16.msra.mxu1 %v1518_v19  ;;  %v2031_v54 = vld [vmem:[%s3102_s1 + $0xa4] sm:$0xf]  ;;  %v163_v55 = vunpack.c.l.b16 %v30_v52  ;;  %v164_v56 = vunpack.c.h.b16 %v30_v52 }
  0x1e   :  { %v1501_v21 = vld [vmem:[%s3102_s1 + $0x100] sm:$0xf]  ;;  %v2045_v22 = vld [vmem:[%s3102_s1 + $0x10c] sm:$0xf0]  ;;  %v1374_v31 = vor.u32 %v2013_v18, %v1373_v17  ;;  %845 = vmatpush.bf16.msra.mxu2 %v1646_v20  ;;  %v1455_v59 = vld [vmem:[%s3102_s1 + $0xb0] sm:$0xf0] }
  0x1f   :  { %v1629_v23 = vld [vmem:[%s3102_s1 + $0x200] sm:$0xf]  ;;  %v2077_v25 = vld [vmem:[%s3102_s1 + $0x20c] sm:$0xf0]  ;;  %v1502_v35 = vor.u32 %v2045_v22, %v1501_v21  ;;  %858 = vmatpush.bf16.msra.mxu3 %v1774_v24  ;;  %v2063_v60 = vld [vmem:[%s3102_s1 + $0x1a4] sm:$0xf]  ;;  %v2457_v1 = vpack.c.b16 %v163_v55, %v163_v55  ;;  %v2468_v5 = vpack.c.b16 %v164_v56, %v164_v56  ;;  %v1458_v8 = vor.u32 %v2031_v54, %v1455_v59 }
  0x20   :  { %v1757_v26 = vld [vmem:[%s3102_s1 + $0x300] sm:$0xf]  ;;  %v2109_v27 = vld [vmem:[%s3102_s1 + $0x30c] sm:$0xf0]  ;;  %v1630_v36 = vor.u32 %v2077_v25, %v1629_v23  ;;  %820 = vmatpush.bf16.msra.mxu0 %v1374_v31  ;;  %v1583_v61 = vld [vmem:[%s3102_s1 + $0x1b0] sm:$0xf0] }
  0x21   :  { %v1758_v39 = vor.u32 %v2109_v27, %v1757_v26  ;;  %833 = vmatpush.bf16.msra.mxu1 %v1502_v35  ;;  %v2095_v63 = vld [vmem:[%s3102_s1 + $0x2a4] sm:$0xf]  ;;  %v1711_v0 = vld [vmem:[%s3102_s1 + $0x2b0] sm:$0xf0]  ;;  %v1586_v9 = vor.u32 %v2063_v60, %v1583_v61 }
  0x22   :  { %846 = vmatpush.bf16.msra.mxu2 %v1630_v36  ;;  %v29_v2 = vld [vmem:[%s3103_s0] sm:$0xff]  ;;  %v1839_v4 = vld [vmem:[%s3102_s1 + $0x3b0] sm:$0xf0]  ;;  %v1714_v10 = vor.u32 %v2095_v63, %v1711_v0 }
  0x23   :  { %859 = vmatpush.bf16.msra.mxu3 %v1758_v39  ;;  %v2127_v3 = vld [vmem:[%s3102_s1 + $0x3a4] sm:$0xf]  ;;  %v161_v6 = vunpack.c.l.b16 %v29_v2  ;;  %v162_v7 = vunpack.c.h.b16 %v29_v2  ;;  %v1439_v12 = vld [vmem:[%s3102_s1 + $0x90] sm:$0xf0] }
  0x24   :  { %865 = vmatpush.bf16.msrb.mxu0 %v1490_v40  ;;  %v2027_v11 = vld [vmem:[%s3102_s1 + $0x84] sm:$0xf]  ;;  %v1842_v16 = vor.u32 %v2127_v3, %v1839_v4  ;;  %v1567_v17 = vld [vmem:[%s3102_s1 + $0x190] sm:$0xf0] }
  0x25   :  { %878 = vmatpush.bf16.msrb.mxu1 %v1618_v41  ;;  %847 = vmatmul.bf16.vlgmr.msra.gmra.mxu2 %v2457_v1  ;;  %v2059_v13 = vld [vmem:[%s3102_s1 + $0x184] sm:$0xf]  ;;  %v2480_v14 = vpack.c.b16 %v161_v6, %v161_v6  ;;  %v2482_v15 = vpack.c.b16 %v162_v7, %v162_v7  ;;  %v1695_v19 = vld [vmem:[%s3102_s1 + $0x290] sm:$0xf0]  ;;  %v1442_v22 = vor.u32 %v2027_v11, %v1439_v12  ;;  %v2074_v12 = vld [vmem:[%s3102_s1 + $0x1f4] sm:$0xf0] }
  0x26   :  { %891 = vmatpush.bf16.msrb.mxu2 %v1746_v42  ;;  %v2091_v18 = vld [vmem:[%s3102_s1 + $0x284] sm:$0xf]  ;;  %v1823_v21 = vld [vmem:[%s3102_s1 + $0x390] sm:$0xf0]  ;;  %860 = vmatmul.bf16.vlgmr.msra.gmra.mxu3 %v2468_v5  ;;  %v1570_v23 = vor.u32 %v2059_v13, %v1567_v17  ;;  %v1749_v13 = vld [vmem:[%s3102_s1 + $0x2e8] sm:$0xf] }
  0x27   :  { %904 = vmatpush.bf16.msrb.mxu3 %v1874_v46  ;;  %v2123_v20 = vld [vmem:[%s3102_s1 + $0x384] sm:$0xf]  ;;  %821 = vmatmul.bf16.vlgmr.msra.gmra.mxu0 %v2480_v14  ;;  %v1698_v24 = vor.u32 %v2091_v18, %v1695_v19  ;;  %v1423_v26 = vld [vmem:[%s3102_s1 + $0x70] sm:$0xf0]  ;;  %v1877_v19 = vld [vmem:[%s3102_s1 + $0x3e8] sm:$0xf] }
  0x28   :  { %866 = vmatpush.bf16.msrb.mxu0 %v1474_v53  ;;  %834 = vmatmul.bf16.vlgmr.msra.gmra.mxu1 %v2482_v15  ;;  %v2023_v25 = vld [vmem:[%s3102_s1 + $0x64] sm:$0xf]  ;;  %v1826_v28 = vor.u32 %v2123_v20, %v1823_v21  ;;  %v1551_v29 = vld [vmem:[%s3102_s1 + $0x170] sm:$0xf0]  ;;  %v2138_v20 = vld [vmem:[%s3102_s1 + $0x3f4] sm:$0xf0] }
  0x29   :  { %879 = vmatpush.bf16.msrb.mxu1 %v1602_v57  ;;  %v2055_v27 = vld [vmem:[%s3102_s1 + $0x164] sm:$0xf]  ;;  %v1679_v31 = vld [vmem:[%s3102_s1 + $0x270] sm:$0xf0]  ;;  %v1426_v34 = vor.u32 %v2023_v25, %v1423_v26  ;;  %v1477_v25 = vld [vmem:[%s3102_s1 + $0xc8] sm:$0xf] }
  0x2a   :  { %892 = vmatpush.bf16.msrb.mxu2 %v1730_v58  ;;  %v2087_v30 = vld [vmem:[%s3102_s1 + $0x264] sm:$0xf]  ;;  %v1807_v33 = vld [vmem:[%s3102_s1 + $0x370] sm:$0xf0]  ;;  %v1554_v35 = vor.u32 %v2055_v27, %v1551_v29  ;;  %v2038_v26 = vld [vmem:[%s3102_s1 + $0xd4] sm:$0xf0] }
  0x2b   :  { %905 = vmatpush.bf16.msrb.mxu3 %v1858_v62  ;;  %v2119_v32 = vld [vmem:[%s3102_s1 + $0x364] sm:$0xf]  ;;  %v1682_v36 = vor.u32 %v2087_v30, %v1679_v31  ;;  %v1407_v38 = vld [vmem:[%s3102_s1 + $0x50] sm:$0xf0]  ;;  %v1605_v27 = vld [vmem:[%s3102_s1 + $0x1c8] sm:$0xf] }
  0x2c   :  { %867 = vmatpush.bf16.msrb.mxu0 %v1458_v8  ;;  %v2019_v37 = vld [vmem:[%s3102_s1 + $0x44] sm:$0xf]  ;;  %v1810_v40 = vor.u32 %v2119_v32, %v1807_v33  ;;  %v1535_v41 = vld [vmem:[%s3102_s1 + $0x150] sm:$0xf0]  ;;  %v1493_v8 = vld [vmem:[%s3102_s1 + $0xe8] sm:$0xf] }
  0x2d   :  { %880 = vmatpush.bf16.msrb.mxu1 %v1586_v9  ;;  %v2051_v39 = vld [vmem:[%s3102_s1 + $0x144] sm:$0xf]  ;;  %v1663_v43 = vld [vmem:[%s3102_s1 + $0x250] sm:$0xf0]  ;;  %v1410_v46 = vor.u32 %v2019_v37, %v1407_v38  ;;  %v2042_v9 = vld [vmem:[%s3102_s1 + $0xf4] sm:$0xf0] }
  0x2e   :  { %893 = vmatpush.bf16.msrb.mxu2 %v1714_v10  ;;  %v2083_v42 = vld [vmem:[%s3102_s1 + $0x244] sm:$0xf]  ;;  %v1791_v45 = vld [vmem:[%s3102_s1 + $0x350] sm:$0xf0]  ;;  %v1538_v47 = vor.u32 %v2051_v39, %v1535_v41  ;;  %v1621_v10 = vld [vmem:[%s3102_s1 + $0x1e8] sm:$0xf] }
  0x2f   :  { %906 = vmatpush.bf16.msrb.mxu3 %v1842_v16  ;;  %v2115_v44 = vld [vmem:[%s3102_s1 + $0x344] sm:$0xf]  ;;  %v1666_v48 = vor.u32 %v2083_v42, %v1663_v43  ;;  %v1391_v50 = vld [vmem:[%s3102_s1 + $0x30] sm:$0xf0]  ;;  %v2106_v16 = vld [vmem:[%s3102_s1 + $0x2f4] sm:$0xf0] }
  0x30   :  { %868 = vmatpush.bf16.msrb.mxu0 %v1442_v22  ;;  %v2015_v49 = vld [vmem:[%s3102_s1 + $0x24] sm:$0xf]  ;;  %v1794_v52 = vor.u32 %v2115_v44, %v1791_v45  ;;  %v1519_v53 = vld [vmem:[%s3102_s1 + $0x130] sm:$0xf0]  ;;  %v1494_v22 = vor.u32 %v2042_v9, %v1493_v8  ;;  %v2070_v29 = vld [vmem:[%s3102_s1 + $0x1d4] sm:$0xf0] }
  0x31   :  { %881 = vmatpush.bf16.msrb.mxu1 %v1570_v23  ;;  %v2047_v51 = vld [vmem:[%s3102_s1 + $0x124] sm:$0xf]  ;;  %v1647_v55 = vld [vmem:[%s3102_s1 + $0x230] sm:$0xf0]  ;;  %v1394_v58 = vor.u32 %v2015_v49, %v1391_v50  ;;  %v1622_v23 = vor.u32 %v2074_v12, %v1621_v10  ;;  %v1733_v30 = vld [vmem:[%s3102_s1 + $0x2c8] sm:$0xf] }
  0x32   :  { %894 = vmatpush.bf16.msrb.mxu2 %v1698_v24  ;;  %v2079_v54 = vld [vmem:[%s3102_s1 + $0x224] sm:$0xf]  ;;  %v1775_v57 = vld [vmem:[%s3102_s1 + $0x330] sm:$0xf0]  ;;  %v1522_v61 = vor.u32 %v2047_v51, %v1519_v53  ;;  %v1750_v24 = vor.u32 %v2106_v16, %v1749_v13  ;;  %v2102_v31 = vld [vmem:[%s3102_s1 + $0x2d4] sm:$0xf0] }
  0x33   :  { %907 = vmatpush.bf16.msrb.mxu3 %v1826_v28  ;;  %v2111_v56 = vld [vmem:[%s3102_s1 + $0x324] sm:$0xf]  ;;  %v1375_v60 = vld [vmem:[%s3102_s1 + $0x10] sm:$0xf0]  ;;  %v1650_v62 = vor.u32 %v2079_v54, %v1647_v55  ;;  %v1878_v28 = vor.u32 %v2138_v20, %v1877_v19  ;;  %v1861_v32 = vld [vmem:[%s3102_s1 + $0x3c8] sm:$0xf] }
  0x34   :  { %869 = vmatpush.bf16.msrb.mxu0 %v1426_v34  ;;  %v2011_v59 = vld [vmem:[%s3102_s1 + $0x4] sm:$0xf]  ;;  %v1503_v0 = vld [vmem:[%s3102_s1 + $0x110] sm:$0xf0]  ;;  %v1778_v3 = vor.u32 %v2111_v56, %v1775_v57  ;;  %v2134_v33 = vld [vmem:[%s3102_s1 + $0x3d4] sm:$0xf0]  ;;  %v1478_v34 = vor.u32 %v2038_v26, %v1477_v25 }
  0x35   :  { %882 = vmatpush.bf16.msrb.mxu1 %v1554_v35  ;;  %v2043_v63 = vld [vmem:[%s3102_s1 + $0x104] sm:$0xf]  ;;  %v1631_v4 = vld [vmem:[%s3102_s1 + $0x210] sm:$0xf0]  ;;  %v1378_v11 = vor.u32 %v2011_v59, %v1375_v60  ;;  %v1606_v35 = vor.u32 %v2070_v29, %v1605_v27  ;;  %v1461_v37 = vld [vmem:[%s3102_s1 + $0xa8] sm:$0xf] }
  0x36   :  { %895 = vmatpush.bf16.msrb.mxu2 %v1682_v36  ;;  %v2075_v2 = vld [vmem:[%s3102_s1 + $0x204] sm:$0xf]  ;;  %v1759_v7 = vld [vmem:[%s3102_s1 + $0x310] sm:$0xf0]  ;;  %v1506_v17 = vor.u32 %v2043_v63, %v1503_v0  ;;  %v1734_v36 = vor.u32 %v2102_v31, %v1733_v30  ;;  %v2034_v38 = vld [vmem:[%s3102_s1 + $0xb4] sm:$0xf0] }
  0x37   :  { %908 = vmatpush.bf16.msrb.mxu3 %v1810_v40  ;;  %v2107_v6 = vld [vmem:[%s3102_s1 + $0x304] sm:$0xf]  ;;  %v1634_v18 = vor.u32 %v2075_v2, %v1631_v4  ;;  %v1589_v39 = vld [vmem:[%s3102_s1 + $0x1a8] sm:$0xf]  ;;  %v1862_v40 = vor.u32 %v2134_v33, %v1861_v32  ;;  %v2066_v41 = vld [vmem:[%s3102_s1 + $0x1b4] sm:$0xf0] }
  0x38   :  { %870 = vmatpush.bf16.msrb.mxu0 %v1410_v46  ;;  %v1762_v21 = vor.u32 %v2107_v6, %v1759_v7  ;;  %v1717_v42 = vld [vmem:[%s3102_s1 + $0x2a8] sm:$0xf]  ;;  %v2098_v43 = vld [vmem:[%s3102_s1 + $0x2b4] sm:$0xf0]  ;;  %v1462_v46 = vor.u32 %v2034_v38, %v1461_v37 }
  0x39   :  { %883 = vmatpush.bf16.msrb.mxu1 %v1538_v47  ;;  %v1845_v44 = vld [vmem:[%s3102_s1 + $0x3a8] sm:$0xf]  ;;  %v2130_v45 = vld [vmem:[%s3102_s1 + $0x3b4] sm:$0xf0]  ;;  %v1590_v47 = vor.u32 %v2066_v41, %v1589_v39 }
  0x3a   :  { %896 = vmatpush.bf16.msrb.mxu2 %v1666_v48  ;;  %v1718_v48 = vor.u32 %v2098_v43, %v1717_v42  ;;  %v1445_v49 = vld [vmem:[%s3102_s1 + $0x88] sm:$0xf]  ;;  %v2030_v50 = vld [vmem:[%s3102_s1 + $0x94] sm:$0xf0] }
  0x3b   :  { %909 = vmatpush.bf16.msrb.mxu3 %v1794_v52  ;;  %v1573_v51 = vld [vmem:[%s3102_s1 + $0x188] sm:$0xf]  ;;  %v1846_v52 = vor.u32 %v2130_v45, %v1845_v44  ;;  %v2062_v53 = vld [vmem:[%s3102_s1 + $0x194] sm:$0xf0] }
  0x3c   :  { %871 = vmatpush.bf16.msrb.mxu0 %v1394_v58  ;;  %v1701_v54 = vld [vmem:[%s3102_s1 + $0x288] sm:$0xf]  ;;  %v2094_v55 = vld [vmem:[%s3102_s1 + $0x294] sm:$0xf0]  ;;  %v1446_v58 = vor.u32 %v2030_v50, %v1445_v49  ;;  %v1574_v59 = vor.u32 %v2062_v53, %v1573_v51  ;;  %v1623_v50 = vld [vmem:[%s3102_s1 + $0x1f8] sm:$0xf0] }
  0x3d   :  { %884 = vmatpush.bf16.msrb.mxu1 %v1522_v61  ;;  %v1829_v56 = vld [vmem:[%s3102_s1 + $0x388] sm:$0xf]  ;;  %v2126_v57 = vld [vmem:[%s3102_s1 + $0x394] sm:$0xf0]  ;;  %v1702_v60 = vor.u32 %v2094_v55, %v1701_v54  ;;  %v2104_v51 = vld [vmem:[%s3102_s1 + $0x2ec] sm:$0xf] }
  0x3e   :  { %897 = vmatpush.bf16.msrb.mxu2 %v1650_v62  ;;  %v1429_v61 = vld [vmem:[%s3102_s1 + $0x68] sm:$0xf]  ;;  %v2026_v62 = vld [vmem:[%s3102_s1 + $0x74] sm:$0xf0]  ;;  %v1830_v0 = vor.u32 %v2126_v57, %v1829_v56  ;;  %v2136_v55 = vld [vmem:[%s3102_s1 + $0x3ec] sm:$0xf] }
  0x3f   :  { %910 = vmatpush.bf16.msrb.mxu3 %v1778_v3  ;;  %v1557_v63 = vld [vmem:[%s3102_s1 + $0x168] sm:$0xf]  ;;  %v2058_v2 = vld [vmem:[%s3102_s1 + $0x174] sm:$0xf0]  ;;  %v1430_v8 = vor.u32 %v2026_v62, %v1429_v61  ;;  %v1879_v56 = vld [vmem:[%s3102_s1 + $0x3f8] sm:$0xf0] }
  0x40   :  { %872 = vmatpush.bf16.msrb.mxu0 %v1378_v11  ;;  %v1685_v3 = vld [vmem:[%s3102_s1 + $0x268] sm:$0xf]  ;;  %v2090_v4 = vld [vmem:[%s3102_s1 + $0x274] sm:$0xf0]  ;;  %v1558_v9 = vor.u32 %v2058_v2, %v1557_v63  ;;  %v2036_v61 = vld [vmem:[%s3102_s1 + $0xcc] sm:$0xf] }
  0x41   :  { %885 = vmatpush.bf16.msrb.mxu1 %v1506_v17  ;;  %v1813_v6 = vld [vmem:[%s3102_s1 + $0x368] sm:$0xf]  ;;  %v2122_v7 = vld [vmem:[%s3102_s1 + $0x374] sm:$0xf0]  ;;  %v1686_v10 = vor.u32 %v2090_v4, %v1685_v3  ;;  %v1479_v62 = vld [vmem:[%s3102_s1 + $0xd8] sm:$0xf0] }
  0x42   :  { %898 = vmatpush.bf16.msrb.mxu2 %v1634_v18  ;;  %v1413_v11 = vld [vmem:[%s3102_s1 + $0x48] sm:$0xf]  ;;  %v2022_v12 = vld [vmem:[%s3102_s1 + $0x54] sm:$0xf0]  ;;  %v1814_v16 = vor.u32 %v2122_v7, %v1813_v6  ;;  %v2068_v63 = vld [vmem:[%s3102_s1 + $0x1cc] sm:$0xf] }
  0x43   :  { %911 = vmatpush.bf16.msrb.mxu3 %v1762_v21  ;;  %873 = vmatmul.bf16.vlgmr.msrb.gmra.mxu0 %v2480_v14  ;;  %v1541_v13 = vld [vmem:[%s3102_s1 + $0x148] sm:$0xf]  ;;  %v2054_v17 = vld [vmem:[%s3102_s1 + $0x154] sm:$0xf0]  ;;  %v1607_v2 = vld [vmem:[%s3102_s1 + $0x1d8] sm:$0xf0] }
  0x44   :  { %917 = vmatpush.bf16.msra.mxu0 %v1494_v22  ;;  %886 = vmatmul.bf16.vlgmr.msrb.gmra.mxu1 %v2482_v15  ;;  %v1669_v18 = vld [vmem:[%s3102_s1 + $0x248] sm:$0xf]  ;;  %v2086_v19 = vld [vmem:[%s3102_s1 + $0x254] sm:$0xf0]  ;;  %v1414_v22 = vor.u32 %v2022_v12, %v1413_v11  ;;  %v2100_v3 = vld [vmem:[%s3102_s1 + $0x2cc] sm:$0xf] }
  0x45   :  { %930 = vmatpush.bf16.msra.mxu1 %v1622_v23  ;;  %899 = vmatmul.bf16.vlgmr.msrb.gmra.mxu2 %v2457_v1  ;;  %v1797_v20 = vld [vmem:[%s3102_s1 + $0x348] sm:$0xf]  ;;  %v2118_v21 = vld [vmem:[%s3102_s1 + $0x354] sm:$0xf0]  ;;  %v1542_v23 = vor.u32 %v2054_v17, %v1541_v13  ;;  %v1735_v4 = vld [vmem:[%s3102_s1 + $0x2d8] sm:$0xf0] }
  0x46   :  { %943 = vmatpush.bf16.msra.mxu2 %v1750_v24  ;;  %912 = vmatmul.bf16.vlgmr.msrb.gmra.mxu3 %v2468_v5  ;;  %v1670_v24 = vor.u32 %v2086_v19, %v1669_v18  ;;  %v1397_v25 = vld [vmem:[%s3102_s1 + $0x28] sm:$0xf]  ;;  %v2018_v26 = vld [vmem:[%s3102_s1 + $0x34] sm:$0xf0]  ;;  %v2132_v6 = vld [vmem:[%s3102_s1 + $0x3cc] sm:$0xf] }
  0x47   :  { %956 = vmatpush.bf16.msra.mxu3 %v1878_v28  ;;  %v1525_v27 = vld [vmem:[%s3102_s1 + $0x128] sm:$0xf]  ;;  %v1798_v28 = vor.u32 %v2118_v21, %v1797_v20  ;;  %v2050_v29 = vld [vmem:[%s3102_s1 + $0x134] sm:$0xf0]  ;;  %v1863_v7 = vld [vmem:[%s3102_s1 + $0x3d8] sm:$0xf0] }
  0x48   :  { %918 = vmatpush.bf16.msra.mxu0 %v1478_v34  ;;  %v1653_v30 = vld [vmem:[%s3102_s1 + $0x228] sm:$0xf]  ;;  %v2082_v31 = vld [vmem:[%s3102_s1 + $0x234] sm:$0xf0]  ;;  %v1398_v34 = vor.u32 %v2018_v26, %v1397_v25  ;;  %v1526_v37 = vor.u32 %v2050_v29, %v1525_v27  ;;  %v2032_v11 = vld [vmem:[%s3102_s1 + $0xac] sm:$0xf] }
  0x49   :  { %931 = vmatpush.bf16.msra.mxu1 %v1606_v35  ;;  %v1781_v32 = vld [vmem:[%s3102_s1 + $0x328] sm:$0xf]  ;;  %v2114_v33 = vld [vmem:[%s3102_s1 + $0x334] sm:$0xf0]  ;;  %v1654_v38 = vor.u32 %v2082_v31, %v1653_v30  ;;  %v1463_v12 = vld [vmem:[%s3102_s1 + $0xb8] sm:$0xf0] }
  0x4a   :  { %944 = vmatpush.bf16.msra.mxu2 %v1734_v36  ;;  %v1381_v35 = vld [vmem:[%s3102_s1 + $0x8] sm:$0xf]  ;;  %v2014_v36 = vld [vmem:[%s3102_s1 + $0x14] sm:$0xf0]  ;;  %v1782_v42 = vor.u32 %v2114_v33, %v1781_v32  ;;  %v2064_v13 = vld [vmem:[%s3102_s1 + $0x1ac] sm:$0xf] }
  0x4b   :  { %957 = vmatpush.bf16.msra.mxu3 %v1862_v40  ;;  %v1509_v39 = vld [vmem:[%s3102_s1 + $0x108] sm:$0xf]  ;;  %v2046_v40 = vld [vmem:[%s3102_s1 + $0x114] sm:$0xf0]  ;;  %v1382_v49 = vor.u32 %v2014_v36, %v1381_v35  ;;  %v1591_v17 = vld [vmem:[%s3102_s1 + $0x1b8] sm:$0xf0] }
  0x4c   :  { %919 = vmatpush.bf16.msra.mxu0 %v1462_v46  ;;  %v1637_v41 = vld [vmem:[%s3102_s1 + $0x208] sm:$0xf]  ;;  %v2078_v43 = vld [vmem:[%s3102_s1 + $0x214] sm:$0xf0]  ;;  %v2040_v46 = vld [vmem:[%s3102_s1 + $0xec] sm:$0xf]  ;;  %v1510_v53 = vor.u32 %v2046_v40, %v1509_v39 }
  0x4d   :  { %932 = vmatpush.bf16.msra.mxu1 %v1590_v47  ;;  %v1765_v44 = vld [vmem:[%s3102_s1 + $0x308] sm:$0xf]  ;;  %v2110_v45 = vld [vmem:[%s3102_s1 + $0x314] sm:$0xf0]  ;;  %v1495_v47 = vld [vmem:[%s3102_s1 + $0xf8] sm:$0xf0]  ;;  %v1638_v54 = vor.u32 %v2078_v43, %v1637_v41 }
  0x4e   :  { %945 = vmatpush.bf16.msra.mxu2 %v1718_v48  ;;  %v2072_v48 = vld [vmem:[%s3102_s1 + $0x1ec] sm:$0xf]  ;;  %v1766_v57 = vor.u32 %v2110_v45, %v1765_v44  ;;  %v1719_v19 = vld [vmem:[%s3102_s1 + $0x2b8] sm:$0xf0] }
  0x4f   :  { %958 = vmatpush.bf16.msra.mxu3 %v1846_v52  ;;  %v1751_v52 = vld [vmem:[%s3102_s1 + $0x2f8] sm:$0xf0]  ;;  %v2096_v18 = vld [vmem:[%s3102_s1 + $0x2ac] sm:$0xf] }
  0x50   :  { %920 = vmatpush.bf16.msra.mxu0 %v1446_v58  ;;  %v1498_v58 = vor.u32 %v2040_v46, %v1495_v47  ;;  %v2128_v20 = vld [vmem:[%s3102_s1 + $0x3ac] sm:$0xf]  ;;  %v1847_v21 = vld [vmem:[%s3102_s1 + $0x3b8] sm:$0xf0] }
  0x51   :  { %933 = vmatpush.bf16.msra.mxu1 %v1574_v59  ;;  %v1626_v59 = vor.u32 %v2072_v48, %v1623_v50  ;;  %v2028_v25 = vld [vmem:[%s3102_s1 + $0x8c] sm:$0xf]  ;;  %v1447_v26 = vld [vmem:[%s3102_s1 + $0x98] sm:$0xf0] }
  0x52   :  { %946 = vmatpush.bf16.msra.mxu2 %v1702_v60  ;;  %v1754_v60 = vor.u32 %v2104_v51, %v1751_v52  ;;  %v2060_v27 = vld [vmem:[%s3102_s1 + $0x18c] sm:$0xf]  ;;  %v1575_v29 = vld [vmem:[%s3102_s1 + $0x198] sm:$0xf0] }
  0x53   :  { %959 = vmatpush.bf16.msra.mxu3 %v1830_v0  ;;  %v1882_v0 = vor.u32 %v2136_v55, %v1879_v56  ;;  %v2092_v30 = vld [vmem:[%s3102_s1 + $0x28c] sm:$0xf]  ;;  %v1703_v31 = vld [vmem:[%s3102_s1 + $0x298] sm:$0xf0]  ;;  %v1578_v35 = vor.u32 %v2060_v27, %v1575_v29 }
  0x54   :  { %921 = vmatpush.bf16.msra.mxu0 %v1430_v8  ;;  %v1482_v8 = vor.u32 %v2036_v61, %v1479_v62  ;;  %v2124_v32 = vld [vmem:[%s3102_s1 + $0x38c] sm:$0xf]  ;;  %v1831_v33 = vld [vmem:[%s3102_s1 + $0x398] sm:$0xf0]  ;;  %v1706_v36 = vor.u32 %v2092_v30, %v1703_v31  ;;  %v2143_v30 = vld [vmem:[%s3104_s3 + $0x20] sm:$0xff] }
  0x55   :  { %934 = vmatpush.bf16.msra.mxu1 %v1558_v9  ;;  %v1610_v9 = vor.u32 %v2068_v63, %v1607_v2  ;;  %v2056_v39 = vld [vmem:[%s3102_s1 + $0x16c] sm:$0xf]  ;;  %v1834_v40 = vor.u32 %v2124_v32, %v1831_v33  ;;  %v1559_v41 = vld [vmem:[%s3102_s1 + $0x178] sm:$0xf0]  ;;  %v2151_v31 = vld [vmem:[%s3104_s3 + $0x60] sm:$0xff] }
  0x56   :  { %947 = vmatpush.bf16.msra.mxu2 %v1686_v10  ;;  %v1738_v10 = vor.u32 %v2100_v3, %v1735_v4  ;;  %v1687_v43 = vld [vmem:[%s3102_s1 + $0x278] sm:$0xf0]  ;;  %v2120_v44 = vld [vmem:[%s3102_s1 + $0x36c] sm:$0xf]  ;;  %v1562_v47 = vor.u32 %v2056_v39, %v1559_v41  ;;  %v3039_v39 = vld [vmem:[%s3105_s2] sm:$0xf] }
  0x57   :  { %960 = vmatpush.bf16.msra.mxu3 %v1814_v16  ;;  %v1866_v16 = vor.u32 %v2132_v6, %v1863_v7  ;;  %v1815_v45 = vld [vmem:[%s3102_s1 + $0x378] sm:$0xf0]  ;;  %v2052_v51 = vld [vmem:[%s3102_s1 + $0x14c] sm:$0xf] }
  0x58   :  { %922 = vmatpush.bf16.msra.mxu0 %v1414_v22  ;;  %v1466_v22 = vor.u32 %v2032_v11, %v1463_v12  ;;  %v1415_v50 = vld [vmem:[%s3102_s1 + $0x58] sm:$0xf0]  ;;  %v1818_v52 = vor.u32 %v2120_v44, %v1815_v45  ;;  %v2116_v56 = vld [vmem:[%s3102_s1 + $0x34c] sm:$0xf] }
  0x59   :  { %935 = vmatpush.bf16.msra.mxu1 %v1542_v23  ;;  %v1594_v23 = vor.u32 %v2064_v13, %v1591_v17  ;;  %v1671_v55 = vld [vmem:[%s3102_s1 + $0x258] sm:$0xf0]  ;;  %v2016_v61 = vld [vmem:[%s3102_s1 + $0x2c] sm:$0xf] }
  0x5a   :  { %948 = vmatpush.bf16.msra.mxu2 %v1670_v24  ;;  %v1722_v24 = vor.u32 %v2096_v18, %v1719_v19  ;;  %v1399_v62 = vld [vmem:[%s3102_s1 + $0x38] sm:$0xf0]  ;;  %v2048_v63 = vld [vmem:[%s3102_s1 + $0x12c] sm:$0xf] }
  0x5b   :  { %961 = vmatpush.bf16.msra.mxu3 %v1798_v28  ;;  %v1850_v28 = vor.u32 %v2128_v20, %v1847_v21  ;;  %v1527_v2 = vld [vmem:[%s3102_s1 + $0x138] sm:$0xf0]  ;;  %v2080_v3 = vld [vmem:[%s3102_s1 + $0x22c] sm:$0xf] }
  0x5c   :  { %923 = vmatpush.bf16.msra.mxu0 %v1398_v34  ;;  %v1450_v34 = vor.u32 %v2028_v25, %v1447_v26  ;;  %v1655_v4 = vld [vmem:[%s3102_s1 + $0x238] sm:$0xf0]  ;;  %v2112_v6 = vld [vmem:[%s3102_s1 + $0x32c] sm:$0xf] }
  0x5d   :  { %936 = vmatpush.bf16.msra.mxu1 %v1526_v37  ;;  %v2024_v37 = vld [vmem:[%s3102_s1 + $0x6c] sm:$0xf]  ;;  %v1783_v7 = vld [vmem:[%s3102_s1 + $0x338] sm:$0xf0] }
  0x5e   :  { %949 = vmatpush.bf16.msra.mxu2 %v1654_v38  ;;  %v1431_v38 = vld [vmem:[%s3102_s1 + $0x78] sm:$0xf0]  ;;  %v2012_v11 = vld [vmem:[%s3102_s1 + $0xc] sm:$0xf] }
  0x5f   :  { %962 = vmatpush.bf16.msra.mxu3 %v1782_v42  ;;  %v2088_v42 = vld [vmem:[%s3102_s1 + $0x26c] sm:$0xf]  ;;  %v1434_v46 = vor.u32 %v2024_v37, %v1431_v38  ;;  %v1383_v12 = vld [vmem:[%s3102_s1 + $0x18] sm:$0xf0] }
  0x60   :  { %924 = vmatpush.bf16.msra.mxu0 %v1382_v49  ;;  %v1690_v48 = vor.u32 %v2088_v42, %v1687_v43  ;;  %v2020_v49 = vld [vmem:[%s3102_s1 + $0x4c] sm:$0xf]  ;;  %v1511_v17 = vld [vmem:[%s3102_s1 + $0x118] sm:$0xf0]  ;;  %v1038_v43 = vperm.slane %v3039_v39, 0 }
  0x61   :  { %937 = vmatpush.bf16.msra.mxu1 %v1510_v53  ;;  %v1543_v53 = vld [vmem:[%s3102_s1 + $0x158] sm:$0xf0]  ;;  %v2044_v13 = vld [vmem:[%s3102_s1 + $0x10c] sm:$0xf] }
  0x62   :  { %950 = vmatpush.bf16.msra.mxu2 %v1638_v54  ;;  %v2084_v54 = vld [vmem:[%s3102_s1 + $0x24c] sm:$0xf]  ;;  %v1639_v19 = vld [vmem:[%s3102_s1 + $0x218] sm:$0xf0] }
  0x63   :  { %963 = vmatpush.bf16.msra.mxu3 %v1766_v57  ;;  %925 = vmatmul.bf16.vlgmr.msra.gmra.mxu0 %v2480_v14  ;;  %v1799_v57 = vld [vmem:[%s3102_s1 + $0x358] sm:$0xf0]  ;;  %v2076_v18 = vld [vmem:[%s3102_s1 + $0x20c] sm:$0xf] }
  0x64   :  { %969 = vmatpush.bf16.msrb.mxu0 %v1498_v58  ;;  %938 = vmatmul.bf16.vlgmr.msra.gmra.mxu1 %v2482_v15  ;;  %v1418_v58 = vor.u32 %v2020_v49, %v1415_v50  ;;  %v2108_v20 = vld [vmem:[%s3102_s1 + $0x30c] sm:$0xf]  ;;  %v1767_v21 = vld [vmem:[%s3102_s1 + $0x318] sm:$0xf0] }
  0x65   :  { %982 = vmatpush.bf16.msrb.mxu1 %v1626_v59  ;;  %951 = vmatmul.bf16.vlgmr.msra.gmra.mxu2 %v2457_v1  ;;  %v1546_v59 = vor.u32 %v2052_v51, %v1543_v53  ;;  %v1770_v25 = vor.u32 %v2108_v20, %v1767_v21  ;;  %v2146_v26 = vld [vmem:[%s3104_s3 + $0x38] sm:$0xff]  ;;  %v2144_v29 = vld [vmem:[%s3104_s3 + $0x28] sm:$0xff]  ;;  %v2161_v51 = vld [vmem:[%s3104_s3 + $0xb0] sm:$0xff] }
  0x66   :  { %995 = vmatpush.bf16.msrb.mxu2 %v1754_v60  ;;  %964 = vmatmul.bf16.vlgmr.msra.gmra.mxu3 %v2468_v5  ;;  %v1674_v60 = vor.u32 %v2084_v54, %v1671_v55  ;;  %v2154_v27 = vld [vmem:[%s3104_s3 + $0x78] sm:$0xff]  ;;  %v2140_v32 = vld [vmem:[%s3104_s3 + $0x8] sm:$0xff]  ;;  %v2167_v20 = vld [vmem:[%s3104_s3 + $0xe0] sm:$0xff] }
  0x67   :  { %1008 = vmatpush.bf16.msrb.mxu3 %v1882_v0  ;;  %v1802_v0 = vor.u32 %v2116_v56, %v1799_v57  ;;  %v2150_v33 = vld [vmem:[%s3104_s3 + $0x58] sm:$0xff]  ;;  %v2148_v42 = vld [vmem:[%s3104_s3 + $0x48] sm:$0xff]  ;;  %v2159_v57 = vld [vmem:[%s3104_s3 + $0xa0] sm:$0xff] }
  0x68   :  { %970 = vmatpush.bf16.msrb.mxu0 %v1482_v8  ;;  %v1402_v8 = vor.u32 %v2016_v61, %v1399_v62  ;;  %v2160_v56 = vld [vmem:[%s3104_s3 + $0xa8] sm:$0xff]  ;;  %v2157_v62 = vld [vmem:[%s3104_s3 + $0x90] sm:$0xff]  ;;  %v2166_v21 = vld [vmem:[%s3104_s3 + $0xd8] sm:$0xff] }
  0x69   :  { %983 = vmatpush.bf16.msrb.mxu1 %v1610_v9  ;;  %v1530_v9 = vor.u32 %v2048_v63, %v1527_v2 }
  0x6a   :  { %996 = vmatpush.bf16.msrb.mxu2 %v1738_v10  ;;  %v1658_v10 = vor.u32 %v2080_v3, %v1655_v4  ;;  %v1039_v3 = vperm.slane %v3039_v39, 1  ;;  %v2156_v4 = vld [vmem:[%s3104_s3 + $0x88] sm:$0xff] }
  0x6b   :  { %1009 = vmatpush.bf16.msrb.mxu3 %v1866_v16  ;;  %v1786_v16 = vor.u32 %v2112_v6, %v1783_v7 }
  0x6c   :  { %971 = vmatpush.bf16.msrb.mxu0 %v1466_v22  ;;  %v1386_v22 = vor.u32 %v2012_v11, %v1383_v12  ;;  %v2170_v12 = vld [vmem:[%s3104_s3 + $0xf8] sm:$0xff] }
  0x6d   :  { %984 = vmatpush.bf16.msrb.mxu1 %v1594_v23  ;;  %v1514_v23 = vor.u32 %v2044_v13, %v1511_v17 }
  0x6e   :  { %997 = vmatpush.bf16.msrb.mxu2 %v1722_v24  ;;  %v1642_v24 = vor.u32 %v2076_v18, %v1639_v19  ;;  %v2169_v18 = vld [vmem:[%s3104_s3 + $0xf0] sm:$0xff]  ;;  %v2168_v19 = vld [vmem:[%s3104_s3 + $0xe8] sm:$0xff] }
  0x6f   :  { %1010 = vmatpush.bf16.msrb.mxu3 %v1850_v28  ;;  %v2145_v28 = vld [vmem:[%s3104_s3 + $0x30] sm:$0xff] }
  0x70   :  { %972 = vmatpush.bf16.msrb.mxu0 %v1450_v34  ;;  %v2139_v34 = vld [vmem:[%s3104_s3] sm:$0xff] }
  0x71   :  { %985 = vmatpush.bf16.msrb.mxu1 %v1578_v35 }
  0x72   :  { %998 = vmatpush.bf16.msrb.mxu2 %v1706_v36  ;;  %v2149_v36 = vld [vmem:[%s3104_s3 + $0x50] sm:$0xff] }
  0x73   :  { %1011 = vmatpush.bf16.msrb.mxu3 %v1834_v40 }
  0x74   :  { %973 = vmatpush.bf16.msrb.mxu0 %v1434_v46 }
  0x75   :  { %986 = vmatpush.bf16.msrb.mxu1 %v1562_v47  ;;  %v2147_v47 = vld [vmem:[%s3104_s3 + $0x40] sm:$0xff] }
  0x76   :  { %999 = vmatpush.bf16.msrb.mxu2 %v1690_v48  ;;  %v2162_v48 = vld [vmem:[%s3104_s3 + $0xb8] sm:$0xff] }
  0x77   :  { %1012 = vmatpush.bf16.msrb.mxu3 %v1818_v52 }
  0x78   :  { %974 = vmatpush.bf16.msrb.mxu0 %v1418_v58  ;;  %v2158_v58 = vld [vmem:[%s3104_s3 + $0x98] sm:$0xff] }
  0x79   :  { %987 = vmatpush.bf16.msrb.mxu1 %v1546_v59 }
  0x7a   :  { %1000 = vmatpush.bf16.msrb.mxu2 %v1674_v60 }
  0x7b   :  { %1013 = vmatpush.bf16.msrb.mxu3 %v1802_v0 }
  0x7c   :  { %975 = vmatpush.bf16.msrb.mxu0 %v1402_v8 }
  0x7d   :  { %988 = vmatpush.bf16.msrb.mxu1 %v1530_v9 }
  0x7e   :  { %1001 = vmatpush.bf16.msrb.mxu2 %v1658_v10  ;;  %v2155_v10 = vld [vmem:[%s3104_s3 + $0x80] sm:$0xff] }
  0x7f   :  { %1014 = vmatpush.bf16.msrb.mxu3 %v1786_v16 }
  0x80   :  { %976 = vmatpush.bf16.msrb.mxu0 %v1386_v22 }
  0x81   :  { %989 = vmatpush.bf16.msrb.mxu1 %v1514_v23 }
  0x82   :  { %1002 = vmatpush.bf16.msrb.mxu2 %v1642_v24 }
  0x83   :  { %1015 = vmatpush.bf16.msrb.mxu3 %v1770_v25  ;;  %977 = vmatmul.bf16.vlgmr.msrb.gmra.mxu0 %v2480_v14  ;;  %v2153_v14 = vld [vmem:[%s3104_s3 + $0x70] sm:$0xff] }
  0x84   :  { %1314 = vmatpush.bf16.msra.mxu0 %v2146_v26  ;;  %990 = vmatmul.bf16.vlgmr.msrb.gmra.mxu1 %v2482_v15  ;;  %v2141_v15 = vld [vmem:[%s3104_s3 + $0x10] sm:$0xff] }
  0x85   :  { %1327 = vmatpush.bf16.msra.mxu1 %v2154_v27  ;;  %1003 = vmatmul.bf16.vlgmr.msrb.gmra.mxu2 %v2457_v1  ;;  %v2142_v1 = vld [vmem:[%s3104_s3 + $0x18] sm:$0xff]  ;;  %v2165_v25 = vld [vmem:[%s3104_s3 + $0xd0] sm:$0xff] }
  0x86   :  { %1016 = vmatmul.bf16.vlgmr.msrb.gmra.mxu3 %v2468_v5  ;;  %v2152_v5 = vld [vmem:[%s3104_s3 + $0x68] sm:$0xff]  ;;  %1340 = vmatpush.bf16.msra.mxu2 %v2162_v48 }
  0x87   :  { %1353 = vmatpush.bf16.msra.mxu3 %v2170_v12 }
  0x88   :  { %1315 = vmatpush.bf16.msra.mxu0 %v2145_v28 }
  0x89   :  { %1328 = vmatpush.bf16.msra.mxu1 %v2153_v14 }
  0x8a   :  { %1341 = vmatpush.bf16.msra.mxu2 %v2161_v51 }
  0x8b   :  { %1354 = vmatpush.bf16.msra.mxu3 %v2169_v18 }
  0x8c   :  { %1316 = vmatpush.bf16.msra.mxu0 %v2144_v29  ;;  %v1040_v29 = vperm.slane %v3039_v39, 2 }
  0x8d   :  { %1329 = vmatpush.bf16.msra.mxu1 %v2152_v5 }
  0x8e   :  { %1342 = vmatpush.bf16.msra.mxu2 %v2160_v56 }
  0x8f   :  { %1355 = vmatpush.bf16.msra.mxu3 %v2168_v19 }
  0x90   :  { %1317 = vmatpush.bf16.msra.mxu0 %v2143_v30  ;;  %v2164_v30 = vld [vmem:[%s3104_s3 + $0xc8] sm:$0xff] }
  0x91   :  { %1330 = vmatpush.bf16.msra.mxu1 %v2151_v31  ;;  %v2163_v31 = vld [vmem:[%s3104_s3 + $0xc0] sm:$0xff] }
  0x92   :  { %1343 = vmatpush.bf16.msra.mxu2 %v2159_v57 }
  0x93   :  { %1356 = vmatpush.bf16.msra.mxu3 %v2167_v20 }
  0x94   :  { %1318 = vmatpush.bf16.msra.mxu0 %v2142_v1 }
  0x95   :  { %1331 = vmatpush.bf16.msra.mxu1 %v2150_v33 }
  0x96   :  { %1344 = vmatpush.bf16.msra.mxu2 %v2158_v58 }
  0x97   :  { %1357 = vmatpush.bf16.msra.mxu3 %v2166_v21 }
  0x98   :  { %1319 = vmatpush.bf16.msra.mxu0 %v2141_v15 }
  0x99   :  { %1332 = vmatpush.bf16.msra.mxu1 %v2149_v36 }
  0x9a   :  { %1345 = vmatpush.bf16.msra.mxu2 %v2157_v62 }
  0x9b   :  { %1358 = vmatpush.bf16.msra.mxu3 %v2165_v25 }
  0x9c   :  { %1320 = vmatpush.bf16.msra.mxu0 %v2140_v32 }
  0x9d   :  { %1333 = vmatpush.bf16.msra.mxu1 %v2148_v42 }
  0x9e   :  { %1346 = vmatpush.bf16.msra.mxu2 %v2156_v4 }
  0x9f   :  { %1359 = vmatpush.bf16.msra.mxu3 %v2164_v30 }
  0xa0   :  { %1321 = vmatpush.bf16.msra.mxu0 %v2139_v34 }
  0xa1   :  { %1334 = vmatpush.bf16.msra.mxu1 %v2147_v47 }
  0xa2   :  { %1347 = vmatpush.bf16.msra.mxu2 %v2155_v10 }
  0xa3   :  { %1360 = vmatpush.bf16.msra.mxu3 %v2163_v31 }
  0xa4   :  { %v822_v35 = vpop.f32.mrf.mxu0 }
  0xa5   :  { %v835_v37 = vpop.f32.mrf.mxu1 }
  0xa6   :  { %v836_v38 = vadd.f32 %v835_v37, %v822_v35 }
  0xa8   :  { %v848_v40 = vpop.f32.mrf.mxu2 }
  0xa9   :  { %v849_v41 = vadd.f32 %v848_v40, %v836_v38  ;;  %v861_v44 = vpop.f32.mrf.mxu3 }
  0xab   :  { %v862_v45 = vadd.f32 %v861_v44, %v849_v41 }
  0xac   :  { %v824_v46 = vpop.f32.mrf.mxu0 }
  0xad   :  { %v1046_v49 = vadd.f32 %v1038_v43, %v862_v45  ;;  %v837_v50 = vpop.f32.mrf.mxu1  ;;  %v1041_v43 = vperm.slane %v3039_v39, 3 }
  0xaf   :  { %v1050_v52 = vmax.f32 %v1046_v49, 0.0 }
  0xb0   :  { %v850_v53 = vpop.f32.mrf.mxu2 }
  0xb1   :  { %v1054_v54 = vpack.c.bf16 %v1050_v52, %v1050_v52  ;;  %v863_v55 = vpop.f32.mrf.mxu3 }
  0xb3   :  { %1322 = vmatmul.bf16.vlgmr.msra.gmra.mxu0 %v1054_v54 }
  0xc0   :  { %v874_v59 = vpop.f32.mrf.mxu0 }
  0xc1   :  { %v887_v60 = vpop.f32.mrf.mxu1 }
  0xc2   :  { %v888_v61 = vadd.f32 %v887_v60, %v874_v59 }
  0xc8   :  { %v900_v63 = vpop.f32.mrf.mxu2  ;;  %v876_v7 = vpop.f32.mrf.mxu0 }
  0xc9   :  { %v901_v0 = vadd.f32 %v900_v63, %v888_v61  ;;  %v913_v2 = vpop.f32.mrf.mxu3  ;;  %v889_v8 = vpop.f32.mrf.mxu1 }
  0xcb   :  { %v914_v6 = vadd.f32 %v913_v2, %v901_v0 }
  0xcd   :  { %v1047_v9 = vadd.f32 %v1039_v3, %v914_v6 }
  0xcf   :  { %v1051_v11 = vmax.f32 %v1047_v9, 0.0 }
  0xd0   :  { %v902_v13 = vpop.f32.mrf.mxu2 }
  0xd1   :  { %v1055_v16 = vpack.c.bf16 %v1051_v11, %v1051_v11  ;;  %v915_v17 = vpop.f32.mrf.mxu3 }
  0xd3   :  { %1335 = vmatmul.bf16.vlgmr.msra.gmra.mxu1 %v1055_v16 }
  0xe0   :  { %v926_v22 = vpop.f32.mrf.mxu0 }
  0xe1   :  { %v939_v23 = vpop.f32.mrf.mxu1 }
  0xe2   :  { %v940_v24 = vadd.f32 %v939_v23, %v926_v22 }
  0xe8   :  { %v952_v26 = vpop.f32.mrf.mxu2  ;;  %v928_v1 = vpop.f32.mrf.mxu0 }
  0xe9   :  { %v953_v27 = vadd.f32 %v952_v26, %v940_v24  ;;  %v965_v28 = vpop.f32.mrf.mxu3  ;;  %v941_v5 = vpop.f32.mrf.mxu1 }
  0xeb   :  { %v966_v14 = vadd.f32 %v965_v28, %v953_v27 }
  0xed   :  { %v1048_v15 = vadd.f32 %v1040_v29, %v966_v14 }
  0xef   :  { %v1052_v32 = vmax.f32 %v1048_v15, 0.0 }
  0xf0   :  { %v954_v33 = vpop.f32.mrf.mxu2 }
  0xf1   :  { %v1056_v34 = vpack.c.bf16 %v1052_v32, %v1052_v32  ;;  %v967_v35 = vpop.f32.mrf.mxu3 }
  0xf3   :  { %1348 = vmatmul.bf16.vlgmr.msra.gmra.mxu2 %v1056_v34 }
 0x100   :  { %v978_v36 = vpop.f32.mrf.mxu0 }
 0x101   :  { %v991_v37 = vpop.f32.mrf.mxu1 }
 0x102   :  { %v992_v38 = vadd.f32 %v991_v37, %v978_v36 }
 0x108   :  { %v1004_v40 = vpop.f32.mrf.mxu2  ;;  %v980_v44 = vpop.f32.mrf.mxu0 }
 0x109   :  { %v1005_v41 = vadd.f32 %v1004_v40, %v992_v38  ;;  %v1017_v42 = vpop.f32.mrf.mxu3  ;;  %v993_v45 = vpop.f32.mrf.mxu1 }
 0x10b   :  { %v1018_v46 = vadd.f32 %v1017_v42, %v1005_v41 }
 0x10d   :  { %v1049_v47 = vadd.f32 %v1041_v43, %v1018_v46 }
 0x10f   :  { %v1053_v48 = vmax.f32 %v1049_v47, 0.0 }
 0x110   :  { %v1006_v49 = vpop.f32.mrf.mxu2 }
 0x111   :  { %v1057_v50 = vpack.c.bf16 %v1053_v48, %v1053_v48  ;;  %v1019_v51 = vpop.f32.mrf.mxu3 }
 0x113   :  { %1361 = vmatmul.bf16.vlgmr.msra.gmra.mxu3 %v1057_v50 }
 0x130   :  { %v1323_v52 = vpop.f32.mrf.mxu0 }
 0x138   :  { %v1325_v53 = vpop.f32.mrf.mxu0 }
 0x150   :  { %v1336_v54 = vpop.f32.mrf.mxu1 }
 0x151   :  { %v1337_v58 = vadd.f32 %v1336_v54, %v1323_v52 }
 0x158   :  { %v1338_v55 = vpop.f32.mrf.mxu1 }
 0x176   :  { %v1349_v56 = vpop.f32.mrf.mxu2 }
 0x177   :  { %v1350_v59 = vadd.f32 %v1349_v56, %v1337_v58 }
 0x17e   :  { %v1351_v57 = vpop.f32.mrf.mxu2 }
 0x196   :  { %v1362_v60 = vpop.f32.mrf.mxu3 }
 0x197   :  { %v1363_v61 = vadd.f32 %v1362_v60, %v1350_v59 }
 0x199   :  { %1366 = vst [vmem:[%s3106_s4] sm:$0xff] %v1363_v61 }
 0x19e   :  { %v1364_v39 = vpop.f32.mrf.mxu3 }

</bundles_post_ra>
